<compile_context>
chip_gen: v7x
topology: tpu7x:2x2x1
jax: 0.10.0
libtpu: 0.0.40
codegen_flags: <defaults>
</compile_context>

<pallas_src>
import functools

import numpy as np
import jax
import jax.numpy as jnp
from jax.experimental import pallas as pl
from jax.experimental.pallas import tpu as pltpu


def _make_divisible(v, divisor, min_value=None):
    if min_value is None:
        min_value = divisor
    new_v = max(min_value, int(v + divisor / 2) // divisor * divisor)
    if new_v < 0.9 * v:
        new_v += divisor
    return new_v


def _hardswish(x):
    # PyTorch nn.Hardswish: x * relu6(x + 3) / 6
    return x * jnp.clip(x + 3.0, 0.0, 6.0) * (1.0 / 6.0)


def _inverted_residual_kernel(
    x_ref,                     # (1, Cin, HW)  bf16
    w_exp_ref,                 # (Cexp, Cin)   bf16  (BN scale folded in)
    b_exp_ref,                 # (Cexp, 1)     f32   folded-BN bias
    w_dw_ref,                  # (Cexp, K*K)   f32   depthwise taps (BN scale folded in)
    b_dw_ref,                  # (Cexp, 1)     f32
    mask_ref,                  # (K*K, HW)     f32   precomputed border masks
    w_se1_ref, b_se1_ref,      # (Cexp, Cred), (1, Cred)   f32
    w_se2_ref, b_se2_ref,      # (Cexp, Cred), (Cexp, 1)   f32
    w_proj_ref,                # (Cout, Cexp)  bf16  (BN scale folded in)
    b_proj_ref,                # (Cout, 1)     f32
    o_ref,                     # (1, Cout, HW) f32
    *, K, H, W, use_residual):
    HW = H * W
    p = (K - 1) // 2

    x = x_ref[0]                                           # (Cin, HW) bf16

    # ---- expand 1x1 conv (MXU, bf16 operands / f32 acc) + folded BN + Hardswish ----
    y = jnp.dot(w_exp_ref[...], x, preferred_element_type=jnp.float32)
    y = _hardswish(y + b_exp_ref[...])                     # (Cexp, HW) f32

    # ---- depthwise KxK conv, stride 1, "same" padding: lane rolls + border masks ----
    # TODO(synk): stride > 1 depthwise path not implemented (residual requires stride==1)
    w_dw = w_dw_ref[...]                                   # (Cexp, K*K), BN scale folded
    center = p * K + p
    # Fold the BN bias into the accumulator init; center tap needs no roll/mask.
    dw_acc = y * w_dw[:, center:center + 1] + b_dw_ref[...]
    for kh in range(K):
        for kw in range(K):
            dh, dwo = kh - p, kw - p
            if dh == 0 and dwo == 0:
                continue
            tap = kh * K + kw
            off = dh * W + dwo
            shifted = pltpu.roll(y, (-off) % HW, axis=1)   # shifted[i] = y[i + off]
            mask = mask_ref[tap:tap + 1, :]                # (1, HW) precomputed
            dw_acc = dw_acc + (shifted * mask) * w_dw[:, tap:tap + 1]
    dw_act = _hardswish(dw_acc)                            # (Cexp, HW)

    # ---- Squeeze-and-Excitation (VPU broadcast-mul + XLU reductions, no tiny matmuls) ----
    pooled = jnp.mean(dw_act, axis=1, keepdims=True)                    # (Cexp, 1)
    se_h = jnp.sum(w_se1_ref[...] * pooled, axis=0, keepdims=True)      # (1, Cred)
    se_h = jnp.maximum(se_h + b_se1_ref[...], 0.0)                      # ReLU
    se = jnp.sum(w_se2_ref[...] * se_h, axis=1, keepdims=True)          # (Cexp, 1)
    se = jax.nn.sigmoid(se + b_se2_ref[...])
    dw_act = dw_act * se

    # ---- project 1x1 conv (MXU, bf16 operands / f32 acc) + folded BN (no activation) ----
    z = jnp.dot(w_proj_ref[...], dw_act.astype(jnp.bfloat16),
                preferred_element_type=jnp.float32)                     # (Cout, HW)
    z = z + b_proj_ref[...]

    if use_residual:
        z = z + x.astype(jnp.float32)
    o_ref[0] = z


def inverted_residual_pallas(x_nchw, params, *, kernel_size, stride, use_residual):
    assert stride == 1, "only stride=1 is implemented"
    B, Cin, H, W = x_nchw.shape
    HW = H * W
    Cout = params["w_proj"].shape[0]
    K = kernel_size
    p = (K - 1) // 2

    # NCHW reshaped to (B, C, H*W) is already the lane-dense layout the kernel wants.
    x = x_nchw.reshape(B, Cin, HW).astype(jnp.bfloat16)

    # Fold the (inference-mode) BN scales into the conv weights; biases stay separate.
    w_exp = (params["w_exp"] * params["s_exp"]).astype(jnp.bfloat16)     # (Cexp, Cin)
    w_dw = params["w_dw"] * params["s_dw"]                               # (Cexp, K*K) f32
    w_proj = (params["w_proj"] * params["s_proj"]).astype(jnp.bfloat16)  # (Cout, Cexp)

    # Precomputed depthwise border masks: mask[tap, h*W+w] = 1 iff (h+dh, w+dw) is inside.
    idx = np.arange(HW)
    hh, ww = idx // W, idx % W
    masks = np.zeros((K * K, HW), np.float32)
    for kh in range(K):
        for kw in range(K):
            dh, dwo = kh - p, kw - p
            m = ((hh + dh >= 0) & (hh + dh < H) & (ww + dwo >= 0) & (ww + dwo < W))
            masks[kh * K + kw] = m.astype(np.float32)
    masks = jnp.asarray(masks)

    param_vals = [w_exp, params["b_exp"],
                  w_dw, params["b_dw"], masks,
                  params["w_se1"], params["b_se1"], params["w_se2"], params["b_se2"],
                  w_proj, params["b_proj"]]

    def full_spec(a):
        nd = a.ndim
        return pl.BlockSpec(a.shape, lambda b, _nd=nd: (0,) * _nd)

    in_specs = [pl.BlockSpec((1, Cin, HW), lambda b: (b, 0, 0))]
    in_specs += [full_spec(a) for a in param_vals]

    kernel = functools.partial(_inverted_residual_kernel,
                               K=K, H=H, W=W, use_residual=use_residual)

    out = pl.pallas_call(
        kernel,
        out_shape=jax.ShapeDtypeStruct((B, Cout, HW), jnp.float32),
        grid=(B,),
        in_specs=in_specs,
        out_specs=pl.BlockSpec((1, Cout, HW), lambda b: (b, 0, 0)),
        compiler_params=pltpu.CompilerParams(dimension_semantics=("parallel",)),
    )(x, *param_vals)

    return out.reshape(B, Cout, H, W)


# ----------------------- pure-JAX reference (for checking) -----------------------
# Mirrors the kernel's numerics: BN scale folded into weights, bf16-rounded matmul
# operands, f32 accumulation.
def inverted_residual_reference(x_nchw, params, *, kernel_size, use_residual):
    f32 = jnp.float32
    xq = x_nchw.astype(jnp.bfloat16).astype(f32)             # (B, Cin, H, W)
    B, Cin, H, W = xq.shape
    K = kernel_size
    p = (K - 1) // 2
    Cexp = params["w_exp"].shape[0]
    Cout = params["w_proj"].shape[0]

    w_exp = (params["w_exp"] * params["s_exp"]).astype(jnp.bfloat16).astype(f32)
    y = jnp.einsum("ec,bchw->behw", w_exp, xq)
    y = _hardswish(y + params["b_exp"].reshape(1, Cexp, 1, 1))

    yp = jnp.pad(y, ((0, 0), (0, 0), (p, p), (p, p)))
    w_dw = params["w_dw"] * params["s_dw"]                    # (Cexp, K*K)
    dw = jnp.zeros_like(y)
    for kh in range(K):
        for kw in range(K):
            dw = dw + yp[:, :, kh:kh + H, kw:kw + W] * w_dw[:, kh * K + kw].reshape(1, Cexp, 1, 1)
    dw = _hardswish(dw + params["b_dw"].reshape(1, Cexp, 1, 1))

    pooled = dw.mean(axis=(2, 3))                             # (B, Cexp)
    se_h = jnp.maximum(pooled @ params["w_se1"] + params["b_se1"], 0.0)        # (B, Cred)
    se = jax.nn.sigmoid(se_h @ params["w_se2"].T + params["b_se2"].reshape(1, Cexp))
    dw = dw * se[:, :, None, None]

    w_proj = (params["w_proj"] * params["s_proj"]).astype(jnp.bfloat16).astype(f32)
    dwq = dw.astype(jnp.bfloat16).astype(f32)
    z = jnp.einsum("oe,behw->bohw", w_proj, dwq)
    z = z + params["b_proj"].reshape(1, Cout, 1, 1)
    if use_residual:
        z = z + xq
    return z


# ----------------------- deterministic parameter construction -----------------------
def make_params(key, in_channels, out_channels, kernel_size, expand_ratio, se_ratio):
    Cexp = _make_divisible(in_channels * expand_ratio, 8)
    se_channels = max(1, int(in_channels * se_ratio))
    reduction_ratio = Cexp // se_channels
    Cred = max(1, Cexp // reduction_ratio)
    eps = 1e-5
    K = kernel_size

    def bn_fold(k, c):
        k1, k2, k3, k4 = jax.random.split(k, 4)
        gamma = jax.random.uniform(k1, (c,), jnp.float32, 0.5, 1.5)
        beta = 0.1 * jax.random.normal(k2, (c,), jnp.float32)
        mean = 0.1 * jax.random.normal(k3, (c,), jnp.float32)
        var = jax.random.uniform(k4, (c,), jnp.float32, 0.5, 1.5)
        scale = gamma / jnp.sqrt(var + eps)
        bias = beta - mean * scale
        return scale.reshape(c, 1), bias.reshape(c, 1)

    ks = jax.random.split(key, 10)
    s_exp, b_exp = bn_fold(ks[0], Cexp)
    s_dw, b_dw = bn_fold(ks[1], Cexp)
    s_proj, b_proj = bn_fold(ks[2], out_channels)

    params = {
        # conv weights stored in lane-dense, matmul-friendly layouts:
        #   expand:    PyTorch (Cexp, Cin, 1, 1)  -> (Cexp, Cin)
        #   depthwise: PyTorch (Cexp, 1, K, K)    -> (Cexp, K*K)
        #   SE fc1:    PyTorch (Cred, Cexp)       -> (Cexp, Cred)
        #   SE fc2:    PyTorch (Cexp, Cred)       -> (Cexp, Cred)
        #   project:   PyTorch (Cout, Cexp, 1, 1) -> (Cout, Cexp)
        "w_exp": 0.1 * jax.random.normal(ks[3], (Cexp, in_channels), jnp.float32),
        "s_exp": s_exp, "b_exp": b_exp,
        "w_dw": 0.1 * jax.random.normal(ks[4], (Cexp, K * K), jnp.float32),
        "s_dw": s_dw, "b_dw": b_dw,
        "w_se1": 0.1 * jax.random.normal(ks[5], (Cexp, Cred), jnp.float32),
        "b_se1": 0.1 * jax.random.normal(ks[6], (1, Cred), jnp.float32),
        "w_se2": 0.1 * jax.random.normal(ks[7], (Cexp, Cred), jnp.float32),
        "b_se2": 0.1 * jax.random.normal(ks[8], (Cexp, 1), jnp.float32),
        "w_proj": 0.1 * jax.random.normal(ks[9], (out_channels, Cexp), jnp.float32),
        "s_proj": s_proj, "b_proj": b_proj,
    }
    return params


if __name__ == "__main__":
    # Small config: in=out=16 channels, 16x16 spatial, kernel 3, expand_ratio 4
    # -> expanded channels = 64, SE reduced channels = 4, stride 1 -> residual used.
    B, Cin, H, W = 2, 16, 16, 16
    Cout = 16
    kernel_size = 3
    expand_ratio = 4
    stride = 1
    se_ratio = 0.25
    use_residual = (stride == 1 and Cin == Cout)

    key = jax.random.PRNGKey(0)
    kx, kp = jax.random.split(key)
    x = jax.random.normal(kx, (B, Cin, H, W), jnp.float32)     # NCHW, like PyTorch
    params = make_params(kp, Cin, Cout, kernel_size, expand_ratio, se_ratio)

    out = inverted_residual_pallas(x, params, kernel_size=kernel_size,
                                   stride=stride, use_residual=use_residual)
    out = jax.block_until_ready(out)

    ref = inverted_residual_reference(x, params, kernel_size=kernel_size,
                                      use_residual=use_residual)
    assert out.shape == (B, Cout, H, W)
    assert jnp.allclose(out, ref, rtol=2e-3, atol=2e-3), "mismatch vs reference"

    print("KERNEL_OK")
</pallas_src>

<mosaic_0001>
module attributes {stable_mosaic.version = 11 : i64} {
  func.func @_inverted_residual_kernel(%arg0: i32, %arg1: memref<1x16x256xbf16, #tpu.memory_space<vmem>>, %arg2: memref<64x16xbf16, #tpu.memory_space<vmem>>, %arg3: memref<64x1xf32, #tpu.memory_space<vmem>>, %arg4: memref<64x9xf32, #tpu.memory_space<vmem>>, %arg5: memref<64x1xf32, #tpu.memory_space<vmem>>, %arg6: memref<9x256xf32, #tpu.memory_space<vmem>>, %arg7: memref<64x4xf32, #tpu.memory_space<vmem>>, %arg8: memref<1x4xf32, #tpu.memory_space<vmem>>, %arg9: memref<64x4xf32, #tpu.memory_space<vmem>>, %arg10: memref<64x1xf32, #tpu.memory_space<vmem>>, %arg11: memref<16x64xbf16, #tpu.memory_space<vmem>>, %arg12: memref<16x1xf32, #tpu.memory_space<vmem>>, %arg13: memref<1x16x256xf32, #tpu.memory_space<vmem>>) attributes {dimension_semantics = [#tpu.dimension_semantics<parallel>], iteration_bounds = array<i64: 2>, scalar_prefetch = 0 : i64, scratch_operands = 0 : i64, tpu.core_type = #tpu.core_type<tc>, window_params = [{transform_indices = @transform_0, window_bounds = array<i64: 1, 16, 256>}, {pipeline_mode = #tpu.pipeline_mode<synchronous>, transform_indices = @transform_1, window_bounds = array<i64: 64, 16>}, {pipeline_mode = #tpu.pipeline_mode<synchronous>, transform_indices = @transform_2, window_bounds = array<i64: 64, 1>}, {pipeline_mode = #tpu.pipeline_mode<synchronous>, transform_indices = @transform_3, window_bounds = array<i64: 64, 9>}, {pipeline_mode = #tpu.pipeline_mode<synchronous>, transform_indices = @transform_4, window_bounds = array<i64: 64, 1>}, {pipeline_mode = #tpu.pipeline_mode<synchronous>, transform_indices = @transform_5, window_bounds = array<i64: 9, 256>}, {pipeline_mode = #tpu.pipeline_mode<synchronous>, transform_indices = @transform_6, window_bounds = array<i64: 64, 4>}, {pipeline_mode = #tpu.pipeline_mode<synchronous>, transform_indices = @transform_7, window_bounds = array<i64: 1, 4>}, {pipeline_mode = #tpu.pipeline_mode<synchronous>, transform_indices = @transform_8, window_bounds = array<i64: 64, 4>}, {pipeline_mode = #tpu.pipeline_mode<synchronous>, transform_indices = @transform_9, window_bounds = array<i64: 64, 1>}, {pipeline_mode = #tpu.pipeline_mode<synchronous>, transform_indices = @transform_10, window_bounds = array<i64: 16, 64>}, {pipeline_mode = #tpu.pipeline_mode<synchronous>, transform_indices = @transform_11, window_bounds = array<i64: 16, 1>}, {transform_indices = @transform_12, window_bounds = array<i64: 1, 16, 256>}]} {
    %c0 = arith.constant 0 : index
    %c0_0 = arith.constant 0 : index
    %c0_1 = arith.constant 0 : index
    %0 = vector.load %arg1[%c0, %c0_0, %c0_1] : memref<1x16x256xbf16, #tpu.memory_space<vmem>>, vector<1x16x256xbf16>
    %1 = vector.shape_cast %0 : vector<1x16x256xbf16> to vector<16x256xbf16>
    %c0_2 = arith.constant 0 : index
    %c0_3 = arith.constant 0 : index
    %2 = vector.load %arg2[%c0_2, %c0_3] : memref<64x16xbf16, #tpu.memory_space<vmem>>, vector<64x16xbf16>
    %cst = arith.constant dense<0.000000e+00> : vector<64x256xf32>
    %3 = tpu.matmul %2, %1, %cst {dimension_numbers = #tpu.dot_dimension_numbers<[1], [0], [0], [1], [0, 0, 1, 1], [], []>} : vector<64x16xbf16>, vector<16x256xbf16>, vector<64x256xf32> -> vector<64x256xf32>
    %c0_4 = arith.constant 0 : index
    %c0_5 = arith.constant 0 : index
    %4 = vector.load %arg3[%c0_4, %c0_5] : memref<64x1xf32, #tpu.memory_space<vmem>>, vector<64x1xf32>
    %5 = vector.broadcast %4 : vector<64x1xf32> to vector<64x256xf32>
    %6 = arith.addf %3, %5 : vector<64x256xf32>
    %cst_6 = arith.constant 3.000000e+00 : f32
    %7 = vector.broadcast %cst_6 : f32 to vector<64x256xf32>
    %8 = arith.addf %6, %7 : vector<64x256xf32>
    %cst_7 = arith.constant 0.000000e+00 : f32
    %cst_8 = arith.constant 6.000000e+00 : f32
    %9 = vector.broadcast %cst_7 : f32 to vector<64x256xf32>
    %10 = arith.maximumf %9, %8 : vector<64x256xf32>
    %11 = vector.broadcast %cst_8 : f32 to vector<64x256xf32>
    %12 = arith.minimumf %11, %10 : vector<64x256xf32>
    %13 = arith.mulf %6, %12 : vector<64x256xf32>
    %cst_9 = arith.constant 0.166666672 : f32
    %14 = vector.broadcast %cst_9 : f32 to vector<64x256xf32>
    %15 = arith.mulf %13, %14 : vector<64x256xf32>
    %c0_10 = arith.constant 0 : index
    %c0_11 = arith.constant 0 : index
    %16 = vector.load %arg4[%c0_10, %c0_11] : memref<64x9xf32, #tpu.memory_space<vmem>>, vector<64x9xf32>
    %17 = vector.extract_strided_slice %16 {offsets = [0, 4], sizes = [64, 1], strides = [1, 1]} : vector<64x9xf32> to vector<64x1xf32>
    %18 = vector.broadcast %17 : vector<64x1xf32> to vector<64x256xf32>
    %19 = arith.mulf %15, %18 : vector<64x256xf32>
    %c0_12 = arith.constant 0 : index
    %c0_13 = arith.constant 0 : index
    %20 = vector.load %arg5[%c0_12, %c0_13] : memref<64x1xf32, #tpu.memory_space<vmem>>, vector<64x1xf32>
    %21 = vector.broadcast %20 : vector<64x1xf32> to vector<64x256xf32>
    %22 = arith.addf %19, %21 : vector<64x256xf32>
    %c17_i32 = arith.constant 17 : i32
    %23 = tpu.dynamic_rotate %15 by %c17_i32 dim 1 : vector<64x256xf32>, i32 -> vector<64x256xf32>
    %c0_14 = arith.constant 0 : index
    %c0_15 = arith.constant 0 : index
    %24 = vector.load %arg6[%c0_14, %c0_15] : memref<9x256xf32, #tpu.memory_space<vmem>>, vector<1x256xf32>
    %25 = vector.broadcast %24 : vector<1x256xf32> to vector<64x256xf32>
    %26 = arith.mulf %23, %25 : vector<64x256xf32>
    %27 = vector.extract_strided_slice %16 {offsets = [0, 0], sizes = [64, 1], strides = [1, 1]} : vector<64x9xf32> to vector<64x1xf32>
    %28 = vector.broadcast %27 : vector<64x1xf32> to vector<64x256xf32>
    %29 = arith.mulf %26, %28 : vector<64x256xf32>
    %30 = arith.addf %22, %29 : vector<64x256xf32>
    %c16_i32 = arith.constant 16 : i32
    %31 = tpu.dynamic_rotate %15 by %c16_i32 dim 1 : vector<64x256xf32>, i32 -> vector<64x256xf32>
    %c1 = arith.constant 1 : index
    %c0_16 = arith.constant 0 : index
    %32 = vector.load %arg6[%c1, %c0_16] : memref<9x256xf32, #tpu.memory_space<vmem>>, vector<1x256xf32>
    %33 = vector.broadcast %32 : vector<1x256xf32> to vector<64x256xf32>
    %34 = arith.mulf %31, %33 : vector<64x256xf32>
    %35 = vector.extract_strided_slice %16 {offsets = [0, 1], sizes = [64, 1], strides = [1, 1]} : vector<64x9xf32> to vector<64x1xf32>
    %36 = vector.broadcast %35 : vector<64x1xf32> to vector<64x256xf32>
    %37 = arith.mulf %34, %36 : vector<64x256xf32>
    %38 = arith.addf %30, %37 : vector<64x256xf32>
    %c15_i32 = arith.constant 15 : i32
    %39 = tpu.dynamic_rotate %15 by %c15_i32 dim 1 : vector<64x256xf32>, i32 -> vector<64x256xf32>
    %c2 = arith.constant 2 : index
    %c0_17 = arith.constant 0 : index
    %40 = vector.load %arg6[%c2, %c0_17] : memref<9x256xf32, #tpu.memory_space<vmem>>, vector<1x256xf32>
    %41 = vector.broadcast %40 : vector<1x256xf32> to vector<64x256xf32>
    %42 = arith.mulf %39, %41 : vector<64x256xf32>
    %43 = vector.extract_strided_slice %16 {offsets = [0, 2], sizes = [64, 1], strides = [1, 1]} : vector<64x9xf32> to vector<64x1xf32>
    %44 = vector.broadcast %43 : vector<64x1xf32> to vector<64x256xf32>
    %45 = arith.mulf %42, %44 : vector<64x256xf32>
    %46 = arith.addf %38, %45 : vector<64x256xf32>
    %c1_i32 = arith.constant 1 : i32
    %47 = tpu.dynamic_rotate %15 by %c1_i32 dim 1 : vector<64x256xf32>, i32 -> vector<64x256xf32>
    %c3 = arith.constant 3 : index
    %c0_18 = arith.constant 0 : index
    %48 = vector.load %arg6[%c3, %c0_18] : memref<9x256xf32, #tpu.memory_space<vmem>>, vector<1x256xf32>
    %49 = vector.broadcast %48 : vector<1x256xf32> to vector<64x256xf32>
    %50 = arith.mulf %47, %49 : vector<64x256xf32>
    %51 = vector.extract_strided_slice %16 {offsets = [0, 3], sizes = [64, 1], strides = [1, 1]} : vector<64x9xf32> to vector<64x1xf32>
    %52 = vector.broadcast %51 : vector<64x1xf32> to vector<64x256xf32>
    %53 = arith.mulf %50, %52 : vector<64x256xf32>
    %54 = arith.addf %46, %53 : vector<64x256xf32>
    %c255_i32 = arith.constant 255 : i32
    %55 = tpu.dynamic_rotate %15 by %c255_i32 dim 1 : vector<64x256xf32>, i32 -> vector<64x256xf32>
    %c5 = arith.constant 5 : index
    %c0_19 = arith.constant 0 : index
    %56 = vector.load %arg6[%c5, %c0_19] : memref<9x256xf32, #tpu.memory_space<vmem>>, vector<1x256xf32>
    %57 = vector.broadcast %56 : vector<1x256xf32> to vector<64x256xf32>
    %58 = arith.mulf %55, %57 : vector<64x256xf32>
    %59 = vector.extract_strided_slice %16 {offsets = [0, 5], sizes = [64, 1], strides = [1, 1]} : vector<64x9xf32> to vector<64x1xf32>
    %60 = vector.broadcast %59 : vector<64x1xf32> to vector<64x256xf32>
    %61 = arith.mulf %58, %60 : vector<64x256xf32>
    %62 = arith.addf %54, %61 : vector<64x256xf32>
    %c241_i32 = arith.constant 241 : i32
    %63 = tpu.dynamic_rotate %15 by %c241_i32 dim 1 : vector<64x256xf32>, i32 -> vector<64x256xf32>
    %c6 = arith.constant 6 : index
    %c0_20 = arith.constant 0 : index
    %64 = vector.load %arg6[%c6, %c0_20] : memref<9x256xf32, #tpu.memory_space<vmem>>, vector<1x256xf32>
    %65 = vector.broadcast %64 : vector<1x256xf32> to vector<64x256xf32>
    %66 = arith.mulf %63, %65 : vector<64x256xf32>
    %67 = vector.extract_strided_slice %16 {offsets = [0, 6], sizes = [64, 1], strides = [1, 1]} : vector<64x9xf32> to vector<64x1xf32>
    %68 = vector.broadcast %67 : vector<64x1xf32> to vector<64x256xf32>
    %69 = arith.mulf %66, %68 : vector<64x256xf32>
    %70 = arith.addf %62, %69 : vector<64x256xf32>
    %c240_i32 = arith.constant 240 : i32
    %71 = tpu.dynamic_rotate %15 by %c240_i32 dim 1 : vector<64x256xf32>, i32 -> vector<64x256xf32>
    %c7 = arith.constant 7 : index
    %c0_21 = arith.constant 0 : index
    %72 = vector.load %arg6[%c7, %c0_21] : memref<9x256xf32, #tpu.memory_space<vmem>>, vector<1x256xf32>
    %73 = vector.broadcast %72 : vector<1x256xf32> to vector<64x256xf32>
    %74 = arith.mulf %71, %73 : vector<64x256xf32>
    %75 = vector.extract_strided_slice %16 {offsets = [0, 7], sizes = [64, 1], strides = [1, 1]} : vector<64x9xf32> to vector<64x1xf32>
    %76 = vector.broadcast %75 : vector<64x1xf32> to vector<64x256xf32>
    %77 = arith.mulf %74, %76 : vector<64x256xf32>
    %78 = arith.addf %70, %77 : vector<64x256xf32>
    %c239_i32 = arith.constant 239 : i32
    %79 = tpu.dynamic_rotate %15 by %c239_i32 dim 1 : vector<64x256xf32>, i32 -> vector<64x256xf32>
    %c8 = arith.constant 8 : index
    %c0_22 = arith.constant 0 : index
    %80 = vector.load %arg6[%c8, %c0_22] : memref<9x256xf32, #tpu.memory_space<vmem>>, vector<1x256xf32>
    %81 = vector.broadcast %80 : vector<1x256xf32> to vector<64x256xf32>
    %82 = arith.mulf %79, %81 : vector<64x256xf32>
    %83 = vector.extract_strided_slice %16 {offsets = [0, 8], sizes = [64, 1], strides = [1, 1]} : vector<64x9xf32> to vector<64x1xf32>
    %84 = vector.broadcast %83 : vector<64x1xf32> to vector<64x256xf32>
    %85 = arith.mulf %82, %84 : vector<64x256xf32>
    %86 = arith.addf %78, %85 : vector<64x256xf32>
    %cst_23 = arith.constant 3.000000e+00 : f32
    %87 = vector.broadcast %cst_23 : f32 to vector<64x256xf32>
    %88 = arith.addf %86, %87 : vector<64x256xf32>
    %cst_24 = arith.constant 0.000000e+00 : f32
    %cst_25 = arith.constant 6.000000e+00 : f32
    %89 = vector.broadcast %cst_24 : f32 to vector<64x256xf32>
    %90 = arith.maximumf %89, %88 : vector<64x256xf32>
    %91 = vector.broadcast %cst_25 : f32 to vector<64x256xf32>
    %92 = arith.minimumf %91, %90 : vector<64x256xf32>
    %93 = arith.mulf %86, %92 : vector<64x256xf32>
    %cst_26 = arith.constant 0.166666672 : f32
    %94 = vector.broadcast %cst_26 : f32 to vector<64x256xf32>
    %95 = arith.mulf %93, %94 : vector<64x256xf32>
    %cst_27 = arith.constant dense<0.000000e+00> : vector<64xf32>
    %96 = vector.multi_reduction <add>, %95, %cst_27 [1] : vector<64x256xf32> to vector<64xf32>
    %97 = vector.shape_cast %96 : vector<64xf32> to vector<64x1xf32>
    %cst_28 = arith.constant 2.560000e+02 : f32
    %98 = vector.broadcast %cst_28 : f32 to vector<64x1xf32>
    %99 = arith.divf %97, %98 : vector<64x1xf32>
    %c0_29 = arith.constant 0 : index
    %c0_30 = arith.constant 0 : index
    %100 = vector.load %arg7[%c0_29, %c0_30] : memref<64x4xf32, #tpu.memory_space<vmem>>, vector<64x4xf32>
    %101 = vector.broadcast %99 : vector<64x1xf32> to vector<64x4xf32>
    %102 = arith.mulf %100, %101 : vector<64x4xf32>
    %cst_31 = arith.constant dense<0.000000e+00> : vector<4xf32>
    %103 = vector.multi_reduction <add>, %102, %cst_31 [0] : vector<64x4xf32> to vector<4xf32>
    %104 = vector.shape_cast %103 : vector<4xf32> to vector<1x4xf32>
    %c0_32 = arith.constant 0 : index
    %c0_33 = arith.constant 0 : index
    %105 = vector.load %arg8[%c0_32, %c0_33] : memref<1x4xf32, #tpu.memory_space<vmem>>, vector<1x4xf32>
    %106 = arith.addf %104, %105 : vector<1x4xf32>
    %cst_34 = arith.constant 0.000000e+00 : f32
    %107 = vector.broadcast %cst_34 : f32 to vector<1x4xf32>
    %108 = arith.maximumf %106, %107 : vector<1x4xf32>
    %c0_35 = arith.constant 0 : index
    %c0_36 = arith.constant 0 : index
    %109 = vector.load %arg9[%c0_35, %c0_36] : memref<64x4xf32, #tpu.memory_space<vmem>>, vector<64x4xf32>
    %110 = vector.broadcast %108 : vector<1x4xf32> to vector<64x4xf32>
    %111 = arith.mulf %109, %110 : vector<64x4xf32>
    %cst_37 = arith.constant dense<0.000000e+00> : vector<64xf32>
    %112 = vector.multi_reduction <add>, %111, %cst_37 [1] : vector<64x4xf32> to vector<64xf32>
    %113 = vector.shape_cast %112 : vector<64xf32> to vector<64x1xf32>
    %c0_38 = arith.constant 0 : index
    %c0_39 = arith.constant 0 : index
    %114 = vector.load %arg10[%c0_38, %c0_39] : memref<64x1xf32, #tpu.memory_space<vmem>>, vector<64x1xf32>
    %115 = arith.addf %113, %114 : vector<64x1xf32>
    %116 = arith.negf %115 : vector<64x1xf32>
    %117 = math.exp %116 : vector<64x1xf32>
    %cst_40 = arith.constant 1.000000e+00 : f32
    %118 = vector.broadcast %cst_40 : f32 to vector<64x1xf32>
    %119 = arith.addf %118, %117 : vector<64x1xf32>
    %120 = arith.divf %118, %119 : vector<64x1xf32>
    %121 = vector.broadcast %120 : vector<64x1xf32> to vector<64x256xf32>
    %122 = arith.mulf %95, %121 : vector<64x256xf32>
    %c0_41 = arith.constant 0 : index
    %c0_42 = arith.constant 0 : index
    %123 = vector.load %arg11[%c0_41, %c0_42] : memref<16x64xbf16, #tpu.memory_space<vmem>>, vector<16x64xbf16>
    %124 = arith.truncf %122 : vector<64x256xf32> to vector<64x256xbf16>
    %cst_43 = arith.constant dense<0.000000e+00> : vector<16x256xf32>
    %125 = tpu.matmul %123, %124, %cst_43 {dimension_numbers = #tpu.dot_dimension_numbers<[1], [0], [0], [1], [0, 0, 1, 1], [], []>} : vector<16x64xbf16>, vector<64x256xbf16>, vector<16x256xf32> -> vector<16x256xf32>
    %c0_44 = arith.constant 0 : index
    %c0_45 = arith.constant 0 : index
    %126 = vector.load %arg12[%c0_44, %c0_45] : memref<16x1xf32, #tpu.memory_space<vmem>>, vector<16x1xf32>
    %127 = vector.broadcast %126 : vector<16x1xf32> to vector<16x256xf32>
    %128 = arith.addf %125, %127 : vector<16x256xf32>
    %129 = arith.extf %1 : vector<16x256xbf16> to vector<16x256xf32>
    %130 = arith.addf %128, %129 : vector<16x256xf32>
    %c0_46 = arith.constant 0 : index
    %c0_47 = arith.constant 0 : index
    %c0_48 = arith.constant 0 : index
    %131 = vector.load %arg13[%c0_46, %c0_47, %c0_48] : memref<1x16x256xf32, #tpu.memory_space<vmem>>, vector<1x16x256xf32>
    %132 = vector.shape_cast %131 : vector<1x16x256xf32> to vector<16x256xf32>
    %133 = vector.shape_cast %130 : vector<16x256xf32> to vector<1x16x256xf32>
    tpu.vector_store %arg13[%c0_46, %c0_47, %c0_48], %133 {strides = array<i32>} : memref<1x16x256xf32, #tpu.memory_space<vmem>>, vector<1x16x256xf32>,
    return
  }
  func.func @transform_0(%arg0: i32) -> (i32, i32, i32) {
    %c0_i32 = arith.constant 0 : i32
    %c0_i32_0 = arith.constant 0 : i32
    %c0_i32_1 = arith.constant 0 : i32
    return %arg0, %c0_i32, %c0_i32_0 : i32, i32, i32
  }
  func.func @transform_1(%arg0: i32) -> (i32, i32) {
    %c0_i32 = arith.constant 0 : i32
    %c0_i32_0 = arith.constant 0 : i32
    %c0_i32_1 = arith.constant 0 : i32
    return %c0_i32, %c0_i32_0 : i32, i32
  }
  func.func @transform_2(%arg0: i32) -> (i32, i32) {
    %c0_i32 = arith.constant 0 : i32
    %c0_i32_0 = arith.constant 0 : i32
    %c0_i32_1 = arith.constant 0 : i32
    return %c0_i32, %c0_i32_0 : i32, i32
  }
  func.func @transform_3(%arg0: i32) -> (i32, i32) {
    %c0_i32 = arith.constant 0 : i32
    %c0_i32_0 = arith.constant 0 : i32
    %c0_i32_1 = arith.constant 0 : i32
    return %c0_i32, %c0_i32_0 : i32, i32
  }
  func.func @transform_4(%arg0: i32) -> (i32, i32) {
    %c0_i32 = arith.constant 0 : i32
    %c0_i32_0 = arith.constant 0 : i32
    %c0_i32_1 = arith.constant 0 : i32
    return %c0_i32, %c0_i32_0 : i32, i32
  }
  func.func @transform_5(%arg0: i32) -> (i32, i32) {
    %c0_i32 = arith.constant 0 : i32
    %c0_i32_0 = arith.constant 0 : i32
    %c0_i32_1 = arith.constant 0 : i32
    return %c0_i32, %c0_i32_0 : i32, i32
  }
  func.func @transform_6(%arg0: i32) -> (i32, i32) {
    %c0_i32 = arith.constant 0 : i32
    %c0_i32_0 = arith.constant 0 : i32
    %c0_i32_1 = arith.constant 0 : i32
    return %c0_i32, %c0_i32_0 : i32, i32
  }
  func.func @transform_7(%arg0: i32) -> (i32, i32) {
    %c0_i32 = arith.constant 0 : i32
    %c0_i32_0 = arith.constant 0 : i32
    %c0_i32_1 = arith.constant 0 : i32
    return %c0_i32, %c0_i32_0 : i32, i32
  }
  func.func @transform_8(%arg0: i32) -> (i32, i32) {
    %c0_i32 = arith.constant 0 : i32
    %c0_i32_0 = arith.constant 0 : i32
    %c0_i32_1 = arith.constant 0 : i32
    return %c0_i32, %c0_i32_0 : i32, i32
  }
  func.func @transform_9(%arg0: i32) -> (i32, i32) {
    %c0_i32 = arith.constant 0 : i32
    %c0_i32_0 = arith.constant 0 : i32
    %c0_i32_1 = arith.constant 0 : i32
    return %c0_i32, %c0_i32_0 : i32, i32
  }
  func.func @transform_10(%arg0: i32) -> (i32, i32) {
    %c0_i32 = arith.constant 0 : i32
    %c0_i32_0 = arith.constant 0 : i32
    %c0_i32_1 = arith.constant 0 : i32
    return %c0_i32, %c0_i32_0 : i32, i32
  }
  func.func @transform_11(%arg0: i32) -> (i32, i32) {
    %c0_i32 = arith.constant 0 : i32
    %c0_i32_0 = arith.constant 0 : i32
    %c0_i32_1 = arith.constant 0 : i32
    return %c0_i32, %c0_i32_0 : i32, i32
  }
  func.func @transform_12(%arg0: i32) -> (i32, i32, i32) {
    %c0_i32 = arith.constant 0 : i32
    %c0_i32_0 = arith.constant 0 : i32
    %c0_i32_1 = arith.constant 0 : i32
    return %arg0, %c0_i32, %c0_i32_0 : i32, i32, i32
  }
}

</mosaic_0001>

<bundles_post_ra>
// kernel: tpu_custom_call.1
= control target key start
LH: loop header
LB: loop body
LE: loop exit
PB: predicated region body
PF: predicated region fallthrough
CT: control target
= control target key end

     0   :  { %s4806_s0 = inlined_call_operand.vmem [shape: bf16[2,16,256], index: 0, kind: input, shape index: {}]   ;;  %s4807_s1 = inlined_call_operand.vmem [shape: bf16[64,16], index: 1, kind: input, shape index: {}]   ;;  %s4808_s2 = inlined_call_operand.vmem [shape: f32[64,1], index: 2, kind: input, shape index: {}]   ;;  %s4809_s3 = inlined_call_operand.vmem [shape: f32[64,9], index: 3, kind: input, shape index: {}]   ;;  %s4810_s4 = inlined_call_operand.vmem [shape: f32[64,1], index: 4, kind: input, shape index: {}]   ;;  %s4811_s5 = inlined_call_operand.vmem [shape: f32[9,256], index: 5, kind: input, shape index: {}]   ;;  %s4812_s6 = inlined_call_operand.vmem [shape: f32[64,4], index: 6, kind: input, shape index: {}]   ;;  %s4813_s7 = inlined_call_operand.vmem [shape: f32[1,4], index: 7, kind: input, shape index: {}]   ;;  %s4814_s8 = inlined_call_operand.vmem [shape: f32[64,4], index: 8, kind: input, shape index: {}]   ;;  %s4815_s9 = inlined_call_operand.vmem [shape: f32[64,1], index: 9, kind: input, shape index: {}]   ;;  %s4816_s10 = inlined_call_operand.vmem [shape: bf16[16,64], index: 10, kind: input, shape index: {}]   ;;  %s4817_s11 = inlined_call_operand.vmem [shape: f32[16,1], index: 11, kind: input, shape index: {}]   ;;  %s4818_s12 = inlined_call_operand.hbm [shape: f32[2,16,256], index: 12, kind: output, shape index: {}]  }
   0x1   :  { %4963 = sst [smem:[#allocation136_spill]] %s4806_s0 }
   0x2   :  { %17 = vsyncpa [#allocation3], 0 }
   0x3   :  { %19 = vsyncpa [#allocation3 + $0x1], 0  ;;  %s2721_s21 = smov 0   ;;  %s2723_s22 = smov 0  }
   0x4   :  { %s2725_s23 = smov 0   ;;  %s2727_s24 = smov 0  }
   0x5 LB: > { %s2742_s25 = sadd.s32 4294967295, %s2635_s24   ;;  %s2412_s26 = sadd.s32 4294967294, %s2635_s24   ;;  %s2635_s24 = sphi %s2727_s24, %s5257_s24   ;;  %s2631_s23 = sphi %s2725_s23, %s5256_s23   ;;  %s2627_s22 = sphi %s2723_s22, %s5255_s22   ;;  %s2623_s21 = sphi %s2721_s21, %s5254_s21  }
   0x6   : > { %s2746_s27 = sadd.s32 1, %s2635_s24   ;;  %s289_s28 = sadd.s32 1, %s2631_s23 }
   0x7   : > { %s286_s29 = ssub.s32 %s2635_s24, %s2746_s27  ;;  %p299_p0 = scmp.ne.s32.totalorder %s2631_s23, %s2627_s22 }
   0x8   : > { %p287_p1 = scmp.eq.s32.totalorder %s286_s29, 0  ;;  %p300_p2 = scmp.eq.s32.totalorder %s2742_s25, 1 }
   0x9   : > { %p305_p3 = scmp.ne.s32.totalorder %s2627_s22, %s2623_s21  ;;  %p306_p4 = scmp.eq.s32.totalorder %s2412_s26, 1 }
   0xa   : > { %s2757_s30 = scalar_select %p287_p1, %s2631_s23, %s289_s28  }
   0xb   : > { %p2759_p5 = por %p300_p2, %p299_p0  ;;  %p2763_p6 = por %p306_p4, %p305_p3 }
   0xc   : > { %4964 = sst [smem:[#allocation5_spill]] %s2757_s30  ;;  %p2415_p7 = scmp.ge.s32.totalorder %s2635_s24, 1 }
   0xd   : > { %p365_p8 = scmp.lt.s32.totalorder %s2635_s24, 3 }
   0xf   : > { %p366_p9 = pnand %p2415_p7, %p365_p8 }
  0x11   : > { %369 = sbr.rel (%p366_p9) target bundleno = 1565 (0x61d), region = 68 }
  0x18   : > { %p407_p10 = scmp.lt.s32.totalorder %s2742_s25, 1  ;;  %v4820_v0 = vmov 0   ;;  %v2776_v1 = vld [vmem:[%s4809_s3] sm:$0xff]  ;;  %v2638_v2 = vmov 4   ;;  %s4967_s0 = sld [smem:[#allocation136_spill]]  ;;  %v2788_v3 = vld [vmem:[%s4809_s3 + $0x18] sm:$0xff] }
  0x19   : > { %546 = vmatprep.mubr.bf16.mxu0 %v4820_v0  ;;  %2510 = vset.pattern.permute.xlu1 %v4820_v0  ;;  %v425_v8 = vld [vmem:[%s4808_s2 + $0x10] sm:$0xff]  ;;  %v2534_v9 = vld [vmem:[%s4807_s1] sm:$0xff]   ;;  %v2802_v10 = vld [vmem:[%s4809_s3 + $0x28] sm:$0xff]  ;;  %vm501_vm0 = vcmask 130048   ;;  %v2639_v34 = vmov 1   ;;  %v2640_v35 = vmov 2  }
  0x1a   : > { %s408_s15 = scalar_select %p407_p10, %s2742_s25, 1  ;;  %2313 = vmatprep.mubr.bf16.mxu1 %v4820_v0  ;;  %2511 = vset.pattern.permute.xlu0 %v2638_v2  ;;  %v426_v11 = vld [vmem:[%s4808_s2 + $0x18] sm:$0xff]  ;;  %v428_v13 = vld [vmem:[%s4808_s2 + $0x28] sm:$0xff]  ;;  %v423_v15 = vld [vmem:[%s4808_s2] sm:$0xff]  ;;  %v4819_v36 = vmov 3   ;;  %v2642_v37 = vmov 5  }
  0x1b   : > { %677 = vperm.xlu0 %2511, %v2776_v1   ;;  %443 = vperm.xlu1 %2510, %v425_v8   ;;  %v2812_v12 = vld [vmem:[%s4809_s3 + $0x38] sm:$0xff]  ;;  %v2535_v14 = vld [vmem:[%s4807_s1 + $0x8] sm:$0xff]   ;;  %v2536_v19 = vld [vmem:[%s4807_s1 + $0x10] sm:$0xff]   ;;  %v4823_v38 = vmov 6   ;;  %v4822_v39 = vmov 7   ;;  %s4962_s28 = smov 16  }
  0x1c   : > { %s2451_s18 = sshll.u32 %s408_s15, 4  ;;  %v430_v16 = vld [vmem:[%s4808_s2 + $0x38] sm:$0xff]  ;;  %v424_v17 = vld [vmem:[%s4808_s2 + $0x8] sm:$0xff]  ;;  %v427_v20 = vld [vmem:[%s4808_s2 + $0x20] sm:$0xff]  ;;  %s2646_s29 = smov 17   ;;  %vm2061_vm9 = vcmask 31744  }
  0x1d   : > { %v2837_v18 = vld [vmem:[%s4809_s3 + $0x8] sm:$0xff]  ;;  %v429_v21 = vld [vmem:[%s4808_s2 + $0x30] sm:$0xff]  ;;  %v2537_v23 = vld [vmem:[%s4807_s1 + $0x18] sm:$0xff]   ;;  %s2647_s15 = smov 15   ;;  %s2648_s16 = smov 1   ;;  %vm2277_vm10 = vcmask 523264  }
  0x1e   : > { %s2783_s26 = scalar_lea.vmem %s4967_s0, %s2451_s18  ;;  %v2854_v22 = vld [vmem:[%s4809_s3 + $0x10] sm:$0xff]  ;;  %v732_v24 = vld [vmem:[%s4810_s4 + $0x8] sm:$0xff]  ;;  %v2866_v25 = vld [vmem:[%s4809_s3 + $0x20] sm:$0xff]  ;;  %s2649_s17 = smov 127  }
  0x1f   : > { %v413_v4 = vld [vmem:[%s2783_s26] sm:$0xff]  ;;  %v414_v5 = vld [vmem:[%s2783_s26 + $0x8] sm:$0xff]  ;;  %692 = vperm.xlu0 %2511, %v2788_v3   ;;  %448 = vperm.xlu1 %2510, %v426_v11   ;;  %v2876_v27 = vld [vmem:[%s4809_s3 + $0x30] sm:$0xff]  ;;  %s2650_s18 = smov 113   ;;  %s2651_s19 = smov 112  }
  0x20   : > { %v2424_v6 = vcombine.high %v413_v4, %v414_v5  ;;  %v2423_v7 = vcombine.low %v413_v4, %v414_v5  ;;  %v735_v26 = vld [vmem:[%s4810_s4 + $0x20] sm:$0xff]  ;;  %v737_v29 = vld [vmem:[%s4810_s4 + $0x30] sm:$0xff]  ;;  %v734_v31 = vld [vmem:[%s4810_s4 + $0x18] sm:$0xff]  ;;  %s2652_s20 = smov 111   ;;  %s2452_s0 = sshll.u32 %s2742_s25, 9 }
  0x21   : > { %v731_v28 = vld [vmem:[%s4810_s4] sm:$0xff]  ;;  %v733_v30 = vld [vmem:[%s4810_s4 + $0x10] sm:$0xff]  ;;  %v736_v32 = vld [vmem:[%s4810_s4 + $0x28] sm:$0xff]  ;;  %s4760_s30 = scalar_lea.hbm %s4818_s12, %s2452_s0 }
  0x22   : > { %514 = vmatprep.subr.bf16.mxu0 %v2424_v6  ;;  %v738_v33 = vld [vmem:[%s4810_s4 + $0x38] sm:$0xff] }
  0x23   : > { %515 = vmatpush1.bf16.msra.mxu0 %v2423_v7  ;;  %702 = vperm.xlu0 %2511, %v2802_v10  }
  0x24   : > { %458 = vperm.xlu1 %2510, %v428_v13  }
  0x26   : > { %2425 = vmatmul.mubr.msk.bf16.vlgmr.msra.gmra.mrb[0].mxu0 %vm501_vm0, %v2534_v9 }
  0x27   : > { %556 = vmatprep.mubr.bf16.mxu0 %v4820_v0  ;;  %712 = vperm.xlu0 %2511, %v2812_v12  }
  0x28   : > { %468 = vperm.xlu1 %2510, %v430_v16  }
  0x2b   : > { %2513 = vset.pattern.permute.xlu0 %v4820_v0 }
  0x2c   : > { %433 = vperm.xlu0 %2513, %v423_v15   ;;  %2512 = vset.pattern.permute.xlu1 %v2638_v2 }
  0x2d   : > { %682 = vperm.xlu1 %2512, %v2837_v18  }
  0x2e   : > { %2426 = vmatmul.mubr.msk.bf16.gmra.mrb[4].mxu0 %vm501_vm0, %v2535_v14 }
  0x2f   : > { %566 = vmatprep.mubr.bf16.mxu0 %v4820_v0 }
  0x30   : > { %438 = vperm.xlu0 %2513, %v424_v17  }
  0x31   : > { %687 = vperm.xlu1 %2512, %v2854_v22  }
  0x34   : > { %453 = vperm.xlu0 %2513, %v427_v20  }
  0x35   : > { %697 = vperm.xlu1 %2512, %v2866_v25  }
  0x36   : > { %2427 = vmatmul.mubr.msk.bf16.gmra.mrb[8].mxu0 %vm501_vm0, %v2536_v19 }
  0x37   : > { %576 = vmatprep.mubr.bf16.mxu0 %v4820_v0 }
  0x38   : > { %463 = vperm.xlu0 %2513, %v429_v21  }
  0x39   : > { %707 = vperm.xlu1 %2512, %v2876_v27  }
  0x3c   : > { %746 = vperm.xlu0 %2513, %v732_v24  }
  0x3d   : > { %2514 = vset.pattern.permute.xlu1 %v4820_v0 }
  0x3e   : > { %2428 = vmatmul.mubr.msk.bf16.gmra.mrb[12].mxu0 %vm501_vm0, %v2537_v23  ;;  %741 = vperm.xlu1 %2514, %v731_v28  }
  0x40   : > { %761 = vperm.xlu0 %2513, %v735_v26  }
  0x42   : > { %751 = vperm.xlu1 %2514, %v733_v30  }
  0x44   : > { %771 = vperm.xlu0 %2513, %v737_v29  }
  0x46   : > { %756 = vperm.xlu1 %2514, %v734_v31  }
  0x48   : > { %875 = vperm.xlu0 %2513, %v2776_v1  }
  0x4a   : > { %766 = vperm.xlu1 %2514, %v736_v32  }
  0x4c   : > { %883 = vperm.xlu0 %2513, %v2854_v22  }
  0x4e   : > { %776 = vperm.xlu1 %2514, %v738_v33  }
  0x50   : > { %887 = vperm.xlu0 %2513, %v2788_v3  }
  0x52   : > { %879 = vperm.xlu1 %2514, %v2837_v18  }
  0x54   : > { %891 = vperm.xlu0 %2513, %v2866_v25  }
  0x56   : > { %2515 = vset.pattern.permute.xlu1 %v2639_v34 }
  0x57   : > { %1017 = vperm.xlu1 %2515, %v2776_v1  }
  0x58   : > { %895 = vperm.xlu0 %2513, %v2802_v10  }
  0x5b   : > { %1025 = vperm.xlu1 %2515, %v2854_v22  }
  0x5c   : > { %899 = vperm.xlu0 %2513, %v2876_v27  }
  0x5f   : > { %2516 = vset.pattern.permute.xlu1 %v2640_v35 }
  0x60   : > { %903 = vperm.xlu0 %2513, %v2812_v12   ;;  %1159 = vperm.xlu1 %2516, %v2776_v1  }
  0x64   : > { %2520 = vset.pattern.permute.xlu0 %v2639_v34  ;;  %1167 = vperm.xlu1 %2516, %v2854_v22  }
  0x65   : > { %1021 = vperm.xlu0 %2520, %v2837_v18  }
  0x68   : > { %2517 = vset.pattern.permute.xlu1 %v4819_v36 }
  0x69   : > { %1029 = vperm.xlu0 %2520, %v2788_v3   ;;  %1301 = vperm.xlu1 %2517, %v2776_v1  }
  0x6d   : > { %1033 = vperm.xlu0 %2520, %v2866_v25   ;;  %1309 = vperm.xlu1 %2517, %v2854_v22  }
  0x71   : > { %1037 = vperm.xlu0 %2520, %v2802_v10   ;;  %2518 = vset.pattern.permute.xlu1 %v2642_v37 }
  0x72   : > { %1443 = vperm.xlu1 %2518, %v2776_v1  }
  0x75   : > { %1041 = vperm.xlu0 %2520, %v2876_v27  }
  0x76   : > { %1451 = vperm.xlu1 %2518, %v2854_v22  }
  0x79   : > { %1045 = vperm.xlu0 %2520, %v2812_v12  }
  0x7a   : > { %2519 = vset.pattern.permute.xlu1 %v4823_v38 }
  0x7b   : > { %1585 = vperm.xlu1 %2519, %v2776_v1  }
  0x7d   : > { %2522 = vset.pattern.permute.xlu0 %v2640_v35 }
  0x7e   : > { %1163 = vperm.xlu0 %2522, %v2837_v18  }
  0x7f   : > { %1593 = vperm.xlu1 %2519, %v2854_v22  }
  0x82   : > { %1171 = vperm.xlu0 %2522, %v2788_v3  }
  0x83   : > { %2521 = vset.pattern.permute.xlu1 %v4822_v39 }
  0x84   : > { %1727 = vperm.xlu1 %2521, %v2776_v1  }
  0x86   : > { %1175 = vperm.xlu0 %2522, %v2866_v25  }
  0x8a   : > { %1179 = vperm.xlu0 %2522, %v2802_v10  }
  0x8e   : > { %1183 = vperm.xlu0 %2522, %v2876_v27  }
  0x9a   : > { %v2932_v40 = vpop.permute.xlu0 %677  ;;  %v2936_v42 = vpop.permute.xlu1 %443 }
  0x9e   : > { %v2934_v41 = vpop.permute.xlu0 %692  ;;  %v2940_v44 = vpop.permute.xlu1 %448 }
  0x9f   : > { %4968 = vst [vmem:[#allocation6_spill] sm:$0xff] %v2934_v41 }
  0xa2   : > { %v2938_v43 = vpop.permute.xlu0 %702 }
  0xa3   : > { %4969 = vst [vmem:[#allocation7_spill] sm:$0xff] %v2938_v43  ;;  %v2944_v46 = vpop.permute.xlu1 %458 }
  0xa6   : > { %v2942_v45 = vpop.permute.xlu0 %712 }
  0xa7   : > { %4970 = vst [vmem:[#allocation8_spill] sm:$0xff] %v2942_v45  ;;  %v2946_v56 = vpop.permute.xlu1 %468 }
  0xab   : > { %v434_v47 = vpop.permute.xlu0 %433 }
  0xac   : > { %v2954_v5 = vpop.permute.xlu1 %682 }
  0xaf   : > { %v439_v2 = vpop.permute.xlu0 %438 }
  0xb0   : > { %v2968_v15 = vpop.permute.xlu1 %687 }
  0xb1   : > { %4971 = vst [vmem:[#allocation9_spill] sm:$0xff] %v2968_v15 }
  0xb3   : > { %v2976_v17 = vpop.permute.xlu0 %453 }
  0xb4   : > { %v2985_v28 = vpop.permute.xlu1 %697 }
  0xb5   : > { %4972 = vst [vmem:[#allocation10_spill] sm:$0xff] %v2985_v28 }
  0xb7   : > { %v2987_v30 = vpop.permute.xlu0 %463 }
  0xf9   : > { %v548_v48 = vpop.f32.mrb[0].mxu0 }
  0xfa   : > { %v549_v49 = vadd.f32 %v548_v48, %v434_v47  ;;  %v550_v50 = vpop.f32.mrb[1].mxu0 }
  0xfb   : > { %v551_v51 = vadd.f32 %v550_v50, %v434_v47  ;;  %v552_v52 = vpop.f32.mrb[2].mxu0 }
  0xfc   : > { %v587_v53 = vadd.f32 3.0, %v549_v49  ;;  %v554_v54 = vpop.f32.mrb[3].mxu0  ;;  %v553_v8 = vadd.f32 %v552_v52, %v439_v2 }
  0xfd   : > { %v588_v55 = vadd.f32 3.0, %v551_v51 }
  0xfe   : > { %v603_v57 = vmax.f32 %v587_v53, 0.0  ;;  %v589_v13 = vadd.f32 3.0, %v553_v8 }
  0xff   : > { %v604_v58 = vmax.f32 %v588_v55, 0.0  ;;  %v555_v55 = vadd.f32 %v554_v54, %v439_v2 }
 0x100   : > { %v619_v59 = vmin.f32 %v603_v57, 6.0  ;;  %v605_v20 = vmax.f32 %v589_v13, 0.0 }
 0x101   : > { %v620_v60 = vmin.f32 %v604_v58, 6.0  ;;  %v2948_v61 = vpop.f32.mrb[4].mxu0 }
 0x102   : > { %v635_v62 = vmul.f32 %v619_v59, %v549_v49  ;;  %v2950_v63 = vpop.f32.mrb[5].mxu0  ;;  %v621_v26 = vmin.f32 %v605_v20, 6.0  ;;  %v590_v59 = vadd.f32 3.0, %v555_v55  ;;  %v3032_v20 = vpop.permute.xlu0 %746 }
 0x103   : > { %v2952_v4 = vpop.f32.mrb[6].mxu0  ;;  %v636_v7 = vmul.f32 %v620_v60, %v551_v51  ;;  %v2998_v51 = vpop.permute.xlu1 %707 }
 0x104   : > { %v2956_v6 = vmul.f32 0.16666667, %v635_v62  ;;  %v2958_v9 = vpop.f32.mrb[7].mxu0  ;;  %v637_v47 = vmul.f32 %v621_v26, %v553_v8  ;;  %4973 = vst [vmem:[#allocation11_spill] sm:$0xff] %v2998_v51  ;;  %v606_v54 = vmax.f32 %v590_v59, 0.0  ;;  %v559_v26 = vadd.f32 %v2948_v61, %v2936_v42 }
 0x105   : > { %v2964_v11 = vmul.f32 0.16666667, %v636_v7 }
 0x106   : > { %938 = vrot.lane.b32.xlu1 %v2956_v6, %s4962_s28  ;;  %795 = vrot.lane.b32.xlu0 %v2956_v6, %s2646_s29  ;;  %v3004_v53 = vmul.f32 0.16666667, %v637_v47  ;;  %v622_v8 = vmin.f32 %v606_v54, 6.0 }
 0x107   : > { %v3012_v60 = vpop.permute.xlu1 %741 }
 0x109   : > { %v2966_v14 = vpop.f32.mrb[8].mxu0 }
 0x10a   : > { %v2970_v16 = vpop.f32.mrb[9].mxu0  ;;  %1080 = vrot.lane.b32.xlu1 %v2956_v6, %s2647_s15  ;;  %954 = vrot.lane.b32.xlu0 %v2964_v11, %s4962_s28 }
 0x10b   : > { %v572_v19 = vpop.f32.mrb[10].mxu0  ;;  %v3018_v2 = vpop.permute.xlu1 %751 }
 0x10c   : > { %v573_v21 = vadd.f32 %v572_v19, %v2944_v46  ;;  %v2979_v23 = vpop.f32.mrb[11].mxu0  ;;  %4975 = vst [vmem:[#allocation13_spill] sm:$0xff] %v3018_v2  ;;  %v638_v19 = vmul.f32 %v622_v8, %v555_v55 }
 0x10e   : > { %v597_v24 = vadd.f32 3.0, %v573_v21  ;;  %1222 = vrot.lane.b32.xlu1 %v2956_v6, %s2648_s16  ;;  %1096 = vrot.lane.b32.xlu0 %v2964_v11, %s2647_s15 }
 0x10f   : > { %v3026_v13 = vpop.permute.xlu1 %756 }
 0x110   : > { %v613_v29 = vmax.f32 %v597_v24, 0.0  ;;  %4977 = vst [vmem:[#allocation15_spill] sm:$0xff] %v3026_v13  ;;  %v3039_v24 = vmul.f32 0.16666667, %v638_v19 }
 0x111   : > { %v578_v31 = vpop.f32.mrb[12].mxu0 }
 0x112   : > { %v629_v32 = vmin.f32 %v613_v29, 6.0  ;;  %v579_v33 = vadd.f32 %v578_v31, %v2987_v30  ;;  %v2990_v34 = vpop.f32.mrb[13].mxu0  ;;  %1364 = vrot.lane.b32.xlu1 %v2956_v6, %s2649_s17  ;;  %1238 = vrot.lane.b32.xlu0 %v2964_v11, %s2648_s16  ;;  %v3048_v31 = vpop.permute.xlu0 %761 }
 0x113   : > { %v2996_v35 = vpop.f32.mrb[14].mxu0  ;;  %4980 = vst [vmem:[#allocation18_spill] sm:$0xff] %v3048_v31 }
 0x114   : > { %v645_v48 = vmul.f32 %v629_v32, %v573_v21  ;;  %v599_v49 = vadd.f32 3.0, %v579_v33  ;;  %v584_v50 = vpop.f32.mrb[15].mxu0  ;;  %v3034_v21 = vpop.permute.xlu1 %766  ;;  %v591_v32 = vadd.f32 3.0, %v559_v26  ;;  %v583_v13 = vadd.f32 %v2996_v35, %v2946_v56 }
 0x115   : > { %4978 = vst [vmem:[#allocation16_spill] sm:$0xff] %v3034_v21  ;;  %v585_v19 = vadd.f32 %v584_v50, %v2946_v56  ;;  %v2653_v35 = vmov 8  }
 0x116   : > { %v615_v52 = vmax.f32 %v599_v49, 0.0  ;;  %811 = vrot.lane.b32.xlu1 %v2964_v11, %s2646_s29  ;;  %1380 = vrot.lane.b32.xlu0 %v2964_v11, %s2649_s17  ;;  %v3006_v57 = vmul.f32 0.16666667, %v645_v48  ;;  %v607_v61 = vmax.f32 %v591_v32, 0.0  ;;  %v3056_v47 = vpop.permute.xlu0 %771  ;;  %v601_v41 = vadd.f32 3.0, %v583_v13 }
 0x117   : > { %4981 = vst [vmem:[#allocation19_spill] sm:$0xff] %v3056_v47  ;;  %v602_v32 = vadd.f32 3.0, %v585_v19 }
 0x118   : > { %4974 = vst [vmem:[#allocation12_spill] sm:$0xff] %v3006_v57  ;;  %v631_v58 = vmin.f32 %v615_v52, 6.0  ;;  %v3043_v29 = vpop.permute.xlu1 %776  ;;  %v623_v49 = vmin.f32 %v607_v61, 6.0  ;;  %v617_v2 = vmax.f32 %v601_v41, 0.0 }
 0x119   : > { %4979 = vst [vmem:[#allocation17_spill] sm:$0xff] %v3043_v29 }
 0x11a   : > { %797 = vrot.lane.b32.xlu1 %v3004_v53, %s2646_s29  ;;  %948 = vrot.lane.b32.xlu0 %v3006_v57, %s4962_s28  ;;  %v647_v62 = vmul.f32 %v631_v58, %v579_v33  ;;  %v3065_v52 = vpop.permute.xlu0 %875  ;;  %v639_v55 = vmul.f32 %v623_v49, %v559_v26  ;;  %v561_v58 = vadd.f32 %v2950_v63, %v2936_v42 }
 0x11b   : > { %v581_v63 = vadd.f32 %v2990_v34, %v2987_v30  ;;  %v563_v34 = vadd.f32 %v2952_v4, %v2940_v44 }
 0x11c   : > { %v3020_v7 = vmul.f32 0.16666667, %v647_v62  ;;  %v3053_v33 = vpop.permute.xlu1 %879  ;;  %v3075_v62 = vmul.f32 0.16666667, %v639_v55  ;;  %v592_v54 = vadd.f32 3.0, %v561_v58 }
 0x11d   : > { %v600_v55 = vadd.f32 3.0, %v581_v63 }
 0x11e   : > { %940 = vrot.lane.b32.xlu1 %v3004_v53, %s4962_s28  ;;  %1522 = vrot.lane.b32.xlu0 %v2964_v11, %s2650_s18  ;;  %4976 = vst [vmem:[#allocation14_spill] sm:$0xff] %v3020_v7  ;;  %4983 = vst [vmem:[#allocation21_spill] sm:$0xff] %v3075_v62  ;;  %v3077_v8 = vpop.permute.xlu0 %883  ;;  %v608_v42 = vmax.f32 %v592_v54, 0.0  ;;  %v618_v54 = vmax.f32 %v602_v32, 0.0 }
 0x11f   : > { %4984 = vst [vmem:[#allocation22_spill] sm:$0xff] %v3077_v8  ;;  %v616_v39 = vmax.f32 %v600_v55, 0.0 }
 0x120   : > { %v3060_v48 = vpop.permute.xlu1 %1017  ;;  %v624_v50 = vmin.f32 %v608_v42, 6.0  ;;  %v569_v42 = vadd.f32 %v2966_v14, %v2976_v17  ;;  %v634_v38 = vmin.f32 %v618_v54, 6.0 }
 0x122   : > { %1082 = vrot.lane.b32.xlu1 %v3004_v53, %s2647_s15  ;;  %950 = vrot.lane.b32.xlu0 %v3020_v7, %s4962_s28  ;;  %v3090_v61 = vpop.permute.xlu0 %887  ;;  %v640_v30 = vmul.f32 %v624_v50, %v561_v58  ;;  %v593_v58 = vadd.f32 3.0, %v563_v34  ;;  %v595_v4 = vadd.f32 3.0, %v569_v42  ;;  %v632_v50 = vmin.f32 %v616_v39, 6.0 }
 0x123   : > { %4985 = vst [vmem:[#allocation23_spill] sm:$0xff] %v3090_v61 }
 0x124   : > { %v3070_v59 = vpop.permute.xlu1 %1025  ;;  %v609_v55 = vmax.f32 %v593_v58, 0.0  ;;  %v648_v29 = vmul.f32 %v632_v50, %v581_v63  ;;  %v565_v63 = vadd.f32 %v2958_v9, %v2940_v44 }
 0x125   : > { %4982 = vst [vmem:[#allocation20_spill] sm:$0xff] %v3070_v59 }
 0x126   : > { %1224 = vrot.lane.b32.xlu1 %v3004_v53, %s2648_s16  ;;  %1090 = vrot.lane.b32.xlu0 %v3006_v57, %s2647_s15  ;;  %v3129_v58 = vmul.f32 0.16666667, %v648_v29 }
 0x128   : > { %v3082_v26 = vpop.permute.xlu1 %1159 }
 0x12a   : > { %1366 = vrot.lane.b32.xlu1 %v3004_v53, %s2649_s17  ;;  %1187 = vperm.xlu0 %2522, %v2812_v12  }
 0x12c   : > { %v3093_v49 = vpop.permute.xlu1 %1167 }
 0x12d   : > { %4986 = vst [vmem:[#allocation24_spill] sm:$0xff] %v3093_v49 }
 0x12e   : > { %813 = vrot.lane.b32.xlu1 %v3039_v24, %s2646_s29  ;;  %2524 = vset.pattern.permute.xlu0 %v4819_v36  ;;  %v3102_v36 = vpop.permute.xlu0 %891 }
 0x12f   : > { %1305 = vperm.xlu0 %2524, %v2837_v18   ;;  %4987 = vst [vmem:[#allocation25_spill] sm:$0xff] %v3102_v36  ;;  %v650_v36 = vmul.f32 %v634_v38, %v585_v19 }
 0x131   : > { %v3121_v49 = vmul.f32 0.16666667, %v650_v36 }
 0x132   : > { %956 = vrot.lane.b32.xlu1 %v3039_v24, %s4962_s28  ;;  %v3115_v14 = vpop.permute.xlu0 %895 }
 0x133   : > { %1313 = vperm.xlu0 %2524, %v2788_v3   ;;  %4989 = vst [vmem:[#allocation27_spill] sm:$0xff] %v3115_v14 }
 0x136   : > { %1098 = vrot.lane.b32.xlu1 %v3039_v24, %s2647_s15  ;;  %v3127_v38 = vpop.permute.xlu0 %899 }
 0x137   : > { %1317 = vperm.xlu0 %2524, %v2866_v25   ;;  %4991 = vst [vmem:[#allocation29_spill] sm:$0xff] %v3127_v38 }
 0x13a   : > { %1240 = vrot.lane.b32.xlu1 %v3039_v24, %s2648_s16  ;;  %v3143_v29 = vpop.permute.xlu0 %903 }
 0x13b   : > { %1321 = vperm.xlu0 %2524, %v2802_v10   ;;  %4992 = vst [vmem:[#allocation30_spill] sm:$0xff] %v3143_v29 }
 0x13e   : > { %1382 = vrot.lane.b32.xlu1 %v3039_v24, %s2649_s17  ;;  %v3155_v9 = vpop.permute.xlu0 %1021 }
 0x13f   : > { %1325 = vperm.xlu0 %2524, %v2876_v27  }
 0x142   : > { %799 = vrot.lane.b32.xlu1 %v3075_v62, %s2646_s29 }
 0x143   : > { %2525 = vset.pattern.permute.xlu0 %v2642_v37  ;;  %v575_v37 = vadd.f32 %v2979_v23, %v2944_v46  ;;  %v3108_v46 = vpop.permute.xlu1 %1301  ;;  %v3110_v23 = vmul.f32 0.16666667, %v640_v30  ;;  %v611_v30 = vmax.f32 %v595_v4, 0.0 }
 0x144   : > { %1447 = vperm.xlu0 %2525, %v2837_v18  }
 0x145   : > { %v598_v0 = vadd.f32 3.0, %v575_v37  ;;  %4988 = vst [vmem:[#allocation26_spill] sm:$0xff] %v3110_v23  ;;  %v627_v39 = vmin.f32 %v611_v30, 6.0 }
 0x146   : > { %942 = vrot.lane.b32.xlu1 %v3075_v62, %s4962_s28 }
 0x147   : > { %v614_v32 = vmax.f32 %v598_v0, 0.0  ;;  %v3119_v54 = vpop.permute.xlu1 %1309  ;;  %v625_v0 = vmin.f32 %v609_v55, 6.0 }
 0x148   : > { %1455 = vperm.xlu0 %2525, %v2788_v3   ;;  %4990 = vst [vmem:[#allocation28_spill] sm:$0xff] %v3119_v54 }
 0x149   : > { %v630_v61 = vmin.f32 %v614_v32, 6.0  ;;  %v641_v36 = vmul.f32 %v625_v0, %v563_v34  ;;  %v643_v32 = vmul.f32 %v627_v39, %v569_v42  ;;  %v3164_v0 = vpop.permute.xlu0 %1029 }
 0x14a   : > { %1084 = vrot.lane.b32.xlu1 %v3075_v62, %s2647_s15  ;;  %4997 = vst [vmem:[#allocation35_spill] sm:$0xff] %v3164_v0 }
 0x14b   : > { %v646_v19 = vmul.f32 %v630_v61, %v575_v37  ;;  %v3133_v4 = vpop.permute.xlu1 %1443  ;;  %v3145_v61 = vmul.f32 0.16666667, %v641_v36  ;;  %v594_v37 = vadd.f32 3.0, %v565_v63  ;;  %v3151_v44 = vmul.f32 0.16666667, %v643_v32 }
 0x14c   : > { %1459 = vperm.xlu0 %2525, %v2866_v25  }
 0x14d   : > { %v3139_v50 = vmul.f32 0.16666667, %v646_v19  ;;  %4993 = vst [vmem:[#allocation31_spill] sm:$0xff] %v3145_v61  ;;  %4995 = vst [vmem:[#allocation33_spill] sm:$0xff] %v3151_v44  ;;  %v610_v42 = vmax.f32 %v594_v37, 0.0  ;;  %v3174_v36 = vpop.permute.xlu0 %1033  ;;  %v571_v37 = vadd.f32 %v2970_v16, %v2976_v17  ;;  %v5004_v17 = vmov 6  }
 0x14e   : > { %1226 = vrot.lane.b32.xlu1 %v3075_v62, %s2648_s16  ;;  %4999 = vst [vmem:[#allocation37_spill] sm:$0xff] %v3174_v36 }
 0x14f   : > { %v3149_v34 = vpop.permute.xlu1 %1451  ;;  %v626_v30 = vmin.f32 %v610_v42, 6.0 }
 0x150   : > { %1463 = vperm.xlu0 %2525, %v2802_v10   ;;  %4994 = vst [vmem:[#allocation32_spill] sm:$0xff] %v3149_v34 }
 0x151   : > { %v642_v39 = vmul.f32 %v626_v30, %v565_v63  ;;  %v3188_v42 = vpop.permute.xlu0 %1037  ;;  %v596_v30 = vadd.f32 3.0, %v571_v37 }
 0x152   : > { %815 = vrot.lane.b32.xlu1 %v3110_v23, %s2646_s29  ;;  %5002 = vst [vmem:[#allocation40_spill] sm:$0xff] %v3188_v42 }
 0x153   : > { %v3161_v55 = vpop.permute.xlu1 %1585  ;;  %v3176_v32 = vmul.f32 0.16666667, %v642_v39  ;;  %v612_v14 = vmax.f32 %v596_v30, 0.0 }
 0x154   : > { %1664 = vrot.lane.b32.xlu0 %v2964_v11, %s2651_s19  ;;  %4996 = vst [vmem:[#allocation34_spill] sm:$0xff] %v3161_v55 }
 0x155   : > { %5000 = vst [vmem:[#allocation38_spill] sm:$0xff] %v3176_v32  ;;  %v3197_v38 = vpop.permute.xlu0 %1041  ;;  %v628_v42 = vmin.f32 %v612_v14, 6.0 }
 0x156   : > { %958 = vrot.lane.b32.xlu1 %v3110_v23, %s4962_s28  ;;  %5003 = vst [vmem:[#allocation41_spill] sm:$0xff] %v3197_v38 }
 0x157   : > { %v3170_v19 = vpop.permute.xlu1 %1593  ;;  %v644_v30 = vmul.f32 %v628_v42, %v571_v37 }
 0x158   : > { %968 = vrot.lane.b32.xlu0 %v3121_v49, %s4962_s28  ;;  %4998 = vst [vmem:[#allocation36_spill] sm:$0xff] %v3170_v19 }
 0x159   : > { %v3207_v0 = vpop.permute.xlu0 %1045  ;;  %v3219_v14 = vmul.f32 0.16666667, %v644_v30 }
 0x15a   : > { %1100 = vrot.lane.b32.xlu1 %v3110_v23, %s2647_s15  ;;  %5005 = vst [vmem:[#allocation42_spill] sm:$0xff] %v3207_v0 }
 0x15b   : > { %v3182_v63 = vpop.permute.xlu1 %1727  ;;  %5006 = vst [vmem:[#allocation43_spill] sm:$0xff] %v3219_v14 }
 0x15c   : > { %1108 = vrot.lane.b32.xlu0 %v3129_v58, %s2647_s15  ;;  %5001 = vst [vmem:[#allocation39_spill] sm:$0xff] %v3182_v63 }
 0x15e   : > { %1242 = vrot.lane.b32.xlu1 %v3110_v23, %s2648_s16 }
 0x160   : > { %1248 = vrot.lane.b32.xlu0 %v3139_v50, %s2648_s16 }
 0x162   : > { %801 = vrot.lane.b32.xlu1 %v3145_v61, %s2646_s29 }
 0x164   : > { %1372 = vrot.lane.b32.xlu0 %v3151_v44, %s2649_s17 }
 0x166   : > { %944 = vrot.lane.b32.xlu1 %v3145_v61, %s4962_s28 }
 0x168   : > { %1467 = vperm.xlu0 %2525, %v2876_v27  }
 0x16a   : > { %1086 = vrot.lane.b32.xlu1 %v3145_v61, %s2647_s15 }
 0x16c   : > { %1806 = vrot.lane.b32.xlu0 %v2964_v11, %s2652_s20 }
 0x16e   : > { %1228 = vrot.lane.b32.xlu1 %v3145_v61, %s2648_s16 }
 0x170   : > { %1234 = vrot.lane.b32.xlu0 %v3020_v7, %s2648_s16 }
 0x172   : > { %817 = vrot.lane.b32.xlu1 %v3176_v32, %s2646_s29 }
 0x174   : > { %1374 = vrot.lane.b32.xlu0 %v3006_v57, %s2649_s17 }
 0x176   : > { %960 = vrot.lane.b32.xlu1 %v3176_v32, %s4962_s28 }
 0x178   : > { %v3192_v39 = vpop.permute.xlu1 %938  ;;  %1471 = vperm.xlu0 %2525, %v2812_v12  }
 0x17a   : > { %1102 = vrot.lane.b32.xlu1 %v3176_v32, %s2647_s15 }
 0x17c   : > { %v3199_v16 = vpop.permute.xlu1 %1080  ;;  %2527 = vset.pattern.permute.xlu0 %v5004_v17  ;;  %v3217_v17 = vpop.permute.xlu0 %1163 }
 0x17d   : > { %1589 = vperm.xlu0 %2527, %v2837_v18  }
 0x17e   : > { %803 = vrot.lane.b32.xlu1 %v3151_v44, %s2646_s29 }
 0x180   : > { %v3205_v36 = vpop.permute.xlu1 %1222  ;;  %v3228_v37 = vpop.permute.xlu0 %1171 }
 0x181   : > { %1597 = vperm.xlu0 %2527, %v2788_v3   ;;  %5007 = vst [vmem:[#allocation44_spill] sm:$0xff] %v3228_v37 }
 0x182   : > { %946 = vrot.lane.b32.xlu1 %v3151_v44, %s4962_s28 }
 0x184   : > { %v3212_v38 = vpop.permute.xlu1 %1364  ;;  %v3239_v30 = vpop.permute.xlu0 %1175 }
 0x185   : > { %1601 = vperm.xlu0 %2527, %v2866_v25   ;;  %5008 = vst [vmem:[#allocation45_spill] sm:$0xff] %v3239_v30  ;;  %v5010_v30 = vmov 7  }
 0x186   : > { %1088 = vrot.lane.b32.xlu1 %v3151_v44, %s2647_s15 }
 0x188   : > { %v3221_v29 = vpop.permute.xlu1 %811  ;;  %v3249_v34 = vpop.permute.xlu0 %1179 }
 0x189   : > { %1605 = vperm.xlu0 %2527, %v2802_v10   ;;  %5009 = vst [vmem:[#allocation46_spill] sm:$0xff] %v3249_v34 }
 0x18a   : > { %819 = vrot.lane.b32.xlu1 %v3219_v14, %s2646_s29 }
 0x18c   : > { %v3226_v0 = vpop.permute.xlu1 %797  ;;  %v3260_v47 = vpop.permute.xlu0 %1183 }
 0x18d   : > { %1609 = vperm.xlu0 %2527, %v2876_v27   ;;  %5011 = vst [vmem:[#allocation47_spill] sm:$0xff] %v3260_v47 }
 0x18e   : > { %962 = vrot.lane.b32.xlu1 %v3219_v14, %s4962_s28 }
 0x190   : > { %v3233_v42 = vpop.permute.xlu1 %940  ;;  %v3269_v59 = vpop.permute.xlu0 %795 }
 0x191   : > { %1376 = vrot.lane.b32.xlu0 %v3020_v7, %s2649_s17 }
 0x192   : > { %1104 = vrot.lane.b32.xlu1 %v3219_v14, %s2647_s15 }
 0x194   : > { %v3241_v19 = vpop.permute.xlu1 %1082  ;;  %v3278_v47 = vpop.permute.xlu0 %954 }
 0x195   : > { %1516 = vrot.lane.b32.xlu0 %v3006_v57, %s2650_s18 }
 0x196   : > { %805 = vrot.lane.b32.xlu1 %v3006_v57, %s2646_s29 }
 0x198   : > { %v3247_v37 = vpop.permute.xlu1 %1224  ;;  %v3288_v31 = vpop.permute.xlu0 %1096 }
 0x199   : > { %1613 = vperm.xlu0 %2527, %v2812_v12  }
 0x19a   : > { %821 = vrot.lane.b32.xlu1 %v3139_v50, %s2646_s29 }
 0x19c   : > { %v3254_v54 = vpop.permute.xlu1 %1366  ;;  %v3300_v28 = vpop.permute.xlu0 %1238 }
 0x19d   : > { %2528 = vset.pattern.permute.xlu0 %v5010_v30 }
 0x19e   : > { %964 = vrot.lane.b32.xlu1 %v3139_v50, %s4962_s28  ;;  %1731 = vperm.xlu0 %2528, %v2837_v18  }
 0x1a0   : > { %v3262_v45 = vpop.permute.xlu1 %813  ;;  %v3311_v56 = vpop.permute.xlu0 %1380 }
 0x1a2   : > { %807 = vrot.lane.b32.xlu1 %v3020_v7, %s2646_s29  ;;  %1739 = vperm.xlu0 %2528, %v2788_v3  }
 0x1a4   : > { %v3267_v34 = vpop.permute.xlu1 %956  ;;  %v3319_v63 = vpop.permute.xlu0 %948 }
 0x1a5   : > { %5016 = vst [vmem:[#allocation52_spill] sm:$0xff] %v3319_v63 }
 0x1a6   : > { %823 = vrot.lane.b32.xlu1 %v3129_v58, %s2646_s29  ;;  %1743 = vperm.xlu0 %2528, %v2866_v25  }
 0x1a8   : > { %v3274_v30 = vpop.permute.xlu1 %1098 }
 0x1aa   : > { %1244 = vrot.lane.b32.xlu1 %v3176_v32, %s2648_s16  ;;  %1747 = vperm.xlu0 %2528, %v2802_v10  }
 0x1ac   : > { %v3281_v51 = vpop.permute.xlu1 %1240 }
 0x1ae   : > { %1368 = vrot.lane.b32.xlu1 %v3075_v62, %s2649_s17  ;;  %1751 = vperm.xlu0 %2528, %v2876_v27  }
 0x1b0   : > { %v3286_v8 = vpop.permute.xlu1 %1382 }
 0x1b2   : > { %1384 = vrot.lane.b32.xlu1 %v3110_v23, %s2649_s17  ;;  %1518 = vrot.lane.b32.xlu0 %v3020_v7, %s2650_s18 }
 0x1b4   : > { %v3294_v21 = vpop.permute.xlu1 %799 }
 0x1b5   : > { %5012 = vst [vmem:[#allocation48_spill] sm:$0xff] %v3294_v21 }
 0x1b6   : > { %1506 = vrot.lane.b32.xlu1 %v2956_v6, %s2650_s18  ;;  %1658 = vrot.lane.b32.xlu0 %v3006_v57, %s2651_s19 }
 0x1b8   : > { %v3304_v43 = vpop.permute.xlu1 %942 }
 0x1b9   : > { %5013 = vst [vmem:[#allocation49_spill] sm:$0xff] %v3304_v43  ;;  %v633_v43 = vmin.f32 %v617_v2, 6.0 }
 0x1ba   : > { %1508 = vrot.lane.b32.xlu1 %v3004_v53, %s2650_s18  ;;  %1755 = vperm.xlu0 %2528, %v2812_v12  }
 0x1bb   : > { %v649_v41 = vmul.f32 %v633_v43, %v583_v13 }
 0x1bc   : > { %v3309_v21 = vpop.permute.xlu1 %1084 }
 0x1bd   : > { %5014 = vst [vmem:[#allocation50_spill] sm:$0xff] %v3309_v21 }
 0x1be   : > { %1524 = vrot.lane.b32.xlu1 %v3039_v24, %s2650_s18  ;;  %2529 = vset.pattern.permute.xlu0 %v2653_v35 }
 0x1bf   : > { %1873 = vperm.xlu0 %2529, %v2837_v18   ;;  %v3328_v18 = vmul.f32 0.16666667, %v649_v41 }
 0x1c0   : > { %v3316_v15 = vpop.permute.xlu1 %1226 }
 0x1c1   : > { %5015 = vst [vmem:[#allocation51_spill] sm:$0xff] %v3316_v15  ;;  %v3330_v15 = vpop.permute.xlu0 %1522 }
 0x1c2   : > { %1735 = vperm.xlu1 %2521, %v2854_v22  }
 0x1c3   : > { %1881 = vperm.xlu0 %2529, %v2788_v3  }
 0x1c4   : > { %v3322_v21 = vpop.permute.xlu1 %815 }
 0x1c5   : > { %5017 = vst [vmem:[#allocation53_spill] sm:$0xff] %v3322_v21  ;;  %v3337_v2 = vpop.permute.xlu0 %950  ;;  %v827_v21 = vlaneseq }
 0x1c6   : > { %2523 = vset.pattern.permute.xlu1 %v2653_v35  ;;  %5020 = vst [vmem:[#allocation56_spill] sm:$0xff] %v3337_v2 }
 0x1c7   : > { %1869 = vperm.xlu1 %2523, %v2776_v1   ;;  %1885 = vperm.xlu0 %2529, %v2866_v25  }
 0x1c8   : > { %v3326_v55 = vpop.permute.xlu1 %958 }
 0x1c9   : > { %5018 = vst [vmem:[#allocation54_spill] sm:$0xff] %v3326_v55 }
 0x1cb   : > { %809 = vrot.lane.b32.xlu1 %v3328_v18, %s2646_s29  ;;  %1889 = vperm.xlu0 %2529, %v2802_v10   ;;  %v3350_v10 = vpop.permute.xlu0 %1090 }
 0x1cc   : > { %v3335_v3 = vpop.permute.xlu1 %1100  ;;  %5023 = vst [vmem:[#allocation59_spill] sm:$0xff] %v3350_v10  ;;  %v5028_v10 = vmov 0  }
 0x1cd   : > { %5019 = vst [vmem:[#allocation55_spill] sm:$0xff] %v3335_v3 }
 0x1cf   : > { %825 = vrot.lane.b32.xlu1 %v3121_v49, %s2646_s29  ;;  %1893 = vperm.xlu0 %2529, %v2876_v27   ;;  %v3358_v27 = vpop.permute.xlu0 %1187  ;;  %s2654_s29 = smov [#allocation2]  }
 0x1d0   : > { %v3342_v1 = vpop.permute.xlu1 %1242  ;;  %5025 = vst [vmem:[#allocation61_spill] sm:$0xff] %v3358_v27 }
 0x1d1   : > { %5021 = vst [vmem:[#allocation57_spill] sm:$0xff] %v3342_v1 }
 0x1d3   : > { %966 = vrot.lane.b32.xlu1 %v3129_v58, %s4962_s28  ;;  %1660 = vrot.lane.b32.xlu0 %v3020_v7, %s2651_s19  ;;  %v3365_v35 = vpop.permute.xlu0 %1305 }
 0x1d4   : > { %v3348_v25 = vpop.permute.xlu1 %801 }
 0x1d5   : > { %5022 = vst [vmem:[#allocation58_spill] sm:$0xff] %v3348_v25 }
 0x1d7   : > { %1106 = vrot.lane.b32.xlu1 %v3139_v50, %s2647_s15  ;;  %1800 = vrot.lane.b32.xlu0 %v3006_v57, %s2652_s20  ;;  %v3380_v63 = vpop.permute.xlu0 %1313 }
 0x1d8   : > { %v3356_v43 = vpop.permute.xlu1 %944  ;;  %5030 = vst [vmem:[#allocation65_spill] sm:$0xff] %v3380_v63 }
 0x1d9   : > { %5024 = vst [vmem:[#allocation60_spill] sm:$0xff] %v3356_v43 }
 0x1db   : > { %1230 = vrot.lane.b32.xlu1 %v3151_v44, %s2648_s16  ;;  %1897 = vperm.xlu0 %2529, %v2812_v12  }
 0x1dc   : > { %v3363_v13 = vpop.permute.xlu1 %1086 }
 0x1dd   : > { %5026 = vst [vmem:[#allocation62_spill] sm:$0xff] %v3363_v13 }
 0x1df   : > { %1246 = vrot.lane.b32.xlu1 %v3219_v14, %s2648_s16  ;;  %1678 = vrot.lane.b32.xlu0 %v3121_v49, %s2651_s19 }
 0x1e0   : > { %v3371_v41 = vpop.permute.xlu1 %1228  ;;  %2530 = vset.pattern.permute.xlu0 %v5028_v10 }
 0x1e1   : > { %5027 = vst [vmem:[#allocation63_spill] sm:$0xff] %v3371_v41  ;;  %v3388_v41 = vpop.permute.xlu0 %1317 }
 0x1e2   : > { %5032 = vst [vmem:[#allocation67_spill] sm:$0xff] %v3388_v41 }
 0x1e3   : > { %1370 = vrot.lane.b32.xlu1 %v3145_v61, %s2649_s17  ;;  %1818 = vrot.lane.b32.xlu0 %v3129_v58, %s2652_s20 }
 0x1e4   : > { %v3378_v2 = vpop.permute.xlu1 %817 }
 0x1e5   : > { %5029 = vst [vmem:[#allocation64_spill] sm:$0xff] %v3378_v2  ;;  %v3398_v63 = vpop.permute.xlu0 %1321 }
 0x1e6   : > { %5035 = vst [vmem:[#allocation70_spill] sm:$0xff] %v3398_v63 }
 0x1e7   : > { %1386 = vrot.lane.b32.xlu1 %v3176_v32, %s2649_s17  ;;  %1820 = vrot.lane.b32.xlu0 %v3121_v49, %s2652_s20 }
 0x1e8   : > { %v3386_v27 = vpop.permute.xlu1 %960 }
 0x1e9   : > { %5031 = vst [vmem:[#allocation66_spill] sm:$0xff] %v3386_v27  ;;  %v3404_v27 = vpop.permute.xlu0 %1325 }
 0x1ea   : > { %5037 = vst [vmem:[#allocation72_spill] sm:$0xff] %v3404_v27 }
 0x1eb   : > { %1510 = vrot.lane.b32.xlu1 %v3075_v62, %s2650_s18 }
 0x1ec   : > { %v3392_v13 = vpop.permute.xlu1 %1102 }
 0x1ed   : > { %5033 = vst [vmem:[#allocation68_spill] sm:$0xff] %v3392_v13 }
 0x1ef   : > { %1526 = vrot.lane.b32.xlu1 %v3110_v23, %s2650_s18 }
 0x1f0   : > { %v3396_v43 = vpop.permute.xlu1 %803 }
 0x1f1   : > { %5034 = vst [vmem:[#allocation69_spill] sm:$0xff] %v3396_v43  ;;  %v3414_v43 = vpop.permute.xlu0 %1447 }
 0x1f3   : > { %1648 = vrot.lane.b32.xlu1 %v2956_v6, %s2651_s19 }
 0x1f4   : > { %v3402_v25 = vpop.permute.xlu1 %946 }
 0x1f5   : > { %5036 = vst [vmem:[#allocation71_spill] sm:$0xff] %v3402_v25  ;;  %v3419_v2 = vpop.permute.xlu0 %1455  ;;  %v5043_v25 = vmov 3  }
 0x1f6   : > { %5041 = vst [vmem:[#allocation76_spill] sm:$0xff] %v3419_v2 }
 0x1f7   : > { %1650 = vrot.lane.b32.xlu1 %v3004_v53, %s2651_s19 }
 0x1f8   : > { %v3408_v41 = vpop.permute.xlu1 %1088 }
 0x1f9   : > { %5038 = vst [vmem:[#allocation73_spill] sm:$0xff] %v3408_v41 }
 0x1fb   : > { %1666 = vrot.lane.b32.xlu1 %v3039_v24, %s2651_s19 }
 0x1fc   : > { %v3412_v13 = vpop.permute.xlu1 %819 }
 0x1fd   : > { %5039 = vst [vmem:[#allocation74_spill] sm:$0xff] %v3412_v13  ;;  %v3430_v13 = vpop.permute.xlu0 %1459 }
 0x1fe   : > { %5045 = vst [vmem:[#allocation79_spill] sm:$0xff] %v3430_v13 }
 0x1ff   : > { %1877 = vperm.xlu1 %2523, %v2854_v22  }
 0x200   : > { %v3417_v63 = vpop.permute.xlu1 %962 }
 0x201   : > { %5040 = vst [vmem:[#allocation75_spill] sm:$0xff] %v3417_v63  ;;  %v3436_v2 = vpop.permute.xlu0 %1463 }
 0x202   : > { %5047 = vst [vmem:[#allocation81_spill] sm:$0xff] %v3436_v2 }
 0x203   : > { %952 = vrot.lane.b32.xlu1 %v3328_v18, %s4962_s28 }
 0x204   : > { %v3423_v27 = vpop.permute.xlu1 %1104  ;;  %2526 = vset.pattern.permute.xlu1 %v5043_v25 }
 0x205   : > { %5042 = vst [vmem:[#allocation77_spill] sm:$0xff] %v3423_v27 }
 0x207   : > { %1092 = vrot.lane.b32.xlu1 %v3020_v7, %s2647_s15 }
 0x208   : > { %v3428_v41 = vpop.permute.xlu1 %805 }
 0x209   : > { %5044 = vst [vmem:[#allocation78_spill] sm:$0xff] %v3428_v41  ;;  %v3446_v41 = vpop.permute.xlu0 %1664 }
 0x20a   : > { %5050 = vst [vmem:[#allocation84_spill] sm:$0xff] %v3446_v41  ;;  %v716_v41 = vmul.f32 %v2932_v40, %v2964_v11 }
 0x20b   : > { %1232 = vrot.lane.b32.xlu1 %v3006_v57, %s2648_s16 }
 0x20c   : > { %v3434_v22 = vpop.permute.xlu1 %821 }
 0x20d   : > { %5046 = vst [vmem:[#allocation80_spill] sm:$0xff] %v3434_v22  ;;  %v3452_v22 = vpop.permute.xlu0 %968 }
 0x20e   : > { %5052 = vst [vmem:[#allocation86_spill] sm:$0xff] %v3452_v22 }
 0x20f   : > { %1329 = vperm.xlu1 %2526, %v2812_v12  }
 0x210   : > { %v3439_v63 = vpop.permute.xlu1 %964 }
 0x211   : > { %5048 = vst [vmem:[#allocation82_spill] sm:$0xff] %v3439_v63  ;;  %v3460_v2 = vpop.permute.xlu0 %1108 }
 0x212   : > { %5054 = vst [vmem:[#allocation88_spill] sm:$0xff] %v3460_v2 }
 0x213   : > { %1388 = vrot.lane.b32.xlu1 %v3219_v14, %s2649_s17 }
 0x214   : > { %v3443_v25 = vpop.permute.xlu1 %807  ;;  %2531 = vset.pattern.permute.xlu1 %v5028_v10 }
 0x215   : > { %5049 = vst [vmem:[#allocation83_spill] sm:$0xff] %v3443_v25  ;;  %v3466_v25 = vpop.permute.xlu0 %1248 }
 0x216   : > { %5056 = vst [vmem:[#allocation90_spill] sm:$0xff] %v3466_v25 }
 0x217   : > { %1512 = vrot.lane.b32.xlu1 %v3145_v61, %s2650_s18 }
 0x218   : > { %v3450_v13 = vpop.permute.xlu1 %823 }
 0x219   : > { %5051 = vst [vmem:[#allocation85_spill] sm:$0xff] %v3450_v13  ;;  %v3474_v63 = vpop.permute.xlu0 %1372 }
 0x21a   : > { %5058 = vst [vmem:[#allocation92_spill] sm:$0xff] %v3474_v63 }
 0x21b   : > { %1528 = vrot.lane.b32.xlu1 %v3176_v32, %s2650_s18 }
 0x21c   : > { %v3456_v12 = vpop.permute.xlu1 %1244 }
 0x21d   : > { %5053 = vst [vmem:[#allocation87_spill] sm:$0xff] %v3456_v12  ;;  %v3480_v12 = vpop.permute.xlu0 %1467 }
 0x21e   : > { %5060 = vst [vmem:[#allocation94_spill] sm:$0xff] %v3480_v12 }
 0x21f   : > { %1652 = vrot.lane.b32.xlu1 %v3075_v62, %s2651_s19 }
 0x220   : > { %v3464_v10 = vpop.permute.xlu1 %1368 }
 0x221   : > { %5055 = vst [vmem:[#allocation89_spill] sm:$0xff] %v3464_v10  ;;  %v3488_v27 = vpop.permute.xlu0 %1806 }
 0x222   : > { %5061 = vst [vmem:[#allocation95_spill] sm:$0xff] %v3488_v27  ;;  %v2430_v27 = vld [vmem:[%s4811_s5 + $0x2] ss:$8 sm:$0x3] }
 0x223   : > { %1668 = vrot.lane.b32.xlu1 %v3110_v23, %s2651_s19 }
 0x224   : > { %v3470_v13 = vpop.permute.xlu1 %1384 }
 0x225   : > { %5057 = vst [vmem:[#allocation91_spill] sm:$0xff] %v3470_v13  ;;  %v3494_v22 = vpop.permute.xlu0 %1234 }
 0x226   : > { %5062 = vst [vmem:[#allocation96_spill] sm:$0xff] %v3494_v22 }
 0x227   : > { %1790 = vrot.lane.b32.xlu1 %v2956_v6, %s2652_s20 }
 0x228   : > { %v3478_v2 = vpop.permute.xlu1 %1506 }
 0x229   : > { %5059 = vst [vmem:[#allocation93_spill] sm:$0xff] %v3478_v2  ;;  %v3502_v10 = vpop.permute.xlu0 %1374 }
 0x22a   : > { %5064 = vst [vmem:[#allocation98_spill] sm:$0xff] %v3502_v10 }
 0x22b   : > { %1792 = vrot.lane.b32.xlu1 %v3004_v53, %s2652_s20 }
 0x22c   : > { %v3484_v25 = vpop.permute.xlu1 %1508 }
 0x22d   : > { %v3510_v3 = vpop.permute.xlu0 %1471 }
 0x22e   : > { %5067 = vst [vmem:[#allocation101_spill] sm:$0xff] %v3510_v3 }
 0x22f   : > { %1808 = vrot.lane.b32.xlu1 %v3039_v24, %s2652_s20 }
 0x230   : > { %v3492_v63 = vpop.permute.xlu1 %1524 }
 0x233   : > { %1094 = vrot.lane.b32.xlu1 %v3328_v18, %s2647_s15 }
 0x237   : > { %1110 = vrot.lane.b32.xlu1 %v3121_v49, %s2647_s15  ;;  %s404_s15 = sand.u32 1, %s2627_s22  }
 0x238   : > { %s4764_s25 = scalar_lea.sflag [#allocation3], %s404_s15 }
 0x23b   : > { %1250 = vrot.lane.b32.xlu1 %v3129_v58, %s2648_s16 }
 0x23f   : > { %1390 = vrot.lane.b32.xlu1 %v3139_v50, %s2649_s17 }
 0x241   : > { %v3498_v12 = vpop.permute.xlu1 %1735 }
 0x242   : > { %5063 = vst [vmem:[#allocation97_spill] sm:$0xff] %v3498_v12  ;;  %v3518_v12 = vpop.permute.xlu0 %1589 }
 0x243   : > { %1514 = vrot.lane.b32.xlu1 %v3151_v44, %s2650_s18  ;;  %5069 = vst [vmem:[#allocation103_spill] sm:$0xff] %v3518_v12 }
 0x246   : > { %v3504_v13 = vpop.permute.xlu1 %1869 }
 0x247   : > { %5065 = vst [vmem:[#allocation99_spill] sm:$0xff] %v3504_v13  ;;  %1530 = vrot.lane.b32.xlu1 %v3219_v14, %s2650_s18 }
 0x24a   : > { %v3508_v1 = vpop.permute.xlu1 %809 }
 0x24b   : > { %5066 = vst [vmem:[#allocation100_spill] sm:$0xff] %v3508_v1  ;;  %1654 = vrot.lane.b32.xlu1 %v3145_v61, %s2651_s19  ;;  %v3526_v1 = vpop.permute.xlu0 %1597 }
 0x24c   : > { %5072 = vst [vmem:[#allocation106_spill] sm:$0xff] %v3526_v1 }
 0x24e   : > { %v3514_v22 = vpop.permute.xlu1 %825 }
 0x24f   : > { %5068 = vst [vmem:[#allocation102_spill] sm:$0xff] %v3514_v22  ;;  %1670 = vrot.lane.b32.xlu1 %v3176_v32, %s2651_s19  ;;  %v3534_v22 = vpop.permute.xlu0 %1601 }
 0x250   : > { %5074 = vst [vmem:[#allocation108_spill] sm:$0xff] %v3534_v22 }
 0x252   : > { %v3520_v10 = vpop.permute.xlu1 %966 }
 0x253   : > { %5070 = vst [vmem:[#allocation104_spill] sm:$0xff] %v3520_v10  ;;  %1794 = vrot.lane.b32.xlu1 %v3075_v62, %s2652_s20 }
 0x256   : > { %v3524_v55 = vpop.permute.xlu1 %1106 }
 0x257   : > { %5071 = vst [vmem:[#allocation105_spill] sm:$0xff] %v3524_v55  ;;  %1810 = vrot.lane.b32.xlu1 %v3110_v23, %s2652_s20  ;;  %v3542_v55 = vpop.permute.xlu0 %1605  ;;  %v3588_v23 = vand.u32 127, %v827_v21 }
 0x258   : > { %5077 = vst [vmem:[#allocation111_spill] sm:$0xff] %v3542_v55 }
 0x259   : > { %vm829_vm1 = vcmp.lt.s32.totalorder %v3588_v23, 17  ;;  %vm970_vm2 = vcmp.lt.s32.totalorder %v3588_v23, 16  ;;  %vm1112_vm3 = vcmp.lt.s32.totalorder %v3588_v23, 15  ;;  %vm1254_vm4 = vcmp.lt.s32.totalorder %v3588_v23, 1 }
 0x25a   : > { %v3530_v3 = vpop.permute.xlu1 %1230  ;;  %v838_v12 = vsel %vm829_vm1, %v3221_v29, %v3269_v59  ;;  %v971_v11 = vsel %vm970_vm2, %v3192_v39, %v3278_v47  ;;  %vm1396_vm5 = vcmp.lt.s32.totalorder %v3588_v23, 127  ;;  %vm1538_vm6 = vcmp.lt.s32.totalorder %v3588_v23, 113 }
 0x25b   : > { %5073 = vst [vmem:[#allocation107_spill] sm:$0xff] %v3530_v3  ;;  %1236 = vrot.lane.b32.xlu1 %v3328_v18, %s2648_s16  ;;  %v3550_v3 = vpop.permute.xlu0 %1609  ;;  %vm1680_vm7 = vcmp.lt.s32.totalorder %v3588_v23, 112  ;;  %vm1822_vm8 = vcmp.lt.s32.totalorder %v3588_v23, 111 }
 0x25c   : > { %5079 = vst [vmem:[#allocation113_spill] sm:$0xff] %v3550_v3 }
 0x25e   : > { %v3536_v57 = vpop.permute.xlu1 %1246 }
 0x25f   : > { %5075 = vst [vmem:[#allocation109_spill] sm:$0xff] %v3536_v57  ;;  %1252 = vrot.lane.b32.xlu1 %v3121_v49, %s2648_s16 }
 0x262   : > { %v3540_v10 = vpop.permute.xlu1 %1370 }
 0x263   : > { %5076 = vst [vmem:[#allocation110_spill] sm:$0xff] %v3540_v10  ;;  %1392 = vrot.lane.b32.xlu1 %v3129_v58, %s2649_s17  ;;  %v3558_v10 = vpop.permute.xlu0 %1376 }
 0x264   : > { %5082 = vst [vmem:[#allocation116_spill] sm:$0xff] %v3558_v10 }
 0x266   : > { %v3546_v1 = vpop.permute.xlu1 %1386 }
 0x267   : > { %5078 = vst [vmem:[#allocation112_spill] sm:$0xff] %v3546_v1  ;;  %1532 = vrot.lane.b32.xlu1 %v3139_v50, %s2650_s18  ;;  %v3566_v1 = vpop.permute.xlu0 %1516 }
 0x268   : > { %5084 = vst [vmem:[#allocation118_spill] sm:$0xff] %v3566_v1 }
 0x26a   : > { %v3552_v22 = vpop.permute.xlu1 %1510 }
 0x26b   : > { %5080 = vst [vmem:[#allocation114_spill] sm:$0xff] %v3552_v22  ;;  %1656 = vrot.lane.b32.xlu1 %v3151_v44, %s2651_s19 }
 0x26e   : > { %v3556_v57 = vpop.permute.xlu1 %1526 }
 0x26f   : > { %5081 = vst [vmem:[#allocation115_spill] sm:$0xff] %v3556_v57  ;;  %1672 = vrot.lane.b32.xlu1 %v3219_v14, %s2651_s19  ;;  %v3574_v57 = vpop.permute.xlu0 %1613 }
 0x270   : > { %5087 = vst [vmem:[#allocation121_spill] sm:$0xff] %v3574_v57 }
 0x272   : > { %v3562_v55 = vpop.permute.xlu1 %1648 }
 0x273   : > { %5083 = vst [vmem:[#allocation117_spill] sm:$0xff] %v3562_v55  ;;  %1796 = vrot.lane.b32.xlu1 %v3145_v61, %s2652_s20  ;;  %v3582_v61 = vpop.permute.xlu0 %1731 }
 0x274   : > { %5089 = vst [vmem:[#allocation123_spill] sm:$0xff] %v3582_v61 }
 0x276   : > { %v3568_v3 = vpop.permute.xlu1 %1650 }
 0x277   : > { %5085 = vst [vmem:[#allocation119_spill] sm:$0xff] %v3568_v3  ;;  %1812 = vrot.lane.b32.xlu1 %v3176_v32, %s2652_s20  ;;  %v849_v32 = vshrl.u32 %v827_v21, 7  ;;  %v3595_v62 = vpop.permute.xlu0 %1739  ;;  %v2429_v21 = vld [vmem:[%s4811_s5 + $0x1] ss:$8 sm:$0x3] }
 0x278   : > { %5092 = vst [vmem:[#allocation126_spill] sm:$0xff] %v3595_v62 }
 0x279   : > { %v3599_v13 = vsub.s32 0, %v849_v32 }
 0x27a   : > { %v3572_v22 = vpop.permute.xlu1 %1666 }
 0x27b   : > { %5086 = vst [vmem:[#allocation120_spill] sm:$0xff] %v3572_v22  ;;  %1378 = vrot.lane.b32.xlu1 %v3328_v18, %s2649_s17  ;;  %5093 = vst [vmem:[#allocation127_spill] sm:$0xff] %v3599_v13  ;;  %v3634_v55 = vpop.permute.xlu0 %1743 }
 0x27c   : > { %5095 = vst [vmem:[#allocation129_spill] sm:$0xff] %v3634_v55  ;;  %v717_v55 = vmul.f32 %v2954_v5, %v3004_v53 }
 0x27e   : > { %v3578_v10 = vpop.permute.xlu1 %1877 }
 0x27f   : > { %5088 = vst [vmem:[#allocation122_spill] sm:$0xff] %v3578_v10  ;;  %1394 = vrot.lane.b32.xlu1 %v3121_v49, %s2649_s17  ;;  %v846_v10 = vld [vmem:[%s4811_s5] ss:$8 sm:$0x3] }
 0x282   : > { %v3584_v1 = vpop.permute.xlu1 %952 }
 0x283   : > { %5090 = vst [vmem:[#allocation124_spill] sm:$0xff] %v3584_v1  ;;  %1534 = vrot.lane.b32.xlu1 %v3129_v58, %s2650_s18  ;;  %v3601_v1 = vsub.s32 1, %v849_v32  ;;  %v830_v32 = vsel %vm829_vm1, %v3269_v59, %v3221_v29  ;;  %v979_v59 = vsel %vm970_vm2, %v3278_v47, %v3192_v39  ;;  %v718_v47 = vmul.f32 %v2954_v5, %v3039_v24 }
 0x284   : > { %v780_v39 = vadd.f32 %v3012_v60, %v716_v41  ;;  %v831_v41 = vsel %vm829_vm1, %v3226_v0, %v3262_v45 }
 0x285   : > { %v3611_v61 = vrot.slane %v846_v10, %v3601_v1  ;;  %v3647_v7 = vrot.slane %v2429_v21, %v3601_v1 }
 0x286   : > { %v3590_v57 = vpop.permute.xlu1 %1092 }
 0x287   : > { %5091 = vst [vmem:[#allocation125_spill] sm:$0xff] %v3590_v57  ;;  %1674 = vrot.lane.b32.xlu1 %v3139_v50, %s2651_s19  ;;  %v3608_v57 = vrot.slane %v846_v10, %v3599_v13  ;;  %v715_v10 = vmul.f32 %v2932_v40, %v2956_v6  ;;  %v859_v6 = vmul.f32 %v3611_v61, %v830_v32  ;;  %v2431_v40 = vld [vmem:[%s4811_s5 + $0x3] ss:$8 sm:$0x3] }
 0x288   : > { %v2432_v32 = vld [vmem:[%s4811_s5 + $0x5] ss:$8 sm:$0x3]  ;;  %v1001_v53 = vmul.f32 %v3647_v7, %v971_v11  ;;  %v1263_v11 = vsel %vm1254_vm4, %v3300_v28, %v3205_v36 }
 0x289   : > { %v858_v29 = vmul.f32 %v3608_v57, %v838_v12  ;;  %v3660_v12 = vrot.slane %v2430_v27, %v3599_v13  ;;  %v907_v22 = vmul.f32 %v3065_v52, %v859_v6  ;;  %v3689_v5 = vrot.slane %v2432_v32, %v3599_v13 }
 0x28a   : > { %v3613_v62 = vpop.permute.xlu1 %1232  ;;  %v3696_v24 = vrot.slane %v2432_v32, %v3601_v1  ;;  %v1113_v6 = vsel %vm1112_vm3, %v3199_v16, %v3288_v31 }
 0x28b   : > { %5094 = vst [vmem:[#allocation128_spill] sm:$0xff] %v3613_v62  ;;  %1798 = vrot.lane.b32.xlu1 %v3151_v44, %s2652_s20  ;;  %v3629_v62 = vrot.slane %v2429_v21, %v3599_v13  ;;  %v3663_v21 = vrot.slane %v2430_v27, %v3601_v1  ;;  %v3677_v27 = vrot.slane %v2431_v40, %v3599_v13 }
 0x28c   : > { %v906_v3 = vmul.f32 %v3065_v52, %v858_v29  ;;  %v781_v52 = vadd.f32 %v3032_v20, %v717_v55  ;;  %v1121_v55 = vsel %vm1112_vm3, %v3288_v31, %v3199_v16  ;;  %v972_v16 = vsel %vm970_vm2, %v3233_v42, %v3267_v34 }
 0x28e   : > { %v3644_v44 = vpop.permute.xlu1 %1329 }
 0x28f   : > { %5096 = vst [vmem:[#allocation130_spill] sm:$0xff] %v3644_v44  ;;  %1814 = vrot.lane.b32.xlu1 %v3219_v14, %s2652_s20  ;;  %v779_v44 = vadd.f32 %v3012_v60, %v715_v10  ;;  %v1000_v14 = vmul.f32 %v3629_v62, %v979_v59  ;;  %v3685_v10 = vrot.slane %v2431_v40, %v3601_v1  ;;  %v3691_v60 = vpop.permute.xlu0 %1747 }
 0x290   : > { %5098 = vst [vmem:[#allocation132_spill] sm:$0xff] %v3691_v60  ;;  %v839_v59 = vsel %vm829_vm1, %v3262_v45, %v3226_v0  ;;  %v782_v40 = vadd.f32 %v3032_v20, %v718_v47  ;;  %v923_v0 = vadd.f32 %v907_v22, %v780_v39  ;;  %v1049_v60 = vmul.f32 %v3060_v48, %v1001_v53 }
 0x291   : > { %v1048_v29 = vmul.f32 %v3060_v48, %v1000_v14  ;;  %v922_v45 = vadd.f32 %v906_v3, %v779_v44  ;;  %v980_v14 = vsel %vm970_vm2, %v3267_v34, %v3233_v42  ;;  %v860_v31 = vmul.f32 %v3608_v57, %v839_v59 }
 0x292   : > { %v3681_v2 = vpop.permute.xlu1 %1388  ;;  %v861_v20 = vmul.f32 %v3611_v61, %v831_v41  ;;  %v1142_v44 = vmul.f32 %v3660_v12, %v1121_v55  ;;  %v1143_v3 = vmul.f32 %v3663_v21, %v1113_v6  ;;  %v1255_v48 = vsel %vm1254_vm4, %v3205_v36, %v3300_v28 }
 0x293   : > { %5097 = vst [vmem:[#allocation131_spill] sm:$0xff] %v3681_v2  ;;  %1520 = vrot.lane.b32.xlu1 %v3328_v18, %s2650_s18  ;;  %v1122_v22 = vsel %vm1112_vm3, %v3274_v30, %v3241_v19  ;;  %v1284_v47 = vmul.f32 %v3677_v27, %v1263_v11  ;;  %v1397_v34 = vsel %vm1396_vm5, %v3212_v38, %v3311_v56  ;;  %v3756_v28 = vpop.permute.xlu0 %1751 }
 0x294   : > { %v1002_v42 = vmul.f32 %v3629_v62, %v980_v14  ;;  %v1114_v39 = vsel %vm1112_vm3, %v3241_v19, %v3274_v30  ;;  %5099 = vst [vmem:[#allocation133_spill] sm:$0xff] %v3756_v28  ;;  %v1064_v36 = vadd.f32 %v1048_v29, %v922_v45  ;;  %v1065_v53 = vadd.f32 %v1049_v60, %v923_v0 }
 0x295   : > { %v1405_v41 = vsel %vm1396_vm5, %v3311_v56, %v3212_v38  ;;  %v1003_v59 = vmul.f32 %v3647_v7, %v972_v16  ;;  %v1285_v55 = vmul.f32 %v3685_v10, %v1255_v48  ;;  %v908_v11 = vmul.f32 %v3053_v33, %v860_v31 }
 0x296   : > { %v3725_v32 = vpop.permute.xlu1 %1512  ;;  %v909_v14 = vmul.f32 %v3053_v33, %v861_v20  ;;  %v1144_v19 = vmul.f32 %v3660_v12, %v1122_v22  ;;  %v1190_v30 = vmul.f32 %v3082_v26, %v1142_v44  ;;  %v1191_v60 = vmul.f32 %v3082_v26, %v1143_v3 }
 0x297   : > { %1536 = vrot.lane.b32.xlu1 %v3121_v49, %s2650_s18  ;;  %v1426_v38 = vmul.f32 %v3689_v5, %v1397_v34  ;;  %v1145_v56 = vmul.f32 %v3663_v21, %v1114_v39  ;;  %v1427_v29 = vmul.f32 %v3696_v24, %v1405_v41  ;;  %v1050_v45 = vmul.f32 %v3155_v9, %v1002_v42  ;;  %v3791_v42 = vpop.permute.xlu0 %1518  ;;  %s2416_s18 = sshll.u32 %s404_s15, 5 }
 0x298   : > { %v1256_v33 = vsel %vm1254_vm4, %v3247_v37, %v3281_v51  ;;  %v1264_v0 = vsel %vm1254_vm4, %v3281_v51, %v3247_v37  ;;  %v1332_v26 = vmul.f32 %v3108_v46, %v1284_v47  ;;  %v1207_v31 = vadd.f32 %v1191_v60, %v1065_v53  ;;  %5100 = vst [vmem:[#allocation134_spill] sm:$0xff] %v3791_v42  ;;  %s406_s16 = scalar_lea.vmem [#allocation2], %s2416_s18  ;;  %s2577_s18 = sshll.u32 %s2654_s29, 4  ;;  %s2578_s18 = int_to_ptr.vmem [resolvable:$false] %s2577_s18 }
 0x299   : > { %v1206_v20 = vadd.f32 %v1190_v30, %v1064_v36  ;;  %v1051_v16 = vmul.f32 %v3155_v9, %v1003_v59  ;;  %v1333_v3 = vmul.f32 %v3108_v46, %v1285_v55  ;;  %v924_v48 = vadd.f32 %v908_v11, %v781_v52  ;;  %v2433_v9 = vld [vmem:[%s4811_s5 + $0x6] ss:$8 sm:$0x3]  ;;  %s2350_s17 = sshll.u32 %s406_s16, 4  ;;  %s2579_s28 = scalar_lea.vmem %s2578_s18, 1024  ;;  %s4755_s17 = int_to_ptr.vmem [resolvable:$true] %s2350_s17 }
 0x29a   : > { %v3763_v6 = vpop.permute.xlu1 %1528  ;;  %v925_v22 = vadd.f32 %v909_v14, %v782_v40  ;;  %v1192_v34 = vmul.f32 %v3217_v17, %v1144_v19  ;;  %v1193_v51 = vmul.f32 %v3217_v17, %v1145_v56  ;;  %v1286_v37 = vmul.f32 %v3677_v27, %v1264_v0  ;;  %p2580_p0 = scmp.lt.s32.totalorder %s4755_s17, %s2578_s18 }
 0x29b   : > { %1676 = vrot.lane.b32.xlu1 %v3129_v58, %s2651_s19  ;;  %v1287_v47 = vmul.f32 %v3685_v10, %v1256_v33  ;;  %v1398_v46 = vsel %vm1396_vm5, %v3254_v54, %v3286_v8  ;;  %v1474_v52 = vmul.f32 %v3133_v4, %v1426_v38  ;;  %v1475_v40 = vmul.f32 %v3133_v4, %v1427_v29  ;;  %v5102_v33 = vld [vmem:[#allocation93_spill] sm:$0xff] }
 0x29c   : > { %v1066_v39 = vadd.f32 %v1050_v45, %v924_v48  ;;  %v1406_v17 = vsel %vm1396_vm5, %v3286_v8, %v3254_v54  ;;  %v1349_v36 = vadd.f32 %v1333_v3, %v1207_v31  ;;  %v1348_v53 = vadd.f32 %v1332_v26, %v1206_v20  ;;  %v2434_v8 = vld [vmem:[%s4811_s5 + $0x7] ss:$8 sm:$0x3]  ;;  %v3838_v45 = vpop.permute.xlu0 %1658  ;;  %v5103_v20 = vld [vmem:[#allocation120_spill] sm:$0xff] }
 0x29d   : > { %v1067_v41 = vadd.f32 %v1051_v16, %v925_v22  ;;  %v1428_v11 = vmul.f32 %v3689_v5, %v1398_v46  ;;  %v3816_v14 = vrot.slane %v2433_v9, %v3599_v13  ;;  %v3819_v4 = vrot.slane %v2433_v9, %v3601_v1  ;;  %5101 = vst [vmem:[#allocation135_spill] sm:$0xff] %v3838_v45  ;;  %v5104_v16 = vld [vmem:[#allocation119_spill] sm:$0xff]  ;;  %v5105_v48 = vld [vmem:[#allocation14_spill] sm:$0xff] }
 0x29e   : > { %v3787_v44 = vpop.permute.xlu1 %1652  ;;  %v1208_v55 = vadd.f32 %v1192_v34, %v1066_v39  ;;  %v1334_v19 = vmul.f32 %v3365_v35, %v1286_v37  ;;  %v1335_v30 = vmul.f32 %v3365_v35, %v1287_v47  ;;  %v1429_v60 = vmul.f32 %v3696_v24, %v1406_v17  ;;  %v5107_v37 = vld [vmem:[#allocation117_spill] sm:$0xff] }
 0x29f   : > { %1816 = vrot.lane.b32.xlu1 %v3139_v50, %s2652_s20  ;;  %v1209_v54 = vadd.f32 %v1193_v51, %v1067_v41  ;;  %v1476_v38 = vmul.f32 %v3414_v43, %v1428_v11  ;;  %v1540_v56 = vsel %vm1538_vm6, %v3484_v25, %v3492_v63  ;;  %v1548_v29 = vsel %vm1538_vm6, %v3492_v63, %v3484_v25  ;;  %v2435_v63 = vld [vmem:[%s4811_s5 + $0x10] ss:$8 sm:$0x3] }
 0x2a0   : > { %v1477_v35 = vmul.f32 %v3414_v43, %v1429_v60  ;;  %v1539_v0 = vsel %vm1538_vm6, %v5102_v33, %v3330_v15  ;;  %v1547_v26 = vsel %vm1538_vm6, %v3330_v15, %v5102_v33  ;;  %v3851_v31 = vrot.slane %v2434_v8, %v3599_v13  ;;  %v5106_v51 = vld [vmem:[#allocation84_spill] sm:$0xff]  ;;  %v5108_v60 = vld [vmem:[#allocation95_spill] sm:$0xff] }
 0x2a1   : > { %v3857_v43 = vrot.slane %v2434_v8, %v3601_v1  ;;  %v1682_v3 = vsel %vm1680_vm7, %v5104_v16, %v5103_v20  ;;  %v1690_v15 = vsel %vm1680_vm7, %v5103_v20, %v5104_v16  ;;  %v1570_v22 = vmul.f32 %v3816_v14, %v1540_v56  ;;  %v3896_v20 = vpop.permute.xlu0 %1755 }
 0x2a2   : > { %v3812_v59 = vpop.permute.xlu1 %1668  ;;  %v1571_v34 = vmul.f32 %v3819_v4, %v1548_v29  ;;  %v1681_v47 = vsel %vm1680_vm7, %v5107_v37, %v5106_v51  ;;  %v1689_v46 = vsel %vm1680_vm7, %v5106_v51, %v5107_v37  ;;  %v1568_v9 = vmul.f32 %v3816_v14, %v1539_v0  ;;  %5109 = vst [vmem:[#allocation93_spill] sm:$0xff] %v3896_v20 }
 0x2a3   : > { %1662 = vrot.lane.b32.xlu1 %v3328_v18, %s2651_s19  ;;  %v1569_v39 = vmul.f32 %v3819_v4, %v1547_v26  ;;  %v3883_v17 = vrot.slane %v2435_v63, %v3599_v13  ;;  %v3886_v41 = vrot.slane %v2435_v63, %v3601_v1  ;;  %v1712_v11 = vmul.f32 %v3851_v31, %v1682_v3  ;;  %v5111_v13 = vld [vmem:[#allocation34_spill] sm:$0xff] }
 0x2a4   : > { %v1713_v8 = vmul.f32 %v3857_v43, %v1690_v15  ;;  %v1490_v0 = vadd.f32 %v1474_v52, %v1348_v53  ;;  %v1491_v26 = vadd.f32 %v1475_v40, %v1349_v36  ;;  %v1710_v1 = vmul.f32 %v3851_v31, %v1681_v47  ;;  %v5110_v15 = vld [vmem:[#allocation103_spill] sm:$0xff] }
 0x2a5   : > { %v1711_v63 = vmul.f32 %v3857_v43, %v1689_v46  ;;  %v1350_v16 = vadd.f32 %v1334_v19, %v1208_v55  ;;  %v1351_v3 = vadd.f32 %v1335_v30, %v1209_v54  ;;  %v1618_v51 = vmul.f32 %v5110_v15, %v1570_v22  ;;  %v5112_v46 = vld [vmem:[#allocation123_spill] sm:$0xff] }
 0x2a6   : > { %v1791_v25 = vpop.permute.xlu1 %1790  ;;  %v1619_v37 = vmul.f32 %v5110_v15, %v1571_v34  ;;  %v1617_v52 = vmul.f32 %v5111_v13, %v1569_v39  ;;  %v1761_v20 = vmul.f32 %v5112_v46, %v1713_v8  ;;  %v5113_v54 = vld [vmem:[#allocation39_spill] sm:$0xff]  ;;  %v1874_v8 = vpop.permute.xlu0 %1873 }
 0x2a7   : > { %1802 = vrot.lane.b32.xlu1 %v5105_v48, %s2652_s20  ;;  %v1823_v56 = vsel %vm1822_vm8, %v1791_v25, %v5108_v60  ;;  %v1831_v29 = vsel %vm1822_vm8, %v5108_v60, %v1791_v25  ;;  %v1616_v25 = vmul.f32 %v5111_v13, %v1568_v9  ;;  %v1492_v53 = vadd.f32 %v1476_v38, %v1350_v16 }
 0x2a8   : > { %v1852_v40 = vmul.f32 %v3883_v17, %v1823_v56  ;;  %v1853_v36 = vmul.f32 %v3886_v41, %v1831_v29  ;;  %v1493_v47 = vadd.f32 %v1477_v35, %v1351_v3  ;;  %v1760_v60 = vmul.f32 %v5112_v46, %v1712_v11  ;;  %v5114_v56 = vld [vmem:[#allocation99_spill] sm:$0xff] }
 0x2a9   : > { %v1758_v19 = vmul.f32 %v5113_v54, %v1710_v1  ;;  %v1759_v30 = vmul.f32 %v5113_v54, %v1711_v63  ;;  %v1634_v34 = vadd.f32 %v1618_v51, %v1492_v53  ;;  %v1632_v39 = vadd.f32 %v1616_v25, %v1490_v0 }
 0x2aa   : > { %v1793_v33 = vpop.permute.xlu1 %1792  ;;  %v1635_v9 = vadd.f32 %v1619_v37, %v1493_v47  ;;  %v1633_v11 = vadd.f32 %v1617_v52, %v1491_v26  ;;  %v1900_v29 = vmul.f32 %v5114_v56, %v1852_v40  ;;  %v1901_v1 = vmul.f32 %v5114_v56, %v1853_v36  ;;  %v5116_v52 = vld [vmem:[#allocation9_spill] sm:$0xff]  ;;  %v5117_v36 = vld [vmem:[#allocation26_spill] sm:$0xff]  ;;  %v5120_v56 = vld [vmem:[#allocation31_spill] sm:$0xff] }
 0x2ab   : > { %1804 = vrot.lane.b32.xlu1 %v3328_v18, %s2652_s20  ;;  %v1776_v63 = vadd.f32 %v1760_v60, %v1634_v34  ;;  %v1774_v54 = vadd.f32 %v1758_v19, %v1632_v39  ;;  %v720_v60 = vmul.f32 %v5116_v52, %v5117_v36  ;;  %v5119_v39 = vld [vmem:[#allocation13_spill] sm:$0xff]  ;;  %s2573_s20 = scalar_lea.vmem %s4755_s17, 512 }
 0x2ac   : > { %v1777_v16 = vadd.f32 %v1761_v20, %v1635_v9  ;;  %v5115_v20 = vld [vmem:[#allocation21_spill] sm:$0xff]  ;;  %p2574_p11 = scmp.ne.s32.totalorder %s4755_s17, %s2573_s20  ;;  %p2581_p1 = scmp.lt.s32.totalorder %s2579_s28, %s2573_s20 }
 0x2ad   : > { %v1916_v53 = vadd.f32 %v1900_v29, %v1774_v54  ;;  %v719_v40 = vmul.f32 %v5116_v52, %v5115_v20  ;;  %v5121_v29 = vld [vmem:[#allocation6_spill] sm:$0xff]  ;;  %v5126_v20 = vld [vmem:[#allocation7_spill] sm:$0xff] }
 0x2ae   : > { %v1809_v55 = vpop.permute.xlu1 %1808  ;;  %p2575_p12 = pnand %p2574_p11, %p2759_p5  ;;  %p2582_p2 = por %p2581_p1, %p2580_p0 }
 0x2af   : > { %v1824_v22 = vsel %vm1822_vm8, %v1793_v33, %v1809_v55  ;;  %v1832_v13 = vsel %vm1822_vm8, %v1809_v55, %v1793_v33  ;;  %v1775_v33 = vadd.f32 %v1759_v30, %v1633_v11  ;;  %v783_v11 = vadd.f32 %v5119_v39, %v719_v40 }
 0x2b0   : > { %v1854_v38 = vmul.f32 %v3883_v17, %v1824_v22  ;;  %v1855_v35 = vmul.f32 %v3886_v41, %v1832_v13  ;;  %v1932_v13 = vadd.f32 3.0, %v1916_v53  ;;  %v726_v40 = vmul.f32 %v5126_v20, %v3139_v50  ;;  %v5134_v50 = vld [vmem:[#allocation15_spill] sm:$0xff]  ;;  %p2576_p13 = pneg %p2575_p12 }
 0x2b1   : > { %v1917_v47 = vadd.f32 %v1901_v1, %v1775_v33  ;;  %v721_v1 = vmul.f32 %v5121_v29, %v5120_v56 }
 0x2b2   : > { %v1902_v3 = vmul.f32 %v1874_v8, %v1854_v38  ;;  %v1903_v15 = vmul.f32 %v1874_v8, %v1855_v35  ;;  %v1095_v46 = vpop.permute.xlu1 %1094  ;;  %v784_v8 = vadd.f32 %v5119_v39, %v720_v60  ;;  %v1948_v54 = vmax.f32 %v1932_v13, 0.0  ;;  %v5131_v13 = vld [vmem:[#allocation10_spill] sm:$0xff]  ;;  %p2583_p3 = pnand %p2582_p2, %p2576_p13 }
 0x2b3   : > { %v1933_v34 = vadd.f32 3.0, %v1917_v47  ;;  %v3965_v39 = vadd.f32 %v5134_v50, %v721_v1 }
 0x2b4   : > { %v1918_v51 = vadd.f32 %v1902_v3, %v1776_v63  ;;  %v1919_v37 = vadd.f32 %v1903_v15, %v1777_v16  ;;  %v5122_v63 = vld [vmem:[#allocation48_spill] sm:$0xff]  ;;  %v5123_v16 = vld [vmem:[#allocation53_spill] sm:$0xff] }
 0x2b5   : > { %v840_v3 = vsel %vm829_vm1, %v5123_v16, %v5122_v63  ;;  %v1949_v33 = vmax.f32 %v1933_v34, 0.0  ;;  %v832_v36 = vsel %vm829_vm1, %v5122_v63, %v5123_v16  ;;  %v5135_v63 = vld [vmem:[#allocation43_spill] sm:$0xff] }
 0x2b6   : > { %v1934_v55 = vadd.f32 3.0, %v1918_v51  ;;  %v1935_v22 = vadd.f32 3.0, %v1919_v37  ;;  %v1111_v0 = vpop.permute.xlu1 %1110  ;;  %v862_v56 = vmul.f32 %v3608_v57, %v840_v3  ;;  %v724_v16 = vmul.f32 %v5131_v13, %v5135_v63  ;;  %v5138_v63 = vld [vmem:[#allocation50_spill] sm:$0xff] }
 0x2b7   : > { %v3922_v26 = vsel %vm1112_vm3, %v1095_v46, %v1111_v0  ;;  %v3926_v25 = vsel %vm1112_vm3, %v1111_v0, %v1095_v46  ;;  %v5125_v0 = vld [vmem:[#allocation12_spill] sm:$0xff] }
 0x2b8   : > { %v1950_v19 = vmax.f32 %v1934_v55, 0.0  ;;  %v1951_v30 = vmax.f32 %v1935_v22, 0.0  ;;  %v5124_v55 = vld [vmem:[#allocation38_spill] sm:$0xff]  ;;  %v725_v52 = vmul.f32 %v5126_v20, %v5125_v0  ;;  %v1965_v0 = vmin.f32 %v1949_v33, 6.0  ;;  %v5136_v20 = vld [vmem:[#allocation16_spill] sm:$0xff] }
 0x2b9   : > { %v722_v22 = vmul.f32 %v5121_v29, %v5124_v55  ;;  %v863_v55 = vmul.f32 %v3611_v61, %v832_v36  ;;  %v5137_v36 = vld [vmem:[#allocation55_spill] sm:$0xff] }
 0x2ba   : > { %v3932_v9 = vpop.permute.xlu1 %1250  ;;  %v1966_v38 = vmin.f32 %v1950_v19, 6.0  ;;  %v1967_v35 = vmin.f32 %v1951_v30, 6.0  ;;  %v5130_v30 = vld [vmem:[#allocation33_spill] sm:$0xff]  ;;  %v3981_v3 = vadd.f32 %v5136_v20, %v725_v52  ;;  %v1123_v33 = vsel %vm1112_vm3, %v5137_v36, %v5138_v63 }
 0x2bb   : > { %5118 = vst [vmem:[#allocation120_spill] sm:$0xff] %v3932_v9  ;;  %v723_v34 = vmul.f32 %v5131_v13, %v5130_v30  ;;  %v3978_v1 = vadd.f32 %v5134_v50, %v722_v22  ;;  %v3984_v30 = vadd.f32 %v5136_v20, %v726_v40  ;;  %v5139_v22 = vld [vmem:[#allocation18_spill] sm:$0xff]  ;;  %v5142_v20 = vld [vmem:[#allocation57_spill] sm:$0xff]  ;;  %v1146_v45 = vmul.f32 %v3660_v12, %v1123_v33 }
 0x2bc   : > { %v1982_v15 = vmul.f32 %v1966_v38, %v1918_v51  ;;  %v1983_v46 = vmul.f32 %v1967_v35, %v1919_v37  ;;  %v5128_v51 = vld [vmem:[#allocation49_spill] sm:$0xff]  ;;  %v5129_v37 = vld [vmem:[#allocation54_spill] sm:$0xff] }
 0x2bd   : > { %v981_v19 = vsel %vm970_vm2, %v5129_v37, %v5128_v51  ;;  %v973_v29 = vsel %vm970_vm2, %v5128_v51, %v5129_v37  ;;  %v3997_v52 = vadd.f32 %v5139_v22, %v723_v34  ;;  %v5140_v40 = vld [vmem:[#allocation22_spill] sm:$0xff]  ;;  %v5150_v33 = vld [vmem:[#allocation89_spill] sm:$0xff] }
 0x2be   : > { %v3952_v60 = vpop.permute.xlu1 %1390  ;;  %v3960_v38 = vmul.f32 0.16666667, %v1982_v15  ;;  %v3962_v35 = vmul.f32 0.16666667, %v1983_v46  ;;  %v1964_v46 = vmin.f32 %v1948_v54, 6.0  ;;  %v1004_v51 = vmul.f32 %v3629_v62, %v981_v19  ;;  %v5141_v19 = vld [vmem:[#allocation51_spill] sm:$0xff] }
 0x2bf   : > { %5127 = vst [vmem:[#allocation119_spill] sm:$0xff] %v3952_v60  ;;  %v1005_v13 = vmul.f32 %v3647_v7, %v973_v29  ;;  %v1115_v54 = vsel %vm1112_vm3, %v5138_v63, %v5137_v36  ;;  %v910_v50 = vmul.f32 %v5140_v40, %v862_v56  ;;  %v1265_v29 = vsel %vm1254_vm4, %v5142_v20, %v5141_v19  ;;  %v5144_v36 = vld [vmem:[#allocation20_spill] sm:$0xff] }
 0x2c0   : > { %5132 = vst [vmem:[#allocation14_spill] sm:$0xff] %v3960_v38  ;;  %5133 = vst [vmem:[#allocation84_spill] sm:$0xff] %v3962_v35  ;;  %v2015_v15 = vadd.f32 %v3962_v35, %v3960_v38  ;;  %v4005_v35 = vadd.f32 %v5139_v22, %v724_v16  ;;  %v5143_v38 = vld [vmem:[#allocation11_spill] sm:$0xff]  ;;  %v911_v42 = vmul.f32 %v5140_v40, %v863_v55 }
 0x2c1   : > { %v727_v28 = vmul.f32 %v5143_v38, %v5105_v48  ;;  %v1257_v34 = vsel %vm1254_vm4, %v5141_v19, %v5142_v20  ;;  %v1981_v56 = vmul.f32 %v1965_v0, %v1917_v47  ;;  %v1052_v63 = vmul.f32 %v5144_v36, %v1004_v51  ;;  %v5147_v47 = vld [vmem:[#allocation8_spill] sm:$0xff] }
 0x2c2   : > { %v1515_v37 = vpop.permute.xlu1 %1514  ;;  %2016 = vadd.xlane.f32.xlu0 %v2015_v15  ;;  %v1980_v15 = vmul.f32 %v1964_v46, %v1916_v53  ;;  %v1147_v60 = vmul.f32 %v3663_v21, %v1115_v54  ;;  %v728_v16 = vmul.f32 %v5143_v38, %v3129_v58  ;;  %v1053_v48 = vmul.f32 %v5144_v36, %v1005_v13  ;;  %v5148_v58 = vld [vmem:[#allocation19_spill] sm:$0xff] }
 0x2c3   : > { %v1288_v55 = vmul.f32 %v3677_v27, %v1265_v29  ;;  %v729_v46 = vmul.f32 %v5147_v47, %v3328_v18  ;;  %v926_v0 = vadd.f32 %v910_v50, %v783_v11  ;;  %v1289_v51 = vmul.f32 %v3685_v10, %v1257_v34  ;;  %v5149_v54 = vld [vmem:[#allocation91_spill] sm:$0xff]  ;;  %v5153_v18 = vld [vmem:[#allocation24_spill] sm:$0xff] }
 0x2c4   : > { %v4033_v38 = vadd.f32 %v5148_v58, %v727_v28  ;;  %v927_v13 = vadd.f32 %v911_v42, %v784_v8  ;;  %v1399_v19 = vsel %vm1396_vm5, %v5150_v33, %v5149_v54  ;;  %v4039_v20 = vmul.f32 0.16666667, %v1980_v15  ;;  %v5154_v15 = vld [vmem:[#allocation28_spill] sm:$0xff] }
 0x2c5   : > { %v4041_v29 = vmul.f32 0.16666667, %v1981_v56  ;;  %v1194_v11 = vmul.f32 %v5153_v18, %v1146_v45  ;;  %v1195_v50 = vmul.f32 %v5153_v18, %v1147_v60  ;;  %v1407_v28 = vsel %vm1396_vm5, %v5149_v54, %v5150_v33  ;;  %v5157_v45 = vld [vmem:[#allocation58_spill] sm:$0xff] }
 0x2c6   : > { %v1531_v22 = vpop.permute.xlu1 %1530  ;;  %5151 = vst [vmem:[#allocation103_spill] sm:$0xff] %v4039_v20  ;;  %v1068_v8 = vadd.f32 %v1052_v63, %v926_v0  ;;  %v1069_v34 = vadd.f32 %v1053_v48, %v927_v13  ;;  %v1336_v36 = vmul.f32 %v5154_v15, %v1288_v55  ;;  %v4055_v56 = vadd.f32 %v5148_v58, %v728_v16  ;;  %v5158_v55 = vld [vmem:[#allocation115_spill] sm:$0xff]  ;;  %v5159_v0 = vld [vmem:[#allocation114_spill] sm:$0xff]  ;;  %v5160_v13 = vld [vmem:[#allocation17_spill] sm:$0xff] }
 0x2c7   : > { %v4023_v40 = vsel %vm1538_vm6, %v1515_v37, %v1531_v22  ;;  %v4027_v53 = vsel %vm1538_vm6, %v1531_v22, %v1515_v37  ;;  %5152 = vst [vmem:[#allocation34_spill] sm:$0xff] %v4041_v29  ;;  %v730_v37 = vmul.f32 %v5147_v47, %v3121_v49  ;;  %v1337_v49 = vmul.f32 %v5154_v15, %v1289_v51  ;;  %v5156_v22 = vld [vmem:[#allocation64_spill] sm:$0xff] }
 0x2c8   : > { %5145 = vst [vmem:[#allocation117_spill] sm:$0xff] %v4023_v40  ;;  %5146 = vst [vmem:[#allocation95_spill] sm:$0xff] %v4027_v53  ;;  %v833_v60 = vsel %vm829_vm1, %v5157_v45, %v5156_v22  ;;  %v841_v47 = vsel %vm829_vm1, %v5156_v22, %v5157_v45  ;;  %v1430_v63 = vmul.f32 %v3689_v5, %v1399_v19  ;;  %v5172_v53 = vld [vmem:[#allocation97_spill] sm:$0xff] }
 0x2c9   : > { %5155 = vst [vmem:[#allocation123_spill] sm:$0xff] %v4055_v56  ;;  %v1431_v48 = vmul.f32 %v3696_v24, %v1407_v28  ;;  %v1541_v16 = vsel %vm1538_vm6, %v5159_v0, %v5158_v55  ;;  %v1549_v51 = vsel %vm1538_vm6, %v5158_v55, %v5159_v0  ;;  %v2012_v58 = vadd.f32 %v4041_v29, %v4039_v20  ;;  %v5163_v0 = vld [vmem:[#allocation32_spill] sm:$0xff] }
 0x2ca   : > { %v4051_v42 = vpop.permute.xlu1 %1654  ;;  %v4079_v54 = vadd.f32 %v5160_v13, %v729_v46  ;;  %v4082_v33 = vadd.f32 %v5160_v13, %v730_v37  ;;  %v1210_v19 = vadd.f32 %v1194_v11, %v1068_v8  ;;  %v1211_v18 = vadd.f32 %v1195_v50, %v1069_v34  ;;  %v5161_v37 = vld [vmem:[#allocation66_spill] sm:$0xff]  ;;  %v5162_v11 = vld [vmem:[#allocation60_spill] sm:$0xff] }
 0x2cb   : > { %v864_v15 = vmul.f32 %v3608_v57, %v841_v47  ;;  %v865_v22 = vmul.f32 %v3611_v61, %v833_v60  ;;  %v1683_v45 = vsel %vm1680_vm7, %v3787_v44, %v3812_v59  ;;  %v1691_v46 = vsel %vm1680_vm7, %v3812_v59, %v3787_v44  ;;  %v5164_v59 = vld [vmem:[#allocation102_spill] sm:$0xff] }
 0x2cc   : > { %v974_v50 = vsel %vm970_vm2, %v5162_v11, %v5161_v37  ;;  %v982_v8 = vsel %vm970_vm2, %v5161_v37, %v5162_v11  ;;  %v1572_v34 = vmul.f32 %v3816_v14, %v1541_v16  ;;  %v1573_v60 = vmul.f32 %v3819_v4, %v1549_v51  ;;  %v5167_v11 = vld [vmem:[#allocation36_spill] sm:$0xff] }
 0x2cd   : > { %v1352_v47 = vadd.f32 %v1336_v36, %v1210_v19  ;;  %v1353_v55 = vadd.f32 %v1337_v49, %v1211_v18  ;;  %v1478_v13 = vmul.f32 %v5163_v0, %v1430_v63  ;;  %v1479_v44 = vmul.f32 %v5163_v0, %v1431_v48  ;;  %v5166_v49 = vld [vmem:[#allocation23_spill] sm:$0xff] }
 0x2ce   : > { %v4084_v28 = vpop.permute.xlu1 %1670  ;;  %v1714_v16 = vmul.f32 %v3851_v31, %v1683_v45  ;;  %v1715_v51 = vmul.f32 %v3857_v43, %v1691_v46  ;;  %v4119_v19 = vmul.f32 %v5166_v49, %v864_v15  ;;  %v4122_v63 = vmul.f32 %v5166_v49, %v865_v22  ;;  %v5168_v45 = vld [vmem:[#allocation86_spill] sm:$0xff]  ;;  %v5170_v22 = vld [vmem:[#allocation68_spill] sm:$0xff] }
 0x2cf   : > { %2013 = vadd.xlane.f32.xlu1 %v2012_v58  ;;  %v5165_v58 = vld [vmem:[#allocation100_spill] sm:$0xff]  ;;  %v4125_v48 = vmul.f32 %v3629_v62, %v982_v8  ;;  %v4128_v18 = vmul.f32 %v3647_v7, %v974_v50  ;;  %v1620_v0 = vmul.f32 %v5167_v11, %v1572_v34  ;;  %v5171_v8 = vld [vmem:[#allocation62_spill] sm:$0xff]  ;;  %v1495_v20 = vadd.f32 %v1479_v44, %v1353_v55 }
 0x2d0   : > { %v837_v29 = vsel %vm829_vm1, %v5165_v58, %v5164_v59  ;;  %v845_v37 = vsel %vm829_vm1, %v5164_v59, %v5165_v58  ;;  %v1621_v59 = vmul.f32 %v5167_v11, %v1573_v60  ;;  %v5169_v58 = vld [vmem:[#allocation124_spill] sm:$0xff]  ;;  %v1116_v50 = vsel %vm1112_vm3, %v5171_v8, %v5170_v22  ;;  %v5173_v55 = vld [vmem:[#allocation30_spill] sm:$0xff] }
 0x2d1   : > { %v978_v46 = vsel %vm970_vm2, %v5169_v58, %v5168_v45  ;;  %v986_v15 = vsel %vm970_vm2, %v5168_v45, %v5169_v58  ;;  %v1124_v34 = vsel %vm1112_vm3, %v5170_v22, %v5171_v8  ;;  %v872_v60 = vmul.f32 %v3608_v57, %v845_v37 }
 0x2d2   : > { %v1795_v36 = vpop.permute.xlu1 %1794  ;;  %v873_v49 = vmul.f32 %v3611_v61, %v837_v29  ;;  %v1494_v11 = vadd.f32 %v1478_v13, %v1352_v47  ;;  %v1762_v40 = vmul.f32 %v5172_v53, %v1714_v16  ;;  %v1763_v45 = vmul.f32 %v5172_v53, %v1715_v51 }
 0x2d3   : > { %v1014_v9 = vmul.f32 %v3629_v62, %v986_v15  ;;  %v1015_v2 = vmul.f32 %v3647_v7, %v978_v46  ;;  %v1637_v8 = vadd.f32 %v1621_v59, %v1495_v20  ;;  %v920_v13 = vmul.f32 %v5173_v55, %v872_v60  ;;  %v5174_v15 = vld [vmem:[#allocation122_spill] sm:$0xff]  ;;  %v5176_v59 = vld [vmem:[#allocation69_spill] sm:$0xff] }
 0x2d4   : > { %v1636_v37 = vadd.f32 %v1620_v0, %v1494_v11  ;;  %v921_v53 = vmul.f32 %v5173_v55, %v873_v49  ;;  %v1156_v44 = vmul.f32 %v3660_v12, %v3926_v25  ;;  %v1157_v16 = vmul.f32 %v3663_v21, %v3922_v26  ;;  %v5177_v49 = vld [vmem:[#allocation42_spill] sm:$0xff] }
 0x2d5   : > { %v1779_v46 = vadd.f32 %v1763_v45, %v1637_v8  ;;  %v1062_v11 = vmul.f32 %v5177_v49, %v1014_v9  ;;  %v1063_v26 = vmul.f32 %v5177_v49, %v1015_v2  ;;  %v1149_v45 = vmul.f32 %v3663_v21, %v1116_v50 }
 0x2d6   : > { %v1811_v58 = vpop.permute.xlu1 %1810  ;;  %v1778_v51 = vadd.f32 %v1762_v40, %v1636_v37  ;;  %v1148_v40 = vmul.f32 %v3660_v12, %v1124_v34  ;;  %v936_v37 = vadd.f32 %v920_v13, %v4079_v54  ;;  %v937_v8 = vadd.f32 %v921_v53, %v4082_v33 }
 0x2d7   : > { %v1825_v56 = vsel %vm1822_vm8, %v1795_v36, %v1811_v58  ;;  %v1833_v22 = vsel %vm1822_vm8, %v1811_v58, %v1795_v36 }
 0x2d8   : > { %v1856_v29 = vmul.f32 %v3883_v17, %v1825_v56  ;;  %v1857_v47 = vmul.f32 %v3886_v41, %v1833_v22  ;;  %v5175_v56 = vld [vmem:[#allocation74_spill] sm:$0xff]  ;;  %v1078_v34 = vadd.f32 %v1062_v11, %v936_v37  ;;  %v1079_v49 = vadd.f32 %v1063_v26, %v937_v8 }
 0x2d9   : > { %v834_v60 = vsel %vm829_vm1, %v5176_v59, %v5175_v56  ;;  %v842_v25 = vsel %vm829_vm1, %v5175_v56, %v5176_v59 }
 0x2da   : > { %v1904_v36 = vmul.f32 %v5174_v15, %v1856_v29  ;;  %v1905_v20 = vmul.f32 %v5174_v15, %v1857_v47  ;;  %v1237_v0 = vpop.permute.xlu1 %1236  ;;  %v5178_v29 = vld [vmem:[#allocation61_spill] sm:$0xff]  ;;  %v866_v15 = vmul.f32 %v3608_v57, %v842_v25  ;;  %v867_v9 = vmul.f32 %v3611_v61, %v834_v60  ;;  %v5181_v25 = vld [vmem:[#allocation130_spill] sm:$0xff] }
 0x2db   : > { %v1204_v47 = vmul.f32 %v5178_v29, %v1156_v44  ;;  %v1205_v55 = vmul.f32 %v5178_v29, %v1157_v16  ;;  %v5179_v16 = vld [vmem:[#allocation75_spill] sm:$0xff]  ;;  %v928_v29 = vadd.f32 %v4119_v19, %v3965_v39  ;;  %v5184_v39 = vld [vmem:[#allocation73_spill] sm:$0xff] }
 0x2dc   : > { %v1920_v58 = vadd.f32 %v1904_v36, %v1778_v51  ;;  %v1921_v22 = vadd.f32 %v1905_v20, %v1779_v46  ;;  %v5180_v51 = vld [vmem:[#allocation71_spill] sm:$0xff]  ;;  %v5185_v19 = vld [vmem:[#allocation77_spill] sm:$0xff] }
 0x2dd   : > { %v975_v46 = vsel %vm970_vm2, %v5180_v51, %v5179_v16  ;;  %v983_v36 = vsel %vm970_vm2, %v5179_v16, %v5180_v51  ;;  %v1220_v20 = vadd.f32 %v1204_v47, %v1078_v34  ;;  %v1221_v60 = vadd.f32 %v1205_v55, %v1079_v49 }
 0x2de   : > { %v1936_v56 = vadd.f32 3.0, %v1920_v58  ;;  %v1937_v2 = vadd.f32 3.0, %v1921_v22  ;;  %v1253_v59 = vpop.permute.xlu1 %1252  ;;  %v1008_v55 = vmul.f32 %v3629_v62, %v983_v36  ;;  %v1009_v34 = vmul.f32 %v3647_v7, %v975_v46 }
 0x2df   : > { %v1262_v50 = vsel %vm1254_vm4, %v1237_v0, %v1253_v59  ;;  %v1270_v54 = vsel %vm1254_vm4, %v1253_v59, %v1237_v0  ;;  %v1117_v16 = vsel %vm1112_vm3, %v5184_v39, %v5185_v19 }
 0x2e0   : > { %v1298_v33 = vmul.f32 %v3677_v27, %v1270_v54  ;;  %v1299_v13 = vmul.f32 %v3685_v10, %v1262_v50  ;;  %v1952_v53 = vmax.f32 %v1936_v56, 0.0  ;;  %v1953_v44 = vmax.f32 %v1937_v2, 0.0  ;;  %v5182_v2 = vld [vmem:[#allocation35_spill] sm:$0xff]  ;;  %v5183_v54 = vld [vmem:[#allocation44_spill] sm:$0xff] }
 0x2e1   : > { %v929_v56 = vadd.f32 %v4122_v63, %v3978_v1  ;;  %v1054_v59 = vmul.f32 %v5182_v2, %v4125_v48  ;;  %v1055_v47 = vmul.f32 %v5182_v2, %v4128_v18  ;;  %v1125_v1 = vsel %vm1112_vm3, %v5185_v19, %v5184_v39  ;;  %v5186_v18 = vld [vmem:[#allocation25_spill] sm:$0xff]  ;;  %v5192_v19 = vld [vmem:[#allocation112_spill] sm:$0xff] }
 0x2e2   : > { %v1346_v0 = vmul.f32 %v5181_v25, %v1298_v33  ;;  %v1347_v11 = vmul.f32 %v5181_v25, %v1299_v13  ;;  %v4202_v26 = vpop.permute.xlu1 %1392  ;;  %v1968_v37 = vmin.f32 %v1952_v53, 6.0  ;;  %v1969_v8 = vmin.f32 %v1953_v44, 6.0 }
 0x2e3   : > { %v1196_v33 = vmul.f32 %v5183_v54, %v1148_v40  ;;  %v1197_v13 = vmul.f32 %v5183_v54, %v1149_v45  ;;  %v914_v53 = vmul.f32 %v5186_v18, %v866_v15  ;;  %v915_v44 = vmul.f32 %v5186_v18, %v867_v9  ;;  %v5188_v9 = vld [vmem:[#allocation78_spill] sm:$0xff]  ;;  %v5194_v18 = vld [vmem:[#allocation45_spill] sm:$0xff] }
 0x2e4   : > { %v4214_v49 = vadd.f32 %v1346_v0, %v1220_v20  ;;  %v4216_v50 = vadd.f32 %v1347_v11, %v1221_v60  ;;  %v1984_v63 = vmul.f32 %v1968_v37, %v1920_v58  ;;  %v1985_v48 = vmul.f32 %v1969_v8, %v1921_v22  ;;  %v5187_v58 = vld [vmem:[#allocation37_spill] sm:$0xff]  ;;  %v5189_v60 = vld [vmem:[#allocation80_spill] sm:$0xff]  ;;  %v5190_v11 = vld [vmem:[#allocation87_spill] sm:$0xff] }
 0x2e5   : > { %v1070_v40 = vadd.f32 %v1054_v59, %v928_v29  ;;  %v1071_v46 = vadd.f32 %v1055_v47, %v929_v56  ;;  %v1056_v22 = vmul.f32 %v5187_v58, %v1008_v55  ;;  %v1057_v45 = vmul.f32 %v5187_v58, %v1009_v34  ;;  %v5191_v37 = vld [vmem:[#allocation63_spill] sm:$0xff]  ;;  %v5195_v58 = vld [vmem:[#allocation52_spill] sm:$0xff] }
 0x2e6   : > { %v4230_v51 = vpop.permute.xlu1 %1532  ;;  %v4232_v36 = vmul.f32 0.16666667, %v1984_v63  ;;  %v4234_v20 = vmul.f32 0.16666667, %v1985_v48  ;;  %v1150_v15 = vmul.f32 %v3660_v12, %v1125_v1  ;;  %v843_v25 = vsel %vm829_vm1, %v5189_v60, %v5188_v9  ;;  %v5193_v1 = vld [vmem:[#allocation110_spill] sm:$0xff] }
 0x2e7   : > { %v1151_v0 = vmul.f32 %v3663_v21, %v1117_v16  ;;  %v1258_v8 = vsel %vm1254_vm4, %v5191_v37, %v5190_v11  ;;  %v1266_v29 = vsel %vm1254_vm4, %v5190_v11, %v5191_v37  ;;  %v1212_v2 = vadd.f32 %v1196_v33, %v1070_v40  ;;  %v5198_v37 = vld [vmem:[#allocation65_spill] sm:$0xff] }
 0x2e8   : > { %v2018_v56 = vadd.f32 %v4234_v20, %v4232_v36  ;;  %v1213_v59 = vadd.f32 %v1197_v13, %v1071_v46  ;;  %v930_v47 = vadd.f32 %v914_v53, %v3997_v52  ;;  %v931_v55 = vadd.f32 %v915_v44, %v4005_v35 }
 0x2e9   : > { %v835_v54 = vsel %vm829_vm1, %v5188_v9, %v5189_v60  ;;  %v868_v39 = vmul.f32 %v3608_v57, %v843_v25  ;;  %v1400_v63 = vsel %vm1396_vm5, %v5193_v1, %v5192_v19  ;;  %v1408_v52 = vsel %vm1396_vm5, %v5192_v19, %v5193_v1  ;;  %v5197_v25 = vld [vmem:[#allocation27_spill] sm:$0xff]  ;;  %v5200_v1 = vld [vmem:[#allocation85_spill] sm:$0xff] }
 0x2ea   : > { %v4256_v34 = vpop.permute.xlu1 %1656  ;;  %2019 = vadd.xlane.f32.xlu0 %v2018_v56  ;;  %v1072_v35 = vadd.f32 %v1056_v22, %v930_v47  ;;  %v1073_v33 = vadd.f32 %v1057_v45, %v931_v55  ;;  %v1290_v48 = vmul.f32 %v3677_v27, %v1266_v29  ;;  %v1291_v13 = vmul.f32 %v3685_v10, %v1258_v8  ;;  %v5196_v22 = vld [vmem:[#allocation82_spill] sm:$0xff]  ;;  %v5199_v19 = vld [vmem:[#allocation83_spill] sm:$0xff] }
 0x2eb   : > { %v1198_v53 = vmul.f32 %v5194_v18, %v1150_v15  ;;  %v1199_v44 = vmul.f32 %v5194_v18, %v1151_v0  ;;  %v1542_v16 = vsel %vm1538_vm6, %v3725_v32, %v3763_v6  ;;  %v1550_v40 = vsel %vm1538_vm6, %v3763_v6, %v3725_v32 }
 0x2ec   : > { %v869_v46 = vmul.f32 %v3611_v61, %v835_v54  ;;  %v984_v45 = vsel %vm970_vm2, %v5196_v22, %v5195_v58  ;;  %v1432_v15 = vmul.f32 %v3689_v5, %v1400_v63  ;;  %v1433_v9 = vmul.f32 %v3696_v24, %v1408_v52 }
 0x2ed   : > { %v916_v0 = vmul.f32 %v5197_v25, %v868_v39  ;;  %v976_v32 = vsel %vm970_vm2, %v5195_v58, %v5196_v22  ;;  %v1684_v6 = vsel %vm1680_vm7, %v4051_v42, %v4084_v28  ;;  %v1692_v11 = vsel %vm1680_vm7, %v4084_v28, %v4051_v42  ;;  %v5201_v42 = vld [vmem:[#allocation76_spill] sm:$0xff]  ;;  %v1882_v58 = vpop.permute.xlu0 %1881  ;;  %v5202_v22 = vld [vmem:[#allocation106_spill] sm:$0xff] }
 0x2ee   : > { %v4290_v60 = vpop.permute.xlu1 %1672  ;;  %v1338_v8 = vmul.f32 %v5198_v37, %v1290_v48  ;;  %v1339_v29 = vmul.f32 %v5198_v37, %v1291_v13  ;;  %v1574_v56 = vmul.f32 %v3816_v14, %v1542_v16  ;;  %v1575_v47 = vmul.f32 %v3819_v4, %v1550_v40 }
 0x2ef   : > { %v4309_v55 = vadd.f32 %v1198_v53, %v1072_v35  ;;  %v4311_v54 = vadd.f32 %v1199_v44, %v1073_v33  ;;  %v1010_v39 = vmul.f32 %v3629_v62, %v984_v45  ;;  %v844_v63 = vsel %vm829_vm1, %v5200_v1, %v5199_v19 }
 0x2f0   : > { %v1480_v28 = vmul.f32 %v5201_v42, %v1432_v15  ;;  %v1481_v52 = vmul.f32 %v5201_v42, %v1433_v9  ;;  %v1716_v48 = vmul.f32 %v3851_v31, %v1684_v6  ;;  %v1717_v13 = vmul.f32 %v3857_v43, %v1692_v11  ;;  %v5203_v9 = vld [vmem:[#allocation40_spill] sm:$0xff]  ;;  %v5206_v11 = vld [vmem:[#allocation126_spill] sm:$0xff] }
 0x2f1   : > { %v917_v35 = vmul.f32 %v5197_v25, %v869_v46  ;;  %v932_v33 = vadd.f32 %v916_v0, %v3981_v3  ;;  %v1011_v53 = vmul.f32 %v3647_v7, %v976_v32  ;;  %v836_v44 = vsel %vm829_vm1, %v5199_v19, %v5200_v1  ;;  %v5204_v25 = vld [vmem:[#allocation104_spill] sm:$0xff] }
 0x2f2   : > { %v1797_v18 = vpop.permute.xlu1 %1796  ;;  %v1354_v16 = vadd.f32 %v1338_v8, %v1212_v2  ;;  %v1355_v40 = vadd.f32 %v1339_v29, %v1213_v59  ;;  %v1622_v45 = vmul.f32 %v5202_v22, %v1574_v56  ;;  %v1623_v15 = vmul.f32 %v5202_v22, %v1575_v47  ;;  %v5205_v3 = vld [vmem:[#allocation56_spill] sm:$0xff]  ;;  %v5208_v47 = vld [vmem:[#allocation105_spill] sm:$0xff] }
 0x2f3   : > { %v1058_v6 = vmul.f32 %v5203_v9, %v1010_v39  ;;  %v870_v46 = vmul.f32 %v3608_v57, %v844_v63  ;;  %v977_v0 = vsel %vm970_vm2, %v5205_v3, %v5204_v25  ;;  %v985_v2 = vsel %vm970_vm2, %v5204_v25, %v5205_v3  ;;  %v5207_v57 = vld [vmem:[#allocation59_spill] sm:$0xff] }
 0x2f4   : > { %v1496_v59 = vadd.f32 %v1480_v28, %v1354_v16  ;;  %v1497_v32 = vadd.f32 %v1481_v52, %v1355_v40  ;;  %v1764_v37 = vmul.f32 %v5206_v11, %v1716_v48  ;;  %v1765_v8 = vmul.f32 %v5206_v11, %v1717_v13  ;;  %v4358_v40 = vpop.permute.xlu0 %1885 }
 0x2f5   : > { %v871_v56 = vmul.f32 %v3611_v61, %v836_v44  ;;  %v1126_v39 = vsel %vm1112_vm3, %v5208_v47, %v5207_v57  ;;  %v1059_v48 = vmul.f32 %v5203_v9, %v1011_v53  ;;  %v5209_v61 = vld [vmem:[#allocation29_spill] sm:$0xff]  ;;  %v1012_v44 = vmul.f32 %v3629_v62, %v985_v2  ;;  %v5210_v62 = vld [vmem:[#allocation107_spill] sm:$0xff] }
 0x2f6   : > { %v1813_v29 = vpop.permute.xlu1 %1812  ;;  %v1638_v63 = vadd.f32 %v1622_v45, %v1496_v59  ;;  %v1639_v42 = vadd.f32 %v1623_v15, %v1497_v32  ;;  %v918_v13 = vmul.f32 %v5209_v61, %v870_v46  ;;  %v1013_v16 = vmul.f32 %v3647_v7, %v977_v0  ;;  %v5211_v9 = vld [vmem:[#allocation109_spill] sm:$0xff] }
 0x2f7   : > { %v1826_v19 = vsel %vm1822_vm8, %v1797_v18, %v1813_v29  ;;  %v1834_v1 = vsel %vm1822_vm8, %v1813_v29, %v1797_v18  ;;  %v933_v15 = vadd.f32 %v917_v35, %v3984_v30  ;;  %v1074_v59 = vadd.f32 %v1058_v6, %v932_v33  ;;  %v5212_v35 = vld [vmem:[#allocation41_spill] sm:$0xff] }
 0x2f8   : > { %v1858_v28 = vmul.f32 %v3883_v17, %v1826_v19  ;;  %v1859_v52 = vmul.f32 %v3886_v41, %v1834_v1  ;;  %v1780_v22 = vadd.f32 %v1764_v37, %v1638_v63  ;;  %v1781_v25 = vadd.f32 %v1765_v8, %v1639_v42  ;;  %v5213_v37 = vld [vmem:[#allocation125_spill] sm:$0xff]  ;;  %v5214_v8 = vld [vmem:[#allocation88_spill] sm:$0xff]  ;;  %v5216_v42 = vld [vmem:[#allocation123_spill] sm:$0xff] }
 0x2f9   : > { %v919_v32 = vmul.f32 %v5209_v61, %v871_v56  ;;  %v1152_v53 = vmul.f32 %v3660_v12, %v1126_v39  ;;  %v1118_v7 = vsel %vm1112_vm3, %v5207_v57, %v5208_v47  ;;  %v1267_v46 = vsel %vm1254_vm4, %v5211_v9, %v5210_v62  ;;  %v5215_v39 = vld [vmem:[#allocation46_spill] sm:$0xff] }
 0x2fa   : > { %v1906_v3 = vmul.f32 %v1882_v58, %v1858_v28  ;;  %v1907_v18 = vmul.f32 %v1882_v58, %v1859_v52  ;;  %v4360_v45 = vpop.permute.xlu1 %1378  ;;  %v1075_v2 = vadd.f32 %v1059_v48, %v933_v15  ;;  %v934_v30 = vadd.f32 %v918_v13, %v4033_v38  ;;  %v4394_v52 = vpop.permute.xlu0 %1889 }
 0x2fb   : > { %v1060_v33 = vmul.f32 %v5212_v35, %v1012_v44  ;;  %v1259_v6 = vsel %vm1254_vm4, %v5210_v62, %v5211_v9  ;;  %v1061_v11 = vmul.f32 %v5212_v35, %v1013_v16  ;;  %v1127_v29 = vsel %vm1112_vm3, %v5214_v8, %v5213_v37  ;;  %v5217_v16 = vld [vmem:[#allocation128_spill] sm:$0xff] }
 0x2fc   : > { %v1922_v58 = vadd.f32 %v1906_v3, %v1780_v22  ;;  %v1923_v0 = vadd.f32 %v1907_v18, %v1781_v25  ;;  %v1153_v38 = vmul.f32 %v3663_v21, %v1118_v7  ;;  %v1200_v19 = vmul.f32 %v5215_v39, %v1152_v53  ;;  %v5218_v22 = vld [vmem:[#allocation90_spill] sm:$0xff]  ;;  %v5219_v3 = vld [vmem:[#allocation131_spill] sm:$0xff]  ;;  %v5220_v18 = vld [vmem:[#allocation92_spill] sm:$0xff] }
 0x2fd   : > { %v1292_v1 = vmul.f32 %v3677_v27, %v1267_v46  ;;  %v1119_v63 = vsel %vm1112_vm3, %v5213_v37, %v5214_v8  ;;  %v935_v28 = vadd.f32 %v919_v32, %v5216_v42  ;;  %v1293_v48 = vmul.f32 %v3685_v10, %v1259_v6  ;;  %v5221_v37 = vld [vmem:[#allocation67_spill] sm:$0xff] }
 0x2fe   : > { %v1938_v56 = vadd.f32 3.0, %v1922_v58  ;;  %v1939_v57 = vadd.f32 3.0, %v1923_v0  ;;  %v4384_v47 = vpop.permute.xlu1 %1394  ;;  %v1154_v44 = vmul.f32 %v3660_v12, %v1127_v29  ;;  %v1268_v25 = vsel %vm1254_vm4, %v5218_v22, %v5217_v16 }
 0x2ff   : > { %v1401_v15 = vsel %vm1396_vm5, %v5220_v18, %v5219_v3  ;;  %v1409_v32 = vsel %vm1396_vm5, %v5219_v3, %v5220_v18  ;;  %v1076_v53 = vadd.f32 %v1060_v33, %v934_v30  ;;  %v1155_v7 = vmul.f32 %v3663_v21, %v1119_v63  ;;  %v5222_v33 = vld [vmem:[#allocation47_spill] sm:$0xff]  ;;  %v5227_v3 = vld [vmem:[#allocation70_spill] sm:$0xff] }
 0x300   : > { %v1954_v61 = vmax.f32 %v1938_v56, 0.0  ;;  %v1955_v13 = vmax.f32 %v1939_v57, 0.0  ;;  %v1077_v46 = vadd.f32 %v1061_v11, %v935_v28  ;;  %v1201_v35 = vmul.f32 %v5215_v39, %v1153_v38  ;;  %v5225_v28 = vld [vmem:[#allocation117_spill] sm:$0xff] }
 0x301   : > { %v1216_v6 = vadd.f32 %v1200_v19, %v1074_v59  ;;  %v1340_v8 = vmul.f32 %v5221_v37, %v1292_v1  ;;  %v1341_v29 = vmul.f32 %v5221_v37, %v1293_v48  ;;  %v1294_v56 = vmul.f32 %v3677_v27, %v1268_v25  ;;  %v4424_v59 = vpop.permute.xlu0 %1893  ;;  %v5223_v19 = vld [vmem:[#allocation96_spill] sm:$0xff] }
 0x302   : > { %v4411_v62 = vpop.permute.xlu1 %1534  ;;  %v1970_v12 = vmin.f32 %v1954_v61, 6.0  ;;  %v1971_v9 = vmin.f32 %v1955_v13, 6.0  ;;  %v1434_v57 = vmul.f32 %v3689_v5, %v1401_v15  ;;  %v1435_v30 = vmul.f32 %v3696_v24, %v1409_v32  ;;  %v5224_v1 = vld [vmem:[#allocation120_spill] sm:$0xff]  ;;  %v5226_v61 = vld [vmem:[#allocation95_spill] sm:$0xff] }
 0x303   : > { %v1202_v21 = vmul.f32 %v5222_v33, %v1154_v44  ;;  %v1260_v11 = vsel %vm1254_vm4, %v5217_v16, %v5218_v22  ;;  %v1203_v39 = vmul.f32 %v5222_v33, %v1155_v7  ;;  %v1269_v42 = vsel %vm1254_vm4, %v5224_v1, %v5223_v19  ;;  %v5228_v15 = vld [vmem:[#allocation79_spill] sm:$0xff] }
 0x304   : > { %v1986_v63 = vmul.f32 %v1970_v12, %v1922_v58  ;;  %v1987_v38 = vmul.f32 %v1971_v9, %v1923_v0  ;;  %v1576_v48 = vmul.f32 %v3816_v14, %v5225_v28  ;;  %v1577_v13 = vmul.f32 %v3819_v4, %v5226_v61  ;;  %v5231_v28 = vld [vmem:[#allocation119_spill] sm:$0xff]  ;;  %v5232_v61 = vld [vmem:[#allocation98_spill] sm:$0xff] }
 0x305   : > { %v1685_v58 = vsel %vm1680_vm7, %v4256_v34, %v4290_v60  ;;  %v1693_v0 = vsel %vm1680_vm7, %v4290_v60, %v4256_v34  ;;  %v1295_v25 = vmul.f32 %v3685_v10, %v1260_v11  ;;  %v1342_v18 = vmul.f32 %v5227_v3, %v1294_v56  ;;  %v4466_v11 = vpop.permute.xlu0 %1660 }
 0x306   : > { %v4435_v44 = vpop.permute.xlu1 %1674  ;;  %v4445_v16 = vmul.f32 0.16666667, %v1986_v63  ;;  %v4447_v22 = vmul.f32 0.16666667, %v1987_v38  ;;  %v1482_v32 = vmul.f32 %v5228_v15, %v1434_v57  ;;  %v1483_v7 = vmul.f32 %v5228_v15, %v1435_v30  ;;  %v5235_v15 = vld [vmem:[#allocation118_spill] sm:$0xff] }
 0x307   : > { %v1217_v12 = vadd.f32 %v1201_v35, %v1075_v2  ;;  %v1356_v9 = vadd.f32 %v1340_v8, %v4309_v55  ;;  %v1296_v37 = vmul.f32 %v3677_v27, %v1269_v42  ;;  %v1357_v60 = vadd.f32 %v1341_v29, %v4311_v54  ;;  %v5229_v55 = vld [vmem:[#allocation108_spill] sm:$0xff] }
 0x308   : > { %v2021_v34 = vadd.f32 %v4447_v22, %v4445_v16  ;;  %v1261_v33 = vsel %vm1254_vm4, %v5223_v19, %v5224_v1  ;;  %v1718_v56 = vmul.f32 %v3851_v31, %v1685_v58  ;;  %v1719_v57 = vmul.f32 %v3857_v43, %v1693_v0  ;;  %v5230_v1 = vld [vmem:[#allocation72_spill] sm:$0xff] }
 0x309   : > { %v1218_v2 = vadd.f32 %v1202_v21, %v1076_v53  ;;  %v1219_v35 = vadd.f32 %v1203_v39, %v1077_v46  ;;  %v1624_v8 = vmul.f32 %v5229_v55, %v1576_v48  ;;  %v1625_v27 = vmul.f32 %v5229_v55, %v1577_v13  ;;  %v5233_v21 = vld [vmem:[#allocation116_spill] sm:$0xff]  ;;  %v5234_v39 = vld [vmem:[#allocation129_spill] sm:$0xff] }
 0x30a   : > { %v1799_v30 = vpop.permute.xlu1 %1798  ;;  %2022 = vadd.xlane.f32.xlu1 %v2021_v34  ;;  %v1343_v54 = vmul.f32 %v5227_v3, %v1295_v25  ;;  %v1358_v29 = vadd.f32 %v1342_v18, %v1216_v6  ;;  %v1498_v63 = vadd.f32 %v1482_v32, %v1356_v9  ;;  %v1499_v38 = vadd.f32 %v1483_v7, %v1357_v60 }
 0x30b   : > { %v1297_v19 = vmul.f32 %v3685_v10, %v1261_v33  ;;  %v1344_v42 = vmul.f32 %v5230_v1, %v1296_v37  ;;  %v1402_v53 = vsel %vm1396_vm5, %v5232_v61, %v5231_v28  ;;  %v1410_v46 = vsel %vm1396_vm5, %v5231_v28, %v5232_v61 }
 0x30c   : > { %v1403_v6 = vsel %vm1396_vm5, %v5233_v21, %v4202_v26  ;;  %v1411_v10 = vsel %vm1396_vm5, %v4202_v26, %v5233_v21  ;;  %v1766_v48 = vmul.f32 %v5234_v39, %v1718_v56  ;;  %v1767_v13 = vmul.f32 %v5234_v39, %v1719_v57  ;;  %v1801_v56 = vpop.permute.xlu0 %1800 }
 0x30d   : > { %v1640_v0 = vadd.f32 %v1624_v8, %v1498_v63  ;;  %v1641_v25 = vadd.f32 %v1625_v27, %v1499_v38  ;;  %v1544_v32 = vsel %vm1538_vm6, %v5235_v15, %v4230_v51  ;;  %v1552_v26 = vsel %vm1538_vm6, %v4230_v51, %v5235_v15 }
 0x30e   : > { %v1815_v58 = vpop.permute.xlu1 %1814  ;;  %v1436_v37 = vmul.f32 %v3689_v5, %v1402_v53  ;;  %v1437_v34 = vmul.f32 %v3696_v24, %v1410_v46  ;;  %v1438_v60 = vmul.f32 %v3689_v5, %v1403_v6  ;;  %v1439_v33 = vmul.f32 %v3696_v24, %v1411_v10  ;;  %v5236_v6 = vld [vmem:[#allocation81_spill] sm:$0xff] }
 0x30f   : > { %v1827_v3 = vsel %vm1822_vm8, %v1799_v30, %v1815_v58  ;;  %v1835_v18 = vsel %vm1822_vm8, %v1815_v58, %v1799_v30  ;;  %v1782_v57 = vadd.f32 %v1766_v48, %v1640_v0  ;;  %v1783_v30 = vadd.f32 %v1767_v13, %v1641_v25  ;;  %v5239_v0 = vld [vmem:[#allocation111_spill] sm:$0xff] }
 0x310   : > { %v1860_v7 = vmul.f32 %v3883_v17, %v1827_v3  ;;  %v1861_v9 = vmul.f32 %v3886_v41, %v1835_v18  ;;  %v1359_v27 = vadd.f32 %v1343_v54, %v1217_v12  ;;  %v1345_v63 = vmul.f32 %v5230_v1, %v1297_v19  ;;  %v5237_v12 = vld [vmem:[#allocation135_spill] sm:$0xff]  ;;  %v5238_v19 = vld [vmem:[#allocation94_spill] sm:$0xff]  ;;  %v4531_v15 = vpop.permute.xlu0 %1897 }
 0x311   : > { %v1578_v38 = vmul.f32 %v3816_v14, %v1544_v32  ;;  %v1579_v28 = vmul.f32 %v3819_v4, %v1552_v26  ;;  %v1360_v61 = vadd.f32 %v1344_v42, %v1218_v2  ;;  %v1404_v53 = vsel %vm1396_vm5, %v4360_v45, %v4384_v47 }
 0x312   : > { %v1908_v55 = vmul.f32 %v4358_v40, %v1860_v7  ;;  %v1909_v8 = vmul.f32 %v4358_v40, %v1861_v9  ;;  %v1521_v51 = vpop.permute.xlu1 %1520  ;;  %v1484_v10 = vmul.f32 %v5236_v6, %v1436_v37  ;;  %v1485_v40 = vmul.f32 %v5236_v6, %v1437_v34 }
 0x313   : > { %v1686_v54 = vsel %vm1680_vm7, %v5237_v12, %v4435_v44  ;;  %v1694_v2 = vsel %vm1680_vm7, %v4435_v44, %v5237_v12  ;;  %v1486_v1 = vmul.f32 %v5238_v19, %v1438_v60  ;;  %v1487_v42 = vmul.f32 %v5238_v19, %v1439_v33 }
 0x314   : > { %v1924_v46 = vadd.f32 %v1908_v55, %v1782_v57  ;;  %v1925_v21 = vadd.f32 %v1909_v8, %v1783_v30  ;;  %v1361_v58 = vadd.f32 %v1345_v63, %v1219_v35  ;;  %v1626_v25 = vmul.f32 %v5239_v0, %v1578_v38  ;;  %v5240_v8 = vld [vmem:[#allocation134_spill] sm:$0xff]  ;;  %v5242_v38 = vld [vmem:[#allocation132_spill] sm:$0xff]  ;;  %v1679_v12 = vpop.permute.xlu0 %1678 }
 0x315   : > { %v1627_v3 = vmul.f32 %v5239_v0, %v1579_v28  ;;  %v1440_v18 = vmul.f32 %v3689_v5, %v1404_v53  ;;  %v1720_v32 = vmul.f32 %v3851_v31, %v1686_v54  ;;  %v1721_v44 = vmul.f32 %v3857_v43, %v1694_v2 }
 0x316   : > { %v1940_v39 = vadd.f32 3.0, %v1924_v46  ;;  %v1941_v48 = vadd.f32 3.0, %v1925_v21  ;;  %v1537_v13 = vpop.permute.xlu1 %1536  ;;  %v1500_v9 = vadd.f32 %v1484_v10, %v1358_v29  ;;  %v1501_v37 = vadd.f32 %v1485_v40, %v1359_v27 }
 0x317   : > { %v1412_v35 = vsel %vm1396_vm5, %v4384_v47, %v4360_v45  ;;  %v1502_v34 = vadd.f32 %v1486_v1, %v1360_v61  ;;  %v1503_v60 = vadd.f32 %v1487_v42, %v1361_v58  ;;  %v1545_v63 = vsel %vm1538_vm6, %v5240_v8, %v4411_v62  ;;  %v5241_v45 = vld [vmem:[#allocation101_spill] sm:$0xff] }
 0x318   : > { %v1956_v26 = vmax.f32 %v1940_v39, 0.0  ;;  %v1957_v7 = vmax.f32 %v1941_v48, 0.0  ;;  %v1642_v30 = vadd.f32 %v1626_v25, %v1500_v9  ;;  %v1643_v55 = vadd.f32 %v1627_v3, %v1501_v37  ;;  %v1819_v37 = vpop.permute.xlu0 %1818 }
 0x319   : > { %v1553_v29 = vsel %vm1538_vm6, %v4411_v62, %v5240_v8  ;;  %v1441_v27 = vmul.f32 %v3696_v24, %v1412_v35  ;;  %v1488_v47 = vmul.f32 %v5241_v45, %v1440_v18  ;;  %v1768_v28 = vmul.f32 %v5242_v38, %v1720_v32  ;;  %v5243_v32 = vld [vmem:[#allocation113_spill] sm:$0xff] }
 0x31a   : > { %v1677_v33 = vpop.permute.xlu1 %1676  ;;  %v1972_v57 = vmin.f32 %v1956_v26, 6.0  ;;  %v1973_v5 = vmin.f32 %v1957_v7, 6.0  ;;  %v1769_v61 = vmul.f32 %v5242_v38, %v1721_v44  ;;  %v1546_v53 = vsel %vm1538_vm6, %v1521_v51, %v1537_v13  ;;  %v5244_v35 = vld [vmem:[#allocation121_spill] sm:$0xff] }
 0x31b   : > { %v1554_v6 = vsel %vm1538_vm6, %v1537_v13, %v1521_v51  ;;  %v1580_v54 = vmul.f32 %v3816_v14, %v1545_v63  ;;  %v1581_v62 = vmul.f32 %v3819_v4, %v1553_v29  ;;  %v1687_v24 = vsel %vm1680_vm7, %v4466_v11, %v1677_v33  ;;  %v5245_v29 = vld [vmem:[#allocation133_spill] sm:$0xff] }
 0x31c   : > { %v1988_v10 = vmul.f32 %v1972_v57, %v1924_v46  ;;  %v1989_v40 = vmul.f32 %v1973_v5, %v1925_v21  ;;  %v1695_v2 = vsel %vm1680_vm7, %v1677_v33, %v4466_v11  ;;  %v1582_v42 = vmul.f32 %v3816_v14, %v1546_v53 }
 0x31d   : > { %v1583_v39 = vmul.f32 %v3819_v4, %v1554_v6  ;;  %v1489_v11 = vmul.f32 %v5241_v45, %v1441_v27  ;;  %v1784_v58 = vadd.f32 %v1768_v28, %v1642_v30  ;;  %v1785_v0 = vadd.f32 %v1769_v61, %v1643_v55 }
 0x31e   : > { %v1817_v19 = vpop.permute.xlu1 %1816  ;;  %v4567_v46 = vmul.f32 0.16666667, %v1988_v10  ;;  %v4569_v21 = vmul.f32 0.16666667, %v1989_v40  ;;  %v1723_v3 = vmul.f32 %v3857_v43, %v1695_v2  ;;  %v1628_v44 = vmul.f32 %v5243_v32, %v1580_v54  ;;  %v5246_v40 = vld [vmem:[#allocation93_spill] sm:$0xff] }
 0x31f   : > { %v1828_v1 = vsel %vm1822_vm8, %v1801_v56, %v1817_v19  ;;  %v1836_v51 = vsel %vm1822_vm8, %v1817_v19, %v1801_v56  ;;  %v1722_v56 = vmul.f32 %v3851_v31, %v1687_v24  ;;  %v1629_v26 = vmul.f32 %v5243_v32, %v1581_v62 }
 0x320   : > { %v1862_v48 = vmul.f32 %v3883_v17, %v1828_v1  ;;  %v1863_v13 = vmul.f32 %v3886_v41, %v1836_v51  ;;  %v2024_v25 = vadd.f32 %v4569_v21, %v4567_v46  ;;  %v1630_v33 = vmul.f32 %v5244_v35, %v1582_v42 }
 0x321   : > { %v1631_v57 = vmul.f32 %v5244_v35, %v1583_v39  ;;  %v1505_v55 = vadd.f32 %v1489_v11, %v4216_v50  ;;  %v1770_v27 = vmul.f32 %v5245_v29, %v1722_v56  ;;  %v1771_v45 = vmul.f32 %v5245_v29, %v1723_v3 }
 0x322   : > { %v1910_v18 = vmul.f32 %v4394_v52, %v1862_v48  ;;  %v1911_v14 = vmul.f32 %v4394_v52, %v1863_v13  ;;  %v1663_v4 = vpop.permute.xlu1 %1662  ;;  %2025 = vadd.xlane.f32.xlu0 %v2024_v25  ;;  %v1504_v52 = vadd.f32 %v1488_v47, %v4214_v49  ;;  %v1644_v53 = vadd.f32 %v1628_v44, %v1502_v34  ;;  %v1821_v34 = vpop.permute.xlu0 %1820 }
 0x323   : > { %v1688_v7 = vsel %vm1680_vm7, %v1663_v4, %v1679_v12  ;;  %v1696_v9 = vsel %vm1680_vm7, %v1679_v12, %v1663_v4  ;;  %v1645_v6 = vadd.f32 %v1629_v26, %v1503_v60  ;;  %v1647_v47 = vadd.f32 %v1631_v57, %v1505_v55 }
 0x324   : > { %v1926_v5 = vadd.f32 %v1910_v18, %v1784_v58  ;;  %v1927_v30 = vadd.f32 %v1911_v14, %v1785_v0  ;;  %v1724_v8 = vmul.f32 %v3851_v31, %v1688_v7  ;;  %v1725_v63 = vmul.f32 %v3857_v43, %v1696_v9 }
 0x325   : > { %v1646_v50 = vadd.f32 %v1630_v33, %v1504_v52  ;;  %v1786_v60 = vadd.f32 %v1770_v27, %v1644_v53  ;;  %v1787_v2 = vadd.f32 %v1771_v45, %v1645_v6 }
 0x326   : > { %v1942_v38 = vadd.f32 3.0, %v1926_v5  ;;  %v1943_v28 = vadd.f32 3.0, %v1927_v30  ;;  %v1803_v61 = vpop.permute.xlu1 %1802  ;;  %v1772_v12 = vmul.f32 %v5246_v40, %v1724_v8  ;;  %v1773_v54 = vmul.f32 %v5246_v40, %v1725_v63 }
 0x327   : > { %v1829_v10 = vsel %vm1822_vm8, %v1803_v61, %v1819_v37  ;;  %v1837_v49 = vsel %vm1822_vm8, %v1819_v37, %v1803_v61 }
 0x328   : > { %v1864_v31 = vmul.f32 %v3883_v17, %v1829_v10  ;;  %v1865_v43 = vmul.f32 %v3886_v41, %v1837_v49  ;;  %v1958_v62 = vmax.f32 %v1942_v38, 0.0  ;;  %v1959_v24 = vmax.f32 %v1943_v28, 0.0 }
 0x329   : > { %v1788_v56 = vadd.f32 %v1772_v12, %v1646_v50  ;;  %v1789_v3 = vadd.f32 %v1773_v54, %v1647_v47  ;;  %v2046_v54 = vld [vmem:[%s4812_s6 + $0x8] sm:$0xff] }
 0x32a   : > { %v1912_v19 = vmul.f32 %v4424_v59, %v1864_v31  ;;  %v1913_v1 = vmul.f32 %v4424_v59, %v1865_v43  ;;  %v1805_v51 = vpop.permute.xlu1 %1804  ;;  %v1974_v48 = vmin.f32 %v1958_v62, 6.0  ;;  %v1975_v13 = vmin.f32 %v1959_v24, 6.0  ;;  %v2045_v31 = vld [vmem:[%s4812_s6] sm:$0xff]  ;;  %v2047_v62 = vld [vmem:[%s4812_s6 + $0x10] sm:$0xff] }
 0x32b   : > { %v1830_v42 = vsel %vm1822_vm8, %v1805_v51, %v1821_v34  ;;  %v1838_v39 = vsel %vm1822_vm8, %v1821_v34, %v1805_v51 }
 0x32c   : > { %v1928_v11 = vadd.f32 %v1912_v19, %v1786_v60  ;;  %v1929_v58 = vadd.f32 %v1913_v1, %v1787_v2  ;;  %v1866_v0 = vmul.f32 %v3883_v17, %v1830_v42  ;;  %v1867_v25 = vmul.f32 %v3886_v41, %v1838_v39  ;;  %v2048_v2 = vld [vmem:[%s4812_s6 + $0x18] sm:$0xff]  ;;  %v2049_v39 = vld [vmem:[%s4812_s6 + $0x20] sm:$0xff] }
 0x32d   : > { %v1990_v18 = vmul.f32 %v1974_v48, %v1926_v5  ;;  %v1991_v14 = vmul.f32 %v1975_v13, %v1927_v30 }
 0x32e   : > { %v1944_v59 = vadd.f32 3.0, %v1928_v11  ;;  %v1945_v4 = vadd.f32 3.0, %v1929_v58  ;;  %v1914_v32 = vmul.f32 %v4531_v15, %v1866_v0  ;;  %v1915_v44 = vmul.f32 %v4531_v15, %v1867_v25 }
 0x32f   : > { %v4614_v23 = vmul.f32 0.16666667, %v1990_v18  ;;  %v4616_v26 = vmul.f32 0.16666667, %v1991_v14 }
 0x330   : > { %v1930_v7 = vadd.f32 %v1914_v32, %v1788_v56  ;;  %v1931_v9 = vadd.f32 %v1915_v44, %v1789_v3  ;;  %v1960_v37 = vmax.f32 %v1944_v59, 0.0  ;;  %v1961_v17 = vmax.f32 %v1945_v4, 0.0  ;;  %v2051_v4 = vld [vmem:[%s4812_s6 + $0x30] sm:$0xff] }
 0x331   : > { %v2027_v41 = vadd.f32 %v4616_v26, %v4614_v23 }
 0x332   : > { %v1946_v35 = vadd.f32 3.0, %v1930_v7  ;;  %v1947_v33 = vadd.f32 3.0, %v1931_v9  ;;  %v1976_v57 = vmin.f32 %v1960_v37, 6.0  ;;  %v1977_v5 = vmin.f32 %v1961_v17, 6.0 }
 0x333   : > { %2028 = vadd.xlane.f32.xlu1 %v2027_v41 }
 0x334   : > { %v1992_v30 = vmul.f32 %v1976_v57, %v1928_v11  ;;  %v1993_v52 = vmul.f32 %v1977_v5, %v1929_v58  ;;  %v1962_v55 = vmax.f32 %v1946_v35, 0.0  ;;  %v1963_v15 = vmax.f32 %v1947_v33, 0.0  ;;  %v2050_v58 = vld [vmem:[%s4812_s6 + $0x28] sm:$0xff]  ;;  %v2052_v35 = vld [vmem:[%s4812_s6 + $0x38] sm:$0xff] }
 0x336   : > { %v4620_v8 = vmul.f32 0.16666667, %v1992_v30  ;;  %v4622_v63 = vmul.f32 0.16666667, %v1993_v52  ;;  %v1978_v29 = vmin.f32 %v1962_v55, 6.0  ;;  %v1979_v27 = vmin.f32 %v1963_v15, 6.0 }
 0x338   : > { %v2030_v45 = vadd.f32 %v4622_v63, %v4620_v8  ;;  %v1994_v38 = vmul.f32 %v1978_v29, %v1930_v7  ;;  %v1995_v28 = vmul.f32 %v1979_v27, %v1931_v9 }
 0x33a   : > { %2031 = vadd.xlane.f32.xlu0 %v2030_v45  ;;  %v4626_v61 = vmul.f32 0.16666667, %v1994_v38  ;;  %v4628_v53 = vmul.f32 0.16666667, %v1995_v28 }
 0x33c   : > { %v2033_v6 = vadd.f32 %v4628_v53, %v4626_v61 }
 0x33e   : > { %2034 = vadd.xlane.f32.xlu1 %v2033_v6 }
 0x34f   : > { %v2017_v10 = vpop.xlane.xlu0 %2016 }
 0x350   : > { %v2038_v40 = vmul.f32 0.00390625, %v2017_v10  ;;  %v2083_v10 = vld [vmem:[%s4813_s7] sm:$0x1] }
 0x352   : > { %v2054_v19 = vmul.f32 %v2046_v54, %v2038_v40  ;;  %v5247_v40 = vld [vmem:[#allocation127_spill] sm:$0xff]  ;;  %v2089_v54 = vld [vmem:[%s4814_s8 + $0x18] sm:$0xff] }
 0x354   : > { %v2063_v0 = vsel %vm2061_vm9, %v2054_v19, 0.0 }
 0x35c   : > { %v2014_v49 = vpop.xlane.xlu1 %2013 }
 0x35d   : > { %v2037_v47 = vmul.f32 0.00390625, %v2014_v49 }
 0x35f   : > { %v2053_v34 = vmul.f32 %v2045_v31, %v2037_v47  ;;  %v2087_v31 = vld [vmem:[%s4814_s8 + $0x8] sm:$0xff] }
 0x361   : > { %v2062_v48 = vsel %vm2061_vm9, %v2053_v34, 0.0 }
 0x362   : > { %v2064_v3 = vadd.f32 %v2063_v0, %v2062_v48  ;;  %v2092_v0 = vld [vmem:[%s4814_s8 + $0x30] sm:$0xff] }
 0x377   : > { %v2020_v50 = vpop.xlane.xlu0 %2019 }
 0x378   : > { %v2039_v12 = vmul.f32 0.00390625, %v2020_v50 }
 0x37a   : > { %v2055_v1 = vmul.f32 %v2047_v62, %v2039_v12  ;;  %v2088_v62 = vld [vmem:[%s4814_s8 + $0x10] sm:$0xff] }
 0x37c   : > { %v2065_v25 = vsel %vm2061_vm9, %v2055_v1, 0.0 }
 0x37d   : > { %v2066_v59 = vadd.f32 %v2065_v25, %v2064_v3 }
 0x397   : > { %v2023_v43 = vpop.xlane.xlu1 %2022 }
 0x398   : > { %v2040_v60 = vmul.f32 0.00390625, %v2023_v43  ;;  %v2086_v43 = vld [vmem:[%s4814_s8] sm:$0xff] }
 0x39a   : > { %v2056_v13 = vmul.f32 %v2048_v2, %v2040_v60 }
 0x39c   : > { %v2067_v18 = vsel %vm2061_vm9, %v2056_v13, 0.0 }
 0x39d   : > { %v2068_v9 = vadd.f32 %v2067_v18, %v2066_v59 }
 0x3af   : > { %v2026_v24 = vpop.xlane.xlu0 %2025 }
 0x3b0   : > { %v2041_v51 = vmul.f32 0.00390625, %v2026_v24 }
 0x3b2   : > { %v2057_v56 = vmul.f32 %v2049_v39, %v2041_v51  ;;  %v2091_v51 = vld [vmem:[%s4814_s8 + $0x28] sm:$0xff] }
 0x3b4   : > { %v2069_v44 = vsel %vm2061_vm9, %v2057_v56, 0.0 }
 0x3b5   : > { %v2070_v41 = vadd.f32 %v2069_v44, %v2068_v9 }
 0x3c0   : > { %v2029_v42 = vpop.xlane.xlu1 %2028 }
 0x3c1   : > { %v2042_v11 = vmul.f32 0.00390625, %v2029_v42  ;;  %v2090_v42 = vld [vmem:[%s4814_s8 + $0x20] sm:$0xff] }
 0x3c3   : > { %v2058_v14 = vmul.f32 %v2050_v58, %v2042_v11  ;;  %v2093_v58 = vld [vmem:[%s4814_s8 + $0x38] sm:$0xff] }
 0x3c5   : > { %v2071_v37 = vsel %vm2061_vm9, %v2058_v14, 0.0 }
 0x3c6   : > { %v2072_v30 = vadd.f32 %v2071_v37, %v2070_v41  ;;  %v2132_v41 = vld [vmem:[%s4815_s9 + $0x10] sm:$0xff] }
 0x3c7   : > { %v2032_v32 = vpop.xlane.xlu0 %2031 }
 0x3c8   : > { %v2043_v7 = vmul.f32 0.00390625, %v2032_v32  ;;  %v2130_v32 = vld [vmem:[%s4815_s9] sm:$0xff] }
 0x3ca   : > { %v2059_v17 = vmul.f32 %v2051_v4, %v2043_v7  ;;  %v2131_v4 = vld [vmem:[%s4815_s9 + $0x8] sm:$0xff] }
 0x3cb   : > { %v2035_v33 = vpop.xlane.xlu1 %2034 }
 0x3cc   : > { %v2073_v57 = vsel %vm2061_vm9, %v2059_v17, 0.0  ;;  %v2044_v5 = vmul.f32 0.00390625, %v2035_v33  ;;  %v2133_v17 = vld [vmem:[%s4815_s9 + $0x18] sm:$0xff] }
 0x3cd   : > { %v2074_v55 = vadd.f32 %v2073_v57, %v2072_v30 }
 0x3ce   : > { %v2060_v52 = vmul.f32 %v2052_v35, %v2044_v5 }
 0x3d0   : > { %v2075_v15 = vsel %vm2061_vm9, %v2060_v52, 0.0 }
 0x3d1   : > { %v2076_v29 = vadd.f32 %v2075_v15, %v2074_v55  ;;  %v2135_v55 = vld [vmem:[%s4815_s9 + $0x28] sm:$0xff]  ;;  %v2134_v15 = vld [vmem:[%s4815_s9 + $0x20] sm:$0xff] }
 0x3d3   : > { %v2077_v27 = vrot.slane %v2076_v29, 4 }
 0x3d5   : > { %v2078_v45 = vadd.f32 %v2077_v27, %v2076_v29 }
 0x3d7   : > { %v2079_v38 = vrot.slane %v2078_v45, 2 }
 0x3d9   : > { %v2080_v28 = vadd.f32 %v2079_v38, %v2078_v45 }
 0x3db   : > { %v2081_v6 = vrot.slane %v2080_v28, 1 }
 0x3dd   : > { %v2082_v49 = vadd.f32 %v2081_v6, %v2080_v28 }
 0x3df   : > { %v2084_v50 = vadd.f32 %v2083_v10, %v2082_v49  ;;  %v2136_v49 = vld [vmem:[%s4815_s9 + $0x30] sm:$0xff] }
 0x3e1   : > { %v2085_v47 = vmax.f32 %v2084_v50, 0.0 }
 0x3e3   : > { %v2097_v12 = vrot.slane %v2085_v47, %v5247_v40  ;;  %v2137_v40 = vld [vmem:[%s4815_s9 + $0x38] sm:$0xff] }
 0x3e5   : > { %v2099_v24 = vmul.f32 %v2097_v12, %v2087_v31  ;;  %v2098_v34 = vmul.f32 %v2097_v12, %v2086_v43  ;;  %v2101_v19 = vmul.f32 %v2097_v12, %v2089_v54  ;;  %v2100_v1 = vmul.f32 %v2097_v12, %v2088_v62 }
 0x3e6   : > { %v2103_v13 = vmul.f32 %v2097_v12, %v2091_v51  ;;  %v2102_v11 = vmul.f32 %v2097_v12, %v2090_v42  ;;  %v2105_v3 = vmul.f32 %v2097_v12, %v2093_v58  ;;  %v2104_v18 = vmul.f32 %v2097_v12, %v2092_v0 }
 0x3e7   : > { %v2109_v60 = vsel %vm2061_vm9, %v2099_v24, 0.0  ;;  %v2106_v2 = vsel %vm2061_vm9, %v2098_v34, 0.0  ;;  %v2115_v39 = vsel %vm2061_vm9, %v2101_v19, 0.0  ;;  %v2112_v48 = vsel %vm2061_vm9, %v2100_v1, 0.0 }
 0x3e8   : > { %2110 = vadd.xlane.f32.xlu1 %v2109_v60  ;;  %2107 = vadd.xlane.f32.xlu0 %v2106_v2  ;;  %v2121_v25 = vsel %vm2061_vm9, %v2103_v13, 0.0  ;;  %v2118_v56 = vsel %vm2061_vm9, %v2102_v11, 0.0  ;;  %v2127_v14 = vsel %vm2061_vm9, %v2105_v3, 0.0  ;;  %v2124_v59 = vsel %vm2061_vm9, %v2104_v18, 0.0 }
 0x3ec   : > { %2116 = vadd.xlane.f32.xlu1 %v2115_v39  ;;  %2113 = vadd.xlane.f32.xlu0 %v2112_v48 }
 0x3f0   : > { %2122 = vadd.xlane.f32.xlu1 %v2121_v25  ;;  %2119 = vadd.xlane.f32.xlu0 %v2118_v56  ;;  %v2261_v25 = vld [vmem:[%s4817_s11 + $0x8] sm:$0xff] }
 0x3f4   : > { %2128 = vadd.xlane.f32.xlu1 %v2127_v14  ;;  %2125 = vadd.xlane.f32.xlu0 %v2124_v59 }
 0x475   : > { %v2111_v44 = vpop.xlane.xlu1 %2110  ;;  %v2108_v7 = vpop.xlane.xlu0 %2107 }
 0x476   : > { %v2139_v9 = vadd.f32 %v2131_v4, %v2111_v44  ;;  %v2138_v37 = vadd.f32 %v2130_v32, %v2108_v7 }
 0x478   : > { %v2437_v35 = vmul.f32 -1.442695, %v2139_v9  ;;  %v2436_v33 = vmul.f32 -1.442695, %v2138_v37  ;;  %v2260_v37 = vld [vmem:[%s4817_s11] sm:$0xff] }
 0x479   : > { %v2117_v57 = vpop.xlane.xlu1 %2116  ;;  %v2114_v5 = vpop.xlane.xlu0 %2113 }
 0x47a   : > { %2539 = vpow2.f32 %v2437_v35  ;;  %v2141_v30 = vadd.f32 %v2133_v17, %v2117_v57  ;;  %v2140_v52 = vadd.f32 %v2132_v41, %v2114_v5  ;;  %v5248_v41 = vld [vmem:[#allocation14_spill] sm:$0xff] }
 0x47b   : > { %2541 = vpow2.f32 %v2436_v33  ;;  %v5249_v33 = vld [vmem:[#allocation84_spill] sm:$0xff] }
 0x47c   : > { %v2439_v29 = vmul.f32 -1.442695, %v2141_v30  ;;  %v2438_v27 = vmul.f32 -1.442695, %v2140_v52  ;;  %v5250_v30 = vld [vmem:[#allocation103_spill] sm:$0xff] }
 0x47d   : > { %v2123_v45 = vpop.xlane.xlu1 %2122  ;;  %v2120_v38 = vpop.xlane.xlu0 %2119 }
 0x47e   : > { %2543 = vpow2.f32 %v2439_v29  ;;  %v2143_v28 = vadd.f32 %v2135_v55, %v2123_v45  ;;  %v2142_v6 = vadd.f32 %v2134_v15, %v2120_v38  ;;  %v5251_v55 = vld [vmem:[#allocation34_spill] sm:$0xff] }
 0x47f   : > { %2545 = vpow2.f32 %v2438_v27 }
 0x480   : > { %v2440_v10 = vmul.f32 -1.442695, %v2142_v6  ;;  %v2441_v47 = vmul.f32 -1.442695, %v2143_v28 }
 0x481   : > { %v2126_v50 = vpop.xlane.xlu0 %2125  ;;  %v2129_v12 = vpop.xlane.xlu1 %2128 }
 0x482   : > { %2547 = vpow2.f32 %v2440_v10  ;;  %v2144_v31 = vadd.f32 %v2136_v49, %v2126_v50  ;;  %v2145_v34 = vadd.f32 %v2137_v40, %v2129_v12 }
 0x483   : > { %2549 = vpow2.f32 %v2441_v47 }
 0x484   : > { %v2540_v43 = vpop.eup %2539  ;;  %v2442_v60 = vmul.f32 -1.442695, %v2144_v31  ;;  %v2443_v51 = vmul.f32 -1.442695, %v2145_v34 }
 0x485   : > { %v2542_v54 = vpop.eup %2541  ;;  %v2171_v62 = vadd.f32 1.0, %v2540_v43 }
 0x486   : > { %v2170_v24 = vadd.f32 1.0, %v2542_v54 }
 0x487   : > { %2551 = vrcp.f32 %v2171_v62 }
 0x488   : > { %v2544_v2 = vpop.eup %2543  ;;  %2553 = vrcp.f32 %v2170_v24 }
 0x489   : > { %v2546_v19 = vpop.eup %2545  ;;  %2555 = vpow2.f32 %v2442_v60  ;;  %v2173_v42 = vadd.f32 1.0, %v2544_v2  ;;  %v2538_v60 = vld [vmem:[%s4816_s10] sm:$0xff]  }
 0x48a   : > { %v2172_v1 = vadd.f32 1.0, %v2546_v19 }
 0x48c   : > { %2557 = vrcp.f32 %v2172_v1  ;;  %v2548_v39 = vpop.eup %2547 }
 0x48d   : > { %2559 = vpow2.f32 %v2443_v51  ;;  %v2550_v48 = vpop.eup %2549  ;;  %v2174_v13 = vadd.f32 1.0, %v2548_v39  ;;  %v2572_v51 = vld [vmem:[%s2783_s26 + $0x8] sm:$0xff] }
 0x48e   : > { %2561 = vrcp.f32 %v2173_v42  ;;  %v2175_v0 = vadd.f32 1.0, %v2550_v48  ;;  %v2326_v42 = vunpack.c.l.bf16 %v2572_v51 }
 0x48f   : > { %2563 = vrcp.f32 %v2174_v13 }
 0x490   : > { %2565 = vrcp.f32 %v2175_v0 }
 0x491   : > { %v2552_v11 = vpop.eup %2551 }
 0x492   : > { %v2554_v58 = vpop.eup %2553  ;;  %2201 = vperm.xlu1 %2531, %v2552_v11   ;;  %v2327_v11 = vunpack.c.h.bf16 %v2572_v51 }
 0x493   : > { %2196 = vperm.xlu0 %2530, %v2554_v58   ;;  %v2556_v56 = vpop.eup %2555 }
 0x494   : > { %v2176_v18 = vadd.f32 1.0, %v2556_v56 }
 0x496   : > { %v2558_v3 = vpop.eup %2557  ;;  %2567 = vrcp.f32 %v2176_v18 }
 0x497   : > { %2206 = vperm.xlu1 %2531, %v2558_v3   ;;  %2269 = vperm.xlu0 %2530, %v2261_v25   ;;  %v2560_v14 = vpop.eup %2559 }
 0x498   : > { %v2562_v59 = vpop.eup %2561  ;;  %v2177_v4 = vadd.f32 1.0, %v2560_v14 }
 0x499   : > { %v2564_v32 = vpop.eup %2563 }
 0x49a   : > { %2569 = vrcp.f32 %v2177_v4  ;;  %v2566_v44 = vpop.eup %2565 }
 0x49b   : > { %2211 = vperm.xlu1 %2531, %v2562_v59  }
 0x49f   : > { %2216 = vperm.xlu1 %2531, %v2564_v32  }
 0x4a0   : > { %v2568_v7 = vpop.eup %2567 }
 0x4a3   : > { %2221 = vperm.xlu1 %2531, %v2566_v44  }
 0x4a4   : > { %v2570_v9 = vpop.eup %2569 }
 0x4a7   : > { %2226 = vperm.xlu1 %2531, %v2568_v7  }
 0x4ab   : > { %2231 = vperm.xlu1 %2531, %v2570_v9  }
 0x4af   : > { %2264 = vperm.xlu1 %2531, %v2260_v37  }
 0x511   : > { %v2202_v17 = vpop.permute.xlu1 %2201 }
 0x512   : > { %v2236_v35 = vmul.f32 %v2202_v17, %v5248_v41  ;;  %v2237_v57 = vmul.f32 %v2202_v17, %v5249_v33  ;;  %v2197_v5 = vpop.permute.xlu0 %2196 }
 0x513   : > { %v2234_v52 = vmul.f32 %v2197_v5, %v5250_v30  ;;  %v2235_v15 = vmul.f32 %v2197_v5, %v5251_v55 }
 0x515   : > { %v2253_v29 = vpack.c.bf16 %v2237_v57, %v2235_v15  ;;  %v2252_v27 = vpack.c.bf16 %v2236_v35, %v2234_v52 }
 0x516   : > { %v2207_v45 = vpop.permute.xlu1 %2206  ;;  %v2270_v39 = vpop.permute.xlu0 %2269 }
 0x517   : > { %2281 = vmatprep.subr.bf16.mxu1 %v2253_v29  ;;  %v2238_v28 = vmul.f32 %v2207_v45, %v4232_v36  ;;  %v2239_v6 = vmul.f32 %v2207_v45, %v4234_v20 }
 0x518   : > { %2282 = vmatpush1.bf16.msra.mxu1 %v2252_v27 }
 0x51a   : > { %v2212_v38 = vpop.permute.xlu1 %2211 }
 0x51b   : > { %v2240_v10 = vmul.f32 %v2212_v38, %v4445_v16  ;;  %v2241_v49 = vmul.f32 %v2212_v38, %v4447_v22 }
 0x51d   : > { %v2254_v50 = vpack.c.bf16 %v2240_v10, %v2238_v28  ;;  %v2255_v47 = vpack.c.bf16 %v2241_v49, %v2239_v6 }
 0x51e   : > { %v2217_v31 = vpop.permute.xlu1 %2216 }
 0x51f   : > { %2283 = vmatprep.subr.bf16.mxu1 %v2255_v47  ;;  %v2242_v40 = vmul.f32 %v2217_v31, %v4567_v46  ;;  %v2243_v12 = vmul.f32 %v2217_v31, %v4569_v21 }
 0x520   : > { %2284 = vmatpush1.bf16.msra.mxu1 %v2254_v50 }
 0x522   : > { %v2222_v43 = vpop.permute.xlu1 %2221 }
 0x523   : > { %v2244_v54 = vmul.f32 %v2222_v43, %v4614_v23  ;;  %v2245_v36 = vmul.f32 %v2222_v43, %v4616_v26 }
 0x525   : > { %v2256_v62 = vpack.c.bf16 %v2244_v54, %v2242_v40  ;;  %v2257_v20 = vpack.c.bf16 %v2245_v36, %v2243_v12 }
 0x526   : > { %v2227_v16 = vpop.permute.xlu1 %2226 }
 0x527   : > { %2285 = vmatprep.subr.bf16.mxu1 %v2257_v20  ;;  %v2246_v24 = vmul.f32 %v2227_v16, %v4620_v8  ;;  %v2247_v34 = vmul.f32 %v2227_v16, %v4622_v63  ;;  %v2571_v8 = vld [vmem:[%s2783_s26] sm:$0xff] }
 0x528   : > { %2286 = vmatpush1.bf16.msra.mxu1 %v2256_v62  ;;  %v2324_v63 = vunpack.c.l.bf16 %v2571_v8 }
 0x52a   : > { %v2232_v22 = vpop.permute.xlu1 %2231 }
 0x52b   : > { %v2248_v46 = vmul.f32 %v2232_v22, %v4626_v61  ;;  %v2249_v21 = vmul.f32 %v2232_v22, %v4628_v53  ;;  %v2325_v53 = vunpack.c.h.bf16 %v2571_v8 }
 0x52d   : > { %v2258_v23 = vpack.c.bf16 %v2248_v46, %v2246_v24  ;;  %v2259_v26 = vpack.c.bf16 %v2249_v21, %v2247_v34 }
 0x52e   : > { %v2265_v2 = vpop.permute.xlu1 %2264 }
 0x52f   : > { %2287 = vmatprep.subr.bf16.mxu1 %v2259_v26 }
 0x530   : > { %2288 = vmatpush1.bf16.msra.mxu1 %v2258_v23 }
 0x533   : > { %2445 = vmatmul.mubr.msk.bf16.vlgmr.msra.gmra.mrb[0].mxu1 %vm2277_vm10, %v2538_v60 }
 0x606   : > { %v2315_v61 = vpop.f32.mrb[0].mxu1 }
 0x607   : > { %v2316_v19 = vadd.f32 %v2315_v61, %v2265_v2  ;;  %v2317_v1 = vpop.f32.mrb[1].mxu1 }
 0x608   : > { %v2318_v48 = vadd.f32 %v2317_v1, %v2265_v2  ;;  %v2319_v13 = vpop.f32.mrb[2].mxu1 }
 0x609   : > { %v2328_v58 = vadd.f32 %v2324_v63, %v2316_v19  ;;  %v2320_v0 = vadd.f32 %v2319_v13, %v2270_v39  ;;  %v2321_v25 = vpop.f32.mrb[3].mxu1 }
 0x60a   : > { %v2329_v56 = vadd.f32 %v2325_v53, %v2318_v48  ;;  %v2322_v3 = vadd.f32 %v2321_v25, %v2270_v39 }
 0x60b   : > { %2332 = vst [vmem:[%s406_s16] sm:$0xff] %v2328_v58  ;;  %v2330_v18 = vadd.f32 %v2326_v42, %v2320_v0 }
 0x60c   : > { %2333 = vst [vmem:[%s406_s16 + $0x8] sm:$0xff] %v2329_v56  ;;  %v2331_v14 = vadd.f32 %v2327_v11, %v2322_v3 }
 0x60d   : > { %2334 = vst [vmem:[%s406_s16 + $0x10] sm:$0xff] %v2330_v18 }
 0x60e   : > { %2335 = vst [vmem:[%s406_s16 + $0x18] sm:$0xff] %v2331_v14 }
 0x60f   : > { %2586 = shalt.err (!%p2583_p3)
}
 0x610   : > { %s2587_s15 = scalar_lea.hbm %s4760_s30, 512  ;;  %s2591_s26 = scalar_lea.hbm %s4818_s12, 1024 }
 0x611   : > { %p2588_p4 = scmp.ne.s32.totalorder %s4760_s30, %s2587_s15  ;;  %p2592_p9 = scmp.lt.u32.totalorder %s4760_s30, %s4818_s12 }
 0x612   : > { %p2593_p10 = scmp.lt.u32.totalorder %s2591_s26, %s2587_s15  ;;  %p2595_p12 = scmp.lt.u32.totalorder %s2587_s15, %s4760_s30 }
 0x613   : > { %p2589_p7 = pnand %p2588_p4, %p2759_p5 }
 0x614   : > { %p2594_p11 = por %p2593_p10, %p2592_p9 }
 0x615   : > { %p2590_p8 = pneg %p2589_p7 }
 0x616   : > { %p2596_p13 = por %p2595_p12, %p2594_p11 }
 0x618   : > { %p2597_p0 = pnand %p2596_p13, %p2590_p8 }
 0x61a   : > { %2600 = shalt.err (!%p2597_p0)
}
 0x61b   : > { %s2655_s28 = smov 256   ;;  %s5252_s20 = smov 16  }
 0x61c   : > { %2453 = dma.vmem_to_hbm [thread:$0]  (%p2759_p5), %s4755_s17, 512, %s4760_s30, %s4764_s25, %s2655_s28, %s2655_s28, %s5252_s20  }
 0x61d PF: > { %p2459_p1 = scmp.ge.s32.totalorder %s2635_s24, 2  ;;  %s2365_s18 = sand.u32 1, %s2623_s21  }
 0x61e   : > { %s2366_s15 = scalar_lea.sflag [#allocation3], %s2365_s18 }
 0x61f   : > { %p2456_p2 = pnand %p2459_p1, %p2763_p6 }
 0x621   : > { %2618 = dma.done.wait (!%p2456_p2), %s2366_s15, 512  }
 0x622   : > { %2620 = vsyncadd (!%p2456_p2), %s2366_s15, 4294966784  ;;  %s5253_s13 = sld [smem:[#allocation5_spill]]  ;;  %p22_p3 = scmp.ge.s32.totalorder %s2746_s27, 4  }
 0x623   : > { %s5254_s21 = smov %s2627_s22  ;;  %s5255_s22 = smov %s2631_s23 }
 0x624   : > { %s5257_s24 = smov %s2746_s27  ;;  %24 = sbr.rel (!%p22_p3) target bundleno = 5 (0x5), region = 110 }
 0x628   : > { %s5256_s23 = smov %s5253_s13 }
 0x62b   :  { %2371 = vsyncpa [#allocation3], 1 }
 0x62c   :  { %2373 = vsyncpa [#allocation3 + $0x1], 1 }

</bundles_post_ra>
